<compile_context>
chip_gen: v5e
topology: v5e:2x2
jax: 0.10.0
libtpu: 0.0.40
codegen_flags: <defaults>
</compile_context>

<pallas_src>
import jax
import jax.numpy as jnp
from jax import lax
from jax.experimental import pallas as pl
from jax.experimental.pallas import tpu as pltpu

H = 1024  # hidden size, per the module __init__ (Linear in_features=1024)


def _round_up(x, m):
    return ((x + m - 1) // m) * m


def _pick_tile_m(m):
    """MXU-friendly M tile.

    - m <= 1024: a single tile rounded up to the sublane multiple (8) --
      minimal padding, one MXU pass over W1.
    - m  > 1024: a 256-aligned tile in [512, 1024] chosen so the padded tail
      stays small; this always yields >= 2 grid steps, so the "parallel" M
      axis can shard across v7x's two TensorCores, while amortizing the
      ~0.35 us per-step cost and the W1 weight-push on v6e/v7x.
    """
    if m <= 1024:
        return _round_up(m, 8)
    for cand in (1024, 768, 512):
        if _round_up(m, cand) - m < cand // 2:
            return cand
    return 512


def _linear_tanh_heads_kernel(rep_ref, w1_ref, b1_ref, wse_ref, bse_ref,
                              logits_ref):
    # rep_ref: (TILE_M, H) f32   w1_ref: (H, H) bf16   b1_ref: (1, H) f32
    # wse_ref: (2, H) bf16       bse_ref: (2, 1) f32   logits_ref: (2, TILE_M) f32

    # Cast the activation tile to bf16 in-kernel (hidden under the MXU); the
    # wrapper no longer materializes a bf16 copy of [M, H] in HBM.
    a = rep_ref[...].astype(jnp.bfloat16)                      # (TILE_M, H)

    # encoder_linear: Linear(H, H) + Tanh (bf16 MXU inputs, f32 accumulation;
    # activation math stays in f32 so it is safe on v5e's f32-only VPU/EUP).
    h = jnp.dot(a, w1_ref[...],
                preferred_element_type=jnp.float32)            # (TILE_M, H) f32
    h = jnp.tanh(h + b1_ref[...])                              # (TILE_M, H) f32

    # Fused start/end heads: (2, H) . (TILE_M, H)^T over H -> (2, TILE_M).
    # Result is lane-dense (M on the lane axis); no transpose of h needed.
    logits = lax.dot_general(
        wse_ref[...], h.astype(jnp.bfloat16),
        dimension_numbers=(((1,), (1,)), ((), ())),
        preferred_element_type=jnp.float32)                    # (2, TILE_M) f32
    logits_ref[...] = logits + bse_ref[...]


def _masked_softmax_kernel(logits_ref, mask_ref, probs_ref):
    # logits_ref: (2, B, S) f32, mask_ref: (B, S) int32.
    # Softmax over the lane axis S; additive mask bias computed in-kernel
    # (0 where mask==1, -1e30 where mask==0) -- trivial VPU work.
    bias = (mask_ref[...].astype(jnp.float32) - 1.0) * 1e30    # (B, S)
    x = logits_ref[...] + bias[None, :, :]                     # (2, B, S)
    m = jnp.max(x, axis=-1, keepdims=True)                     # (2, B, 1)
    e = jnp.exp(x - m)                                         # (2, B, S)
    d = jnp.sum(e, axis=-1, keepdims=True)                     # (2, B, 1)
    probs_ref[...] = e / d


def aux_trigger_heads(encoder_rep, input_mask, w1, b1, wse, bse):
    """encoder_rep: [B, S, H] f32, input_mask: [B, S] (0/1 int32).

    w1: (H, H), b1: (1, H), wse: (H, 2) = [w_start | w_end], bse: (1, 2).
    Returns (start_prob_seq, end_prob_seq), each [B, S] f32.
    """
    B, S, Hdim = encoder_rep.shape
    M = B * S
    tile_m = _pick_tile_m(M)
    m_pad = _round_up(M, tile_m)

    # Keep the activation in f32 in HBM (cast to bf16 happens in-kernel).
    # Pad only when needed; padded rows are zeros -> tanh/exp stay finite.
    rep_flat = encoder_rep.reshape(M, Hdim)
    if m_pad != M:
        rep_flat = jnp.pad(rep_flat, ((0, m_pad - M), (0, 0)))

    w1_bf = w1.astype(jnp.bfloat16)                    # (H, H)
    b1_f = b1.reshape(1, Hdim).astype(jnp.float32)     # (1, H)
    wse_t = wse.T.astype(jnp.bfloat16)                 # (2, H)
    bse_t = bse.reshape(1, 2).T.astype(jnp.float32)    # (2, 1)

    # Resident operands: whole-array VMEM placement => single-buffered (no
    # per-step re-DMA and no double buffer), the Buffered(1) intent from the
    # perf review.  W1 is 2 MiB bf16 instead of 4 MiB double-buffered.
    resident = pl.BlockSpec(memory_space=pltpu.MemorySpace.VMEM)

    logits_flat = pl.pallas_call(
        _linear_tanh_heads_kernel,
        out_shape=jax.ShapeDtypeStruct((2, m_pad), jnp.float32),
        grid_spec=pltpu.PrefetchScalarGridSpec(
            num_scalar_prefetch=0,
            grid=(m_pad // tile_m,),
            in_specs=[
                pl.BlockSpec((tile_m, Hdim), lambda m: (m, 0)),  # rep tile (f32)
                resident,                                        # W1 (bf16)
                resident,                                        # b1
                resident,                                        # [w_start; w_end]
                resident,                                        # [b_start; b_end]
            ],
            out_specs=pl.BlockSpec((2, tile_m), lambda m: (0, m)),
        ),
        compiler_params=pltpu.CompilerParams(
            dimension_semantics=("parallel",),
            # Headroom for tile_m up to 1024 with an f32 activation tile
            # (double-buffered) on v5e's 16 MiB default scoped limit; still
            # well within v7x's 64 MiB physical VMEM.
            vmem_limit_bytes=48 * 1024 * 1024),
    )(rep_flat, w1_bf, b1_f, wse_t, bse_t)

    # Stay in (2, B, S) layout (pure reshape, no XLA transpose, S lane-dense).
    logits_b = logits_flat[:, :M].reshape(2, B, S)

    # Single-invocation masked softmax over the whole (2, B, S) block — the
    # array is tiny (B*2*S*4 bytes), so one step amortizes all pipeline cost.
    probs = pl.pallas_call(
        _masked_softmax_kernel,
        out_shape=jax.ShapeDtypeStruct((2, B, S), jnp.float32),
        in_specs=[
            pl.BlockSpec(memory_space=pltpu.MemorySpace.VMEM),
            pl.BlockSpec(memory_space=pltpu.MemorySpace.VMEM),
        ],
        out_specs=pl.BlockSpec(memory_space=pltpu.MemorySpace.VMEM),
    )(logits_b, input_mask)

    start_prob_seq = probs[0]   # [B, S], contiguous leading-axis slice
    end_prob_seq = probs[1]     # [B, S]
    return start_prob_seq, end_prob_seq


def synthetic_encoder(input_ids, input_seg, word_emb, type_emb, pos_emb):
    """Stand-in for the pretrained BERT encoder (plain-JAX glue)."""
    rep = word_emb[input_ids] + type_emb[input_seg] + pos_emb[None, :, :]
    return rep.astype(jnp.float32)


def reference_heads(encoder_rep, input_mask, w1, b1, wse, bse):
    h = jnp.tanh(encoder_rep @ w1 + b1)
    logits = h @ wse + bse                                   # (B, S, 2)
    logits = jnp.where(input_mask[:, :, None] == 0, -1e30, logits)
    p = jax.nn.softmax(logits, axis=1)
    return p[..., 0], p[..., 1]


if __name__ == "__main__":
    key = jax.random.PRNGKey(0)
    B, S, VOCAB = 2, 8, 50

    k_ids, k_we, k_te, k_pe, k_w1, k_b1, k_ws, k_we2, k_bs, k_be = (
        jax.random.split(key, 10))

    # Inputs (forward signature: input_ids, input_mask, input_seg)
    input_ids = jax.random.randint(k_ids, (B, S), 0, VOCAB, dtype=jnp.int32)
    lengths = jnp.array([S, 5], dtype=jnp.int32)
    input_mask = (jnp.arange(S)[None, :] < lengths[:, None]).astype(jnp.int32)
    input_seg = jnp.zeros((B, S), dtype=jnp.int32)

    # Synthetic encoder params (deterministic)
    word_emb = 0.02 * jax.random.normal(k_we, (VOCAB, H), jnp.float32)
    type_emb = 0.02 * jax.random.normal(k_te, (2, H), jnp.float32)
    pos_emb = 0.02 * jax.random.normal(k_pe, (S, H), jnp.float32)

    # Head params (shapes from the module __init__)
    w1 = 0.02 * jax.random.normal(k_w1, (H, H), jnp.float32)
    b1 = 0.02 * jax.random.normal(k_b1, (1, H), jnp.float32)
    w_start = 0.02 * jax.random.normal(k_ws, (H,), jnp.float32)
    w_end = 0.02 * jax.random.normal(k_we2, (H,), jnp.float32)
    b_start = 0.02 * jax.random.normal(k_bs, (1,), jnp.float32)
    b_end = 0.02 * jax.random.normal(k_be, (1,), jnp.float32)
    wse = jnp.stack([w_start, w_end], axis=1)        # (H, 2)
    bse = jnp.stack([b_start, b_end], axis=1)        # (1, 2)

    # Forward
    encoder_rep = synthetic_encoder(input_ids, input_seg,
                                    word_emb, type_emb, pos_emb)
    start_p, end_p = aux_trigger_heads(encoder_rep, input_mask,
                                       w1, b1, wse, bse)
    start_p = jax.block_until_ready(start_p)
    end_p = jax.block_until_ready(end_p)

    # Correctness check against plain-JAX f32 reference.
    # Tolerance relaxed vs. a pure-f32 kernel because the matmuls use bf16 MXU
    # inputs (with f32 accumulation).
    ref_start, ref_end = reference_heads(encoder_rep, input_mask,
                                         w1, b1, wse, bse)
    assert start_p.shape == (B, S) and end_p.shape == (B, S)
    assert jnp.allclose(start_p, ref_start, atol=2e-3)
    assert jnp.allclose(end_p, ref_end, atol=2e-3)
    # rows sum to 1 over the sequence axis (normalization is exact f32)
    assert jnp.allclose(start_p.sum(axis=1), 1.0, atol=1e-5)
    assert jnp.allclose(end_p.sum(axis=1), 1.0, atol=1e-5)

    print("KERNEL_OK")
</pallas_src>

<mosaic_0001>
module attributes {stable_mosaic.version = 11 : i64} {
  func.func @_linear_tanh_heads_kernel(%arg0: i32, %arg1: memref<16x1024xf32, #tpu.memory_space<vmem>>, %arg2: memref<1024x1024xbf16, #tpu.memory_space<vmem>>, %arg3: memref<1x1024xf32, #tpu.memory_space<vmem>>, %arg4: memref<2x1024xbf16, #tpu.memory_space<vmem>>, %arg5: memref<2x1xf32, #tpu.memory_space<vmem>>, %arg6: memref<2x16xf32, #tpu.memory_space<vmem>>) attributes {dimension_semantics = [#tpu.dimension_semantics<parallel>], iteration_bounds = array<i64: 1>, scalar_prefetch = 0 : i64, scratch_operands = 0 : i64, tpu.core_type = #tpu.core_type<tc>, window_params = [{transform_indices = @transform_0, window_bounds = array<i64: 16, 1024>}, {pipeline_mode = #tpu.pipeline_mode<synchronous>, transform_indices = @transform_1, window_bounds = array<i64: 1024, 1024>}, {pipeline_mode = #tpu.pipeline_mode<synchronous>, transform_indices = @transform_2, window_bounds = array<i64: 1, 1024>}, {pipeline_mode = #tpu.pipeline_mode<synchronous>, transform_indices = @transform_3, window_bounds = array<i64: 2, 1024>}, {pipeline_mode = #tpu.pipeline_mode<synchronous>, transform_indices = @transform_4, window_bounds = array<i64: 2, 1>}, {transform_indices = @transform_5, window_bounds = array<i64: 2, 16>}]} {
    %c0 = arith.constant 0 : index
    %c0_0 = arith.constant 0 : index
    %0 = vector.load %arg1[%c0, %c0_0] : memref<16x1024xf32, #tpu.memory_space<vmem>>, vector<16x1024xf32>
    %1 = arith.truncf %0 : vector<16x1024xf32> to vector<16x1024xbf16>
    %c0_1 = arith.constant 0 : index
    %c0_2 = arith.constant 0 : index
    %2 = vector.load %arg2[%c0_1, %c0_2] : memref<1024x1024xbf16, #tpu.memory_space<vmem>>, vector<1024x1024xbf16>
    %cst = arith.constant dense<0.000000e+00> : vector<16x1024xf32>
    %3 = tpu.matmul %1, %2, %cst {dimension_numbers = #tpu.dot_dimension_numbers<[1], [0], [0], [1], [0, 0, 1, 1], [], []>} : vector<16x1024xbf16>, vector<1024x1024xbf16>, vector<16x1024xf32> -> vector<16x1024xf32>
    %c0_3 = arith.constant 0 : index
    %c0_4 = arith.constant 0 : index
    %4 = vector.load %arg3[%c0_3, %c0_4] : memref<1x1024xf32, #tpu.memory_space<vmem>>, vector<1x1024xf32>
    %5 = vector.broadcast %4 : vector<1x1024xf32> to vector<16x1024xf32>
    %6 = arith.addf %3, %5 : vector<16x1024xf32>
    %7 = math.tanh %6 : vector<16x1024xf32>
    %c0_5 = arith.constant 0 : index
    %c0_6 = arith.constant 0 : index
    %8 = vector.load %arg4[%c0_5, %c0_6] : memref<2x1024xbf16, #tpu.memory_space<vmem>>, vector<2x1024xbf16>
    %9 = arith.truncf %7 : vector<16x1024xf32> to vector<16x1024xbf16>
    %cst_7 = arith.constant dense<0.000000e+00> : vector<2x16xf32>
    %10 = tpu.matmul %8, %9, %cst_7 {dimension_numbers = #tpu.dot_dimension_numbers<[1], [1], [0], [0], [0, 0, 1, 0], [], []>} : vector<2x1024xbf16>, vector<16x1024xbf16>, vector<2x16xf32> -> vector<2x16xf32>
    %c0_8 = arith.constant 0 : index
    %c0_9 = arith.constant 0 : index
    %11 = vector.load %arg5[%c0_8, %c0_9] : memref<2x1xf32, #tpu.memory_space<vmem>>, vector<2x1xf32>
    %12 = vector.broadcast %11 : vector<2x1xf32> to vector<2x16xf32>
    %13 = arith.addf %10, %12 : vector<2x16xf32>
    %c0_10 = arith.constant 0 : index
    %c0_11 = arith.constant 0 : index
    %14 = vector.load %arg6[%c0_10, %c0_11] : memref<2x16xf32, #tpu.memory_space<vmem>>, vector<2x16xf32>
    tpu.vector_store %arg6[%c0_10, %c0_11], %13 {strides = array<i32>} : memref<2x16xf32, #tpu.memory_space<vmem>>, vector<2x16xf32>,
    return
  }
  func.func @transform_0(%arg0: i32) -> (i32, i32) {
    %c0_i32 = arith.constant 0 : i32
    %c0_i32_0 = arith.constant 0 : i32
    return %arg0, %c0_i32 : i32, i32
  }
  func.func @transform_1(%arg0: i32) -> (i32, i32) {
    %c0_i32 = arith.constant 0 : i32
    %c0_i32_0 = arith.constant 0 : i32
    %c0_i32_1 = arith.constant 0 : i32
    return %c0_i32, %c0_i32_0 : i32, i32
  }
  func.func @transform_2(%arg0: i32) -> (i32, i32) {
    %c0_i32 = arith.constant 0 : i32
    %c0_i32_0 = arith.constant 0 : i32
    %c0_i32_1 = arith.constant 0 : i32
    return %c0_i32, %c0_i32_0 : i32, i32
  }
  func.func @transform_3(%arg0: i32) -> (i32, i32) {
    %c0_i32 = arith.constant 0 : i32
    %c0_i32_0 = arith.constant 0 : i32
    %c0_i32_1 = arith.constant 0 : i32
    return %c0_i32, %c0_i32_0 : i32, i32
  }
  func.func @transform_4(%arg0: i32) -> (i32, i32) {
    %c0_i32 = arith.constant 0 : i32
    %c0_i32_0 = arith.constant 0 : i32
    %c0_i32_1 = arith.constant 0 : i32
    return %c0_i32, %c0_i32_0 : i32, i32
  }
  func.func @transform_5(%arg0: i32) -> (i32, i32) {
    %c0_i32 = arith.constant 0 : i32
    %c0_i32_0 = arith.constant 0 : i32
    return %c0_i32, %arg0 : i32, i32
  }
}

</mosaic_0001>

<bundles_post_ra>
// kernel: tpu_custom_call.1
= control target key start
LH: loop header
LB: loop body
LE: loop exit
PB: predicated region body
PF: predicated region fallthrough
CT: control target
= control target key end

     0   :  { %10 = vsyncpa [#allocation3], 0  ;;  %s7324_s0 = inlined_call_operand.hbm [shape: f32[16,1024], index: 0, kind: input, shape index: {}]   ;;  %s7325_s1 = inlined_call_operand.hbm [shape: bf16[1024,1024], index: 1, kind: input, shape index: {}]   ;;  %s7326_s2 = inlined_call_operand.hbm [shape: f32[1,1024], index: 2, kind: input, shape index: {}]   ;;  %s7327_s3 = inlined_call_operand.hbm [shape: bf16[2,1024], index: 3, kind: input, shape index: {}]   ;;  %s7328_s4 = inlined_call_operand.vmem [shape: f32[2,1], index: 4, kind: input, shape index: {}]   ;;  %s7329_s5 = inlined_call_operand.hbm [shape: f32[2,16], index: 5, kind: output, shape index: {}]  }
   0x1   :  { %11 = vsyncpa [#allocation6], 0 }
   0x2   :  { %12 = vsyncpa [#allocation9], 0  ;;  %s31_s20 = sshll.u32 %s7325_s1, 4  ;;  %s32_s20 = int_to_ptr.hbm [resolvable:$true] %s31_s20 }
   0x3   :  { %13 = vsyncpa [#allocation4], 0  ;;  %s6998_s21 = smov [#allocation5]   ;;  %s18_s25 = sshll.u32 %s7324_s0, 4  ;;  %s19_s25 = int_to_ptr.hbm [resolvable:$true] %s18_s25 }
   0x4   :  { %s33_s22 = sshll.u32 %s6998_s21, 4  ;;  %s6999_s26 = smov 512   ;;  %s34_s22 = int_to_ptr.vmem [resolvable:$true] %s33_s22 }
   0x5   :  { %s7000_s27 = smov 32   ;;  %s7001_s28 = smov [#allocation2]  }
   0x6   :  { %39 = dma.hbm_to_vmem [thread:$0]  %s32_s20, 65536, %s34_s22, [#allocation6], %s6999_s26, %s6999_s26, %s7000_s27  }
   0x7   :  { %s20_s29 = sshll.u32 %s7001_s28, 4  ;;  %s7002_s30 = smov 1024   ;;  %s21_s29 = int_to_ptr.vmem [resolvable:$true] %s20_s29 }
   0x8   :  { %s7003_s6 = smov 64   ;;  %s45_s8 = sshll.u32 %s7326_s2, 4  ;;  %s46_s8 = int_to_ptr.hbm [resolvable:$true] %s45_s8 }
   0x9   :  { %26 = dma.hbm_to_vmem [thread:$0]  %s19_s25, 2048, %s21_s29, [#allocation3], %s7002_s30, %s7002_s30, %s7003_s6  }
   0xa   :  { %s7004_s9 = smov [#allocation7]   ;;  %s56_s12 = sshll.u32 %s7327_s3, 4  ;;  %s57_s12 = int_to_ptr.hbm [resolvable:$true] %s56_s12 }
   0xb   :  { %s47_s10 = sshll.u32 %s7004_s9, 4  ;;  %s7005_s13 = smov [#allocation8]   ;;  %s48_s10 = int_to_ptr.vmem [resolvable:$true] %s47_s10 }
   0xc   :  { %50 = dma.hbm_to_vmem [thread:$0]  %s46_s8, 128, %s48_s10, [#allocation6]  }
   0xd   :  { %s58_s14 = sshll.u32 %s7005_s13, 4  ;;  %s59_s14 = int_to_ptr.vmem [resolvable:$true] %s58_s14 }
   0xe   :  { %61 = dma.hbm_to_vmem [thread:$0]  %s57_s12, 128, %s59_s14, [#allocation9]  }
   0xf   :  { %6990 = dma.done.wait [#allocation3], 2048  }
  0x10   :  { %6991 = vsyncadd [#allocation3], 4294965248 }
  0x11   :  { %6992 = dma.done.wait [#allocation6], 65664  }
  0x12   :  { %6993 = vsyncadd [#allocation6], 4294901632 }
  0x13   :  { %6994 = dma.done.wait [#allocation9], 128  }
  0x14   :  { %6995 = vsyncadd [#allocation9], 4294967168  ;;  %v4491_v0 = vld [vmem:[#allocation5 + $0x1c0] sm:$0xf]  ;;  %s4253_s18 = sshll.u32 %s7329_s5, 4  ;;  %vm4244_vm0 = vcmask 123904   ;;  %s4254_s18 = int_to_ptr.hbm [resolvable:$true] %s4253_s18 }
  0x15   :  { %v6373_v1 = vld [vmem:[#allocation5 + $0x1dc] sm:$0xf0] }
  0x16   :  { %v4747_v2 = vld [vmem:[#allocation5 + $0x3c0] sm:$0xf]  ;;  %v4492_v3 = vor.u32 %v6373_v1, %v4491_v0 }
  0x17   :  { %v6437_v4 = vld [vmem:[#allocation5 + $0x3dc] sm:$0xf0] }
  0x18   :  { %v5003_v5 = vld [vmem:[#allocation5 + $0x5c0] sm:$0xf]  ;;  %v4748_v7 = vor.u32 %v6437_v4, %v4747_v2  ;;  %3195 = vmatpush.bf16.msra.mxu0 %v4492_v3 }
  0x19   :  { %v6501_v6 = vld [vmem:[#allocation5 + $0x5dc] sm:$0xf0] }
  0x1a   :  { %v5004_v8 = vor.u32 %v6501_v6, %v5003_v5  ;;  %v5259_v9 = vld [vmem:[#allocation5 + $0x7c0] sm:$0xf]  ;;  %3209 = vmatpush.bf16.msra.mxu1 %v4748_v7 }
  0x1b   :  { %v6565_v10 = vld [vmem:[#allocation5 + $0x7dc] sm:$0xf0] }
  0x1c   :  { %v4459_v11 = vld [vmem:[#allocation5 + $0x180] sm:$0xf]  ;;  %v5260_v12 = vor.u32 %v6565_v10, %v5259_v9  ;;  %3223 = vmatpush.bf16.msra.mxu2 %v5004_v8 }
  0x1d   :  { %v6365_v13 = vld [vmem:[#allocation5 + $0x19c] sm:$0xf0] }
  0x1e   :  { %v4715_v14 = vld [vmem:[#allocation5 + $0x380] sm:$0xf]  ;;  %v4460_v16 = vor.u32 %v6365_v13, %v4459_v11  ;;  %3237 = vmatpush.bf16.msra.mxu3 %v5260_v12 }
  0x1f   :  { %v6429_v15 = vld [vmem:[#allocation5 + $0x39c] sm:$0xf0] }
  0x20   :  { %v4716_v17 = vor.u32 %v6429_v15, %v4715_v14  ;;  %v4971_v18 = vld [vmem:[#allocation5 + $0x580] sm:$0xf]  ;;  %3196 = vmatpush.bf16.msra.mxu0 %v4460_v16 }
  0x21   :  { %v6493_v19 = vld [vmem:[#allocation5 + $0x59c] sm:$0xf0] }
  0x22   :  { %v5227_v20 = vld [vmem:[#allocation5 + $0x780] sm:$0xf]  ;;  %v4972_v21 = vor.u32 %v6493_v19, %v4971_v18  ;;  %3210 = vmatpush.bf16.msra.mxu1 %v4716_v17 }
  0x23   :  { %v6557_v22 = vld [vmem:[#allocation5 + $0x79c] sm:$0xf0] }
  0x24   :  { %v4427_v23 = vld [vmem:[#allocation5 + $0x140] sm:$0xf]  ;;  %v5228_v25 = vor.u32 %v6557_v22, %v5227_v20  ;;  %3224 = vmatpush.bf16.msra.mxu2 %v4972_v21 }
  0x25   :  { %v6357_v24 = vld [vmem:[#allocation5 + $0x15c] sm:$0xf0] }
  0x26   :  { %v4683_v26 = vld [vmem:[#allocation5 + $0x340] sm:$0xf]  ;;  %v4428_v29 = vor.u32 %v6357_v24, %v4427_v23  ;;  %3238 = vmatpush.bf16.msra.mxu3 %v5228_v25 }
  0x27   :  { %v6421_v27 = vld [vmem:[#allocation5 + $0x35c] sm:$0xf0] }
  0x28   :  { %v4939_v28 = vld [vmem:[#allocation5 + $0x540] sm:$0xf]  ;;  %v4684_v33 = vor.u32 %v6421_v27, %v4683_v26  ;;  %3197 = vmatpush.bf16.msra.mxu0 %v4428_v29 }
  0x29   :  { %v6485_v30 = vld [vmem:[#allocation5 + $0x55c] sm:$0xf0] }
  0x2a   :  { %v5195_v31 = vld [vmem:[#allocation5 + $0x740] sm:$0xf]  ;;  %v4940_v34 = vor.u32 %v6485_v30, %v4939_v28  ;;  %3211 = vmatpush.bf16.msra.mxu1 %v4684_v33 }
  0x2b   :  { %v6549_v32 = vld [vmem:[#allocation5 + $0x75c] sm:$0xf0] }
  0x2c   :  { %v4395_v35 = vld [vmem:[#allocation5 + $0x100] sm:$0xf]  ;;  %v5196_v38 = vor.u32 %v6549_v32, %v5195_v31  ;;  %3225 = vmatpush.bf16.msra.mxu2 %v4940_v34 }
  0x2d   :  { %v6349_v36 = vld [vmem:[#allocation5 + $0x11c] sm:$0xf0] }
  0x2e   :  { %v4651_v37 = vld [vmem:[#allocation5 + $0x300] sm:$0xf]  ;;  %v4396_v44 = vor.u32 %v6349_v36, %v4395_v35  ;;  %3239 = vmatpush.bf16.msra.mxu3 %v5196_v38 }
  0x2f   :  { %v6413_v39 = vld [vmem:[#allocation5 + $0x31c] sm:$0xf0] }
  0x30   :  { %v4907_v40 = vld [vmem:[#allocation5 + $0x500] sm:$0xf]  ;;  %v4652_v45 = vor.u32 %v6413_v39, %v4651_v37  ;;  %3198 = vmatpush.bf16.msra.mxu0 %v4396_v44 }
  0x31   :  { %v6477_v41 = vld [vmem:[#allocation5 + $0x51c] sm:$0xf0] }
  0x32   :  { %v5163_v42 = vld [vmem:[#allocation5 + $0x700] sm:$0xf]  ;;  %v4908_v46 = vor.u32 %v6477_v41, %v4907_v40  ;;  %3212 = vmatpush.bf16.msra.mxu1 %v4652_v45 }
  0x33   :  { %v6541_v43 = vld [vmem:[#allocation5 + $0x71c] sm:$0xf0] }
  0x34   :  { %v4363_v47 = vld [vmem:[#allocation5 + $0xc0] sm:$0xf]  ;;  %v5164_v50 = vor.u32 %v6541_v43, %v5163_v42  ;;  %3226 = vmatpush.bf16.msra.mxu2 %v4908_v46 }
  0x35   :  { %v6341_v48 = vld [vmem:[#allocation5 + $0xdc] sm:$0xf0] }
  0x36   :  { %v4619_v49 = vld [vmem:[#allocation5 + $0x2c0] sm:$0xf]  ;;  %v4364_v56 = vor.u32 %v6341_v48, %v4363_v47  ;;  %3240 = vmatpush.bf16.msra.mxu3 %v5164_v50 }
  0x37   :  { %v6405_v51 = vld [vmem:[#allocation5 + $0x2dc] sm:$0xf0] }
  0x38   :  { %v4875_v52 = vld [vmem:[#allocation5 + $0x4c0] sm:$0xf]  ;;  %v4620_v57 = vor.u32 %v6405_v51, %v4619_v49  ;;  %3199 = vmatpush.bf16.msra.mxu0 %v4364_v56 }
  0x39   :  { %v6469_v53 = vld [vmem:[#allocation5 + $0x4dc] sm:$0xf0] }
  0x3a   :  { %v5131_v54 = vld [vmem:[#allocation5 + $0x6c0] sm:$0xf]  ;;  %v4876_v58 = vor.u32 %v6469_v53, %v4875_v52  ;;  %3213 = vmatpush.bf16.msra.mxu1 %v4620_v57 }
  0x3b   :  { %v6533_v55 = vld [vmem:[#allocation5 + $0x6dc] sm:$0xf0] }
  0x3c   :  { %v4331_v59 = vld [vmem:[#allocation5 + $0x80] sm:$0xf]  ;;  %v5132_v62 = vor.u32 %v6533_v55, %v5131_v54  ;;  %3227 = vmatpush.bf16.msra.mxu2 %v4876_v58  ;;  %v83_v54 = vld [vmem:[#allocation2 + $0x10] sm:$0xff] }
  0x3d   :  { %v6333_v60 = vld [vmem:[#allocation5 + $0x9c] sm:$0xf0] }
  0x3e   :  { %v4587_v61 = vld [vmem:[#allocation5 + $0x280] sm:$0xf]  ;;  %v4332_v4 = vor.u32 %v6333_v60, %v4331_v59  ;;  %3241 = vmatpush.bf16.msra.mxu3 %v5132_v62  ;;  %v91_v59 = vld [vmem:[#allocation2 + $0x50] sm:$0xff] }
  0x3f   :  { %v6397_v63 = vld [vmem:[#allocation5 + $0x29c] sm:$0xf0] }
  0x40   :  { %v4843_v0 = vld [vmem:[#allocation5 + $0x480] sm:$0xf]  ;;  %v4588_v5 = vor.u32 %v6397_v63, %v4587_v61  ;;  %3200 = vmatpush.bf16.msra.mxu0 %v4332_v4 }
  0x41   :  { %v6461_v1 = vld [vmem:[#allocation5 + $0x49c] sm:$0xf0] }
  0x42   :  { %v5099_v2 = vld [vmem:[#allocation5 + $0x680] sm:$0xf]  ;;  %v4844_v6 = vor.u32 %v6461_v1, %v4843_v0  ;;  %3214 = vmatpush.bf16.msra.mxu1 %v4588_v5  ;;  %v7052_v1 = vpack.c.bf16 %v91_v59, %v83_v54 }
  0x43   :  { %v6525_v3 = vld [vmem:[#allocation5 + $0x69c] sm:$0xf0] }
  0x44   :  { %v4299_v7 = vld [vmem:[#allocation5 + $0x40] sm:$0xf]  ;;  %v5100_v10 = vor.u32 %v6525_v3, %v5099_v2  ;;  %3228 = vmatpush.bf16.msra.mxu2 %v4844_v6  ;;  %v82_v6 = vld [vmem:[#allocation2 + $0x8] sm:$0xff] }
  0x45   :  { %v6325_v8 = vld [vmem:[#allocation5 + $0x5c] sm:$0xf0] }
  0x46   :  { %v4555_v9 = vld [vmem:[#allocation5 + $0x240] sm:$0xf]  ;;  %v4300_v16 = vor.u32 %v6325_v8, %v4299_v7  ;;  %3242 = vmatpush.bf16.msra.mxu3 %v5100_v10  ;;  %v90_v7 = vld [vmem:[#allocation2 + $0x48] sm:$0xff]  ;;  %v84_v8 = vld [vmem:[#allocation2 + $0x18] sm:$0xff] }
  0x47   :  { %v6389_v11 = vld [vmem:[#allocation5 + $0x25c] sm:$0xf0]  ;;  %v7056_v10 = vpack.c.bf16 %v90_v7, %v82_v6 }
  0x48   :  { %v4811_v12 = vld [vmem:[#allocation5 + $0x440] sm:$0xf]  ;;  %v4556_v19 = vor.u32 %v6389_v11, %v4555_v9  ;;  %3201 = vmatpush.bf16.msra.mxu0 %v4300_v16  ;;  %v92_v11 = vld [vmem:[#allocation2 + $0x58] sm:$0xff] }
  0x49   :  { %v6453_v13 = vld [vmem:[#allocation5 + $0x45c] sm:$0xf0]  ;;  %7340 = vst [vmem:[#allocation15_spill] sm:$0xff] %v7056_v10 }
  0x4a   :  { %v5067_v14 = vld [vmem:[#allocation5 + $0x640] sm:$0xf]  ;;  %v4812_v20 = vor.u32 %v6453_v13, %v4811_v12  ;;  %3215 = vmatpush.bf16.msra.mxu1 %v4556_v19 }
  0x4b   :  { %v6517_v15 = vld [vmem:[#allocation5 + $0x65c] sm:$0xf0] }
  0x4c   :  { %v4267_v17 = vld [vmem:[#allocation5] sm:$0xf]  ;;  %v5068_v24 = vor.u32 %v6517_v15, %v5067_v14  ;;  %3229 = vmatpush.bf16.msra.mxu2 %v4812_v20 }
  0x4d   :  { %v6317_v18 = vld [vmem:[#allocation5 + $0x1c] sm:$0xf0] }
  0x4e   :  { %v4523_v21 = vld [vmem:[#allocation5 + $0x200] sm:$0xf]  ;;  %v4268_v31 = vor.u32 %v6317_v18, %v4267_v17  ;;  %3243 = vmatpush.bf16.msra.mxu3 %v5068_v24  ;;  %v7058_v17 = vpack.c.bf16 %v92_v11, %v84_v8 }
  0x4f   :  { %v6381_v22 = vld [vmem:[#allocation5 + $0x21c] sm:$0xf0] }
  0x50   :  { %v4779_v23 = vld [vmem:[#allocation5 + $0x400] sm:$0xf]  ;;  %v4524_v35 = vor.u32 %v6381_v22, %v4523_v21  ;;  %3202 = vmatpush.bf16.msra.mxu0 %v4268_v31 }
  0x51   :  { %v6445_v25 = vld [vmem:[#allocation5 + $0x41c] sm:$0xf0] }
  0x52   :  { %v5035_v26 = vld [vmem:[#allocation5 + $0x600] sm:$0xf]  ;;  %v4780_v36 = vor.u32 %v6445_v25, %v4779_v23  ;;  %3216 = vmatpush.bf16.msra.mxu1 %v4524_v35 }
  0x53   :  { %v6509_v27 = vld [vmem:[#allocation5 + $0x61c] sm:$0xf0] }
  0x54   :  { %v5515_v28 = vld [vmem:[#allocation5 + $0x9c0] sm:$0xf]  ;;  %v5036_v39 = vor.u32 %v6509_v27, %v5035_v26  ;;  %3230 = vmatpush.bf16.msra.mxu2 %v4780_v36 }
  0x55   :  { %v6629_v29 = vld [vmem:[#allocation5 + $0x9dc] sm:$0xf0]  ;;  %3217 = vmatmul.bf16.vlgmr.msra.gmra.mxu1 %v7056_v10 }
  0x56   :  { %v5771_v30 = vld [vmem:[#allocation5 + $0xbc0] sm:$0xf]  ;;  %v5516_v40 = vor.u32 %v6629_v29, %v5515_v28  ;;  %3244 = vmatpush.bf16.msra.mxu3 %v5036_v39 }
  0x57   :  { %v6693_v32 = vld [vmem:[#allocation5 + $0xbdc] sm:$0xf0]  ;;  %3231 = vmatmul.bf16.vlgmr.msra.gmra.mxu2 %v7052_v1 }
  0x58   :  { %v6027_v33 = vld [vmem:[#allocation5 + $0xdc0] sm:$0xf]  ;;  %v5772_v43 = vor.u32 %v6693_v32, %v5771_v30  ;;  %3251 = vmatpush.bf16.msrb.mxu0 %v5516_v40 }
  0x59   :  { %v6757_v34 = vld [vmem:[#allocation5 + $0xddc] sm:$0xf0]  ;;  %3245 = vmatmul.bf16.vlgmr.msra.gmra.mxu3 %v7058_v17 }
  0x5a   :  { %v6283_v37 = vld [vmem:[#allocation5 + $0xfc0] sm:$0xf]  ;;  %v6028_v44 = vor.u32 %v6757_v34, %v6027_v33  ;;  %3265 = vmatpush.bf16.msrb.mxu1 %v5772_v43 }
  0x5b   :  { %v6821_v38 = vld [vmem:[#allocation5 + $0xfdc] sm:$0xf0] }
  0x5c   :  { %v5483_v41 = vld [vmem:[#allocation5 + $0x980] sm:$0xf]  ;;  %v6284_v48 = vor.u32 %v6821_v38, %v6283_v37  ;;  %3279 = vmatpush.bf16.msrb.mxu2 %v6028_v44 }
  0x5d   :  { %v6621_v42 = vld [vmem:[#allocation5 + $0x99c] sm:$0xf0] }
  0x5e   :  { %v5739_v45 = vld [vmem:[#allocation5 + $0xb80] sm:$0xf]  ;;  %v5484_v55 = vor.u32 %v6621_v42, %v5483_v41  ;;  %3293 = vmatpush.bf16.msrb.mxu3 %v6284_v48 }
  0x5f   :  { %v6685_v46 = vld [vmem:[#allocation5 + $0xb9c] sm:$0xf0] }
  0x60   :  { %v5995_v47 = vld [vmem:[#allocation5 + $0xd80] sm:$0xf]  ;;  %v5740_v60 = vor.u32 %v6685_v46, %v5739_v45  ;;  %3252 = vmatpush.bf16.msrb.mxu0 %v5484_v55 }
  0x61   :  { %v6749_v49 = vld [vmem:[#allocation5 + $0xd9c] sm:$0xf0] }
  0x62   :  { %v6251_v50 = vld [vmem:[#allocation5 + $0xf80] sm:$0xf]  ;;  %v5996_v61 = vor.u32 %v6749_v49, %v5995_v47  ;;  %3266 = vmatpush.bf16.msrb.mxu1 %v5740_v60 }
  0x63   :  { %v6813_v51 = vld [vmem:[#allocation5 + $0xf9c] sm:$0xf0] }
  0x64   :  { %v81_v52 = vld [vmem:[#allocation2] sm:$0xff]  ;;  %v6252_v2 = vor.u32 %v6813_v51, %v6251_v50  ;;  %3280 = vmatpush.bf16.msrb.mxu2 %v5996_v61 }
  0x65   :  { %v89_v53 = vld [vmem:[#allocation2 + $0x40] sm:$0xff] }
  0x66   :  { %v5451_v56 = vld [vmem:[#allocation5 + $0x940] sm:$0xf]  ;;  %v7050_v58 = vpack.c.bf16 %v89_v53, %v81_v52  ;;  %3294 = vmatpush.bf16.msrb.mxu3 %v6252_v2 }
  0x67   :  { %v6613_v57 = vld [vmem:[#allocation5 + $0x95c] sm:$0xf0] }
  0x68   :  { %v5707_v62 = vld [vmem:[#allocation5 + $0xb40] sm:$0xf]  ;;  %3203 = vmatmul.bf16.vlgmr.msra.gmra.mxu0 %v7050_v58  ;;  %v5452_v9 = vor.u32 %v6613_v57, %v5451_v56 }
  0x69   :  { %v6677_v63 = vld [vmem:[#allocation5 + $0xb5c] sm:$0xf0] }
  0x6a   :  { %v5963_v0 = vld [vmem:[#allocation5 + $0xd40] sm:$0xf]  ;;  %v5708_v12 = vor.u32 %v6677_v63, %v5707_v62  ;;  %3253 = vmatpush.bf16.msrb.mxu0 %v5452_v9  ;;  %v6369_v9 = vld [vmem:[#allocation5 + $0x1c4] sm:$0xf] }
  0x6b   :  { %v6741_v3 = vld [vmem:[#allocation5 + $0xd5c] sm:$0xf0] }
  0x6c   :  { %v6219_v4 = vld [vmem:[#allocation5 + $0xf40] sm:$0xf]  ;;  %v5964_v13 = vor.u32 %v6741_v3, %v5963_v0  ;;  %3267 = vmatpush.bf16.msrb.mxu1 %v5708_v12  ;;  %v4493_v12 = vld [vmem:[#allocation5 + $0x1e0] sm:$0xf0] }
  0x6d   :  { %v6805_v5 = vld [vmem:[#allocation5 + $0xf5c] sm:$0xf0] }
  0x6e   :  { %v5419_v14 = vld [vmem:[#allocation5 + $0x900] sm:$0xf]  ;;  %v6220_v18 = vor.u32 %v6805_v5, %v6219_v4  ;;  %3281 = vmatpush.bf16.msrb.mxu2 %v5964_v13  ;;  %v6433_v13 = vld [vmem:[#allocation5 + $0x3c4] sm:$0xf] }
  0x6f   :  { %v6605_v15 = vld [vmem:[#allocation5 + $0x91c] sm:$0xf0] }
  0x70   :  { %v5675_v16 = vld [vmem:[#allocation5 + $0xb00] sm:$0xf]  ;;  %v5420_v24 = vor.u32 %v6605_v15, %v5419_v14  ;;  %3295 = vmatpush.bf16.msrb.mxu3 %v6220_v18  ;;  %v4749_v14 = vld [vmem:[#allocation5 + $0x3e0] sm:$0xf0] }
  0x71   :  { %v6669_v19 = vld [vmem:[#allocation5 + $0xb1c] sm:$0xf0]  ;;  %v6497_v15 = vld [vmem:[#allocation5 + $0x5c4] sm:$0xf] }
  0x72   :  { %v5931_v20 = vld [vmem:[#allocation5 + $0xd00] sm:$0xf]  ;;  %v5676_v25 = vor.u32 %v6669_v19, %v5675_v16  ;;  %3254 = vmatpush.bf16.msrb.mxu0 %v5420_v24  ;;  %v5005_v16 = vld [vmem:[#allocation5 + $0x5e0] sm:$0xf0] }
  0x73   :  { %v6733_v21 = vld [vmem:[#allocation5 + $0xd1c] sm:$0xf0]  ;;  %v6561_v18 = vld [vmem:[#allocation5 + $0x7c4] sm:$0xf] }
  0x74   :  { %v6187_v22 = vld [vmem:[#allocation5 + $0xf00] sm:$0xf]  ;;  %v5932_v26 = vor.u32 %v6733_v21, %v5931_v20  ;;  %3268 = vmatpush.bf16.msrb.mxu1 %v5676_v25  ;;  %v5261_v20 = vld [vmem:[#allocation5 + $0x7e0] sm:$0xf0]  ;;  %v87_v25 = vld [vmem:[#allocation2 + $0x30] sm:$0xff] }
  0x75   :  { %v6797_v23 = vld [vmem:[#allocation5 + $0xf1c] sm:$0xf0] }
  0x76   :  { %v5387_v27 = vld [vmem:[#allocation5 + $0x8c0] sm:$0xf]  ;;  %v6188_v30 = vor.u32 %v6797_v23, %v6187_v22  ;;  %3282 = vmatpush.bf16.msrb.mxu2 %v5932_v26  ;;  %v95_v26 = vld [vmem:[#allocation2 + $0x70] sm:$0xff] }
  0x77   :  { %v6597_v28 = vld [vmem:[#allocation5 + $0x8dc] sm:$0xf0] }
  0x78   :  { %v5643_v29 = vld [vmem:[#allocation5 + $0xac0] sm:$0xf]  ;;  %v5388_v36 = vor.u32 %v6597_v28, %v5387_v27  ;;  %3296 = vmatpush.bf16.msrb.mxu3 %v6188_v30  ;;  %v86_v27 = vld [vmem:[#allocation2 + $0x28] sm:$0xff] }
  0x79   :  { %v6661_v31 = vld [vmem:[#allocation5 + $0xadc] sm:$0xf0]  ;;  %v94_v30 = vld [vmem:[#allocation2 + $0x68] sm:$0xff] }
  0x7a   :  { %v5899_v32 = vld [vmem:[#allocation5 + $0xcc0] sm:$0xf]  ;;  %v5644_v37 = vor.u32 %v6661_v31, %v5643_v29  ;;  %3255 = vmatpush.bf16.msrb.mxu0 %v5388_v36  ;;  %v4496_v29 = vor.u32 %v6369_v9, %v4493_v12  ;;  %v88_v31 = vld [vmem:[#allocation2 + $0x38] sm:$0xff]  ;;  %v4461_v36 = vld [vmem:[#allocation5 + $0x1a0] sm:$0xf0] }
  0x7b   :  { %v6725_v33 = vld [vmem:[#allocation5 + $0xcdc] sm:$0xf0]  ;;  %v5165_v9 = vld [vmem:[#allocation5 + $0x720] sm:$0xf0] }
  0x7c   :  { %v6155_v34 = vld [vmem:[#allocation5 + $0xec0] sm:$0xf]  ;;  %v5900_v38 = vor.u32 %v6725_v33, %v5899_v32  ;;  %3269 = vmatpush.bf16.msrb.mxu1 %v5644_v37  ;;  %v96_v32 = vld [vmem:[#allocation2 + $0x78] sm:$0xff]  ;;  %v4752_v33 = vor.u32 %v6433_v13, %v4749_v14  ;;  %v6425_v37 = vld [vmem:[#allocation5 + $0x384] sm:$0xf] }
  0x7d   :  { %v6789_v35 = vld [vmem:[#allocation5 + $0xedc] sm:$0xf0]  ;;  %v6337_v14 = vld [vmem:[#allocation5 + $0xc4] sm:$0xf] }
  0x7e   :  { %v5355_v39 = vld [vmem:[#allocation5 + $0x880] sm:$0xf]  ;;  %v6156_v42 = vor.u32 %v6789_v35, %v6155_v34  ;;  %3283 = vmatpush.bf16.msrb.mxu2 %v5900_v38  ;;  %v5008_v34 = vor.u32 %v6497_v15, %v5005_v16  ;;  %v6361_v35 = vld [vmem:[#allocation5 + $0x184] sm:$0xf]  ;;  %v5264_v38 = vor.u32 %v6561_v18, %v5261_v20 }
  0x7f   :  { %v6589_v40 = vld [vmem:[#allocation5 + $0x89c] sm:$0xf0]  ;;  %v4365_v15 = vld [vmem:[#allocation5 + $0xe0] sm:$0xf0] }
  0x80   :  { %v5611_v41 = vld [vmem:[#allocation5 + $0xa80] sm:$0xf]  ;;  %v5356_v48 = vor.u32 %v6589_v40, %v5355_v39  ;;  %3297 = vmatpush.bf16.msrb.mxu3 %v6156_v42  ;;  %v4717_v40 = vld [vmem:[#allocation5 + $0x3a0] sm:$0xf0] }
  0x81   :  { %v6653_v43 = vld [vmem:[#allocation5 + $0xa9c] sm:$0xf0]  ;;  %v4973_v42 = vld [vmem:[#allocation5 + $0x5a0] sm:$0xf0] }
  0x82   :  { %v5867_v44 = vld [vmem:[#allocation5 + $0xc80] sm:$0xf]  ;;  %v5612_v50 = vor.u32 %v6653_v43, %v5611_v41  ;;  %3256 = vmatpush.bf16.msrb.mxu0 %v5356_v48  ;;  %v6489_v41 = vld [vmem:[#allocation5 + $0x584] sm:$0xf]  ;;  %v7064_v43 = vpack.c.bf16 %v95_v26, %v87_v25  ;;  %v4464_v48 = vor.u32 %v6361_v35, %v4461_v36 }
  0x83   :  { %v6717_v45 = vld [vmem:[#allocation5 + $0xc9c] sm:$0xf0]  ;;  %v6401_v16 = vld [vmem:[#allocation5 + $0x2c4] sm:$0xf] }
  0x84   :  { %v6123_v46 = vld [vmem:[#allocation5 + $0xe80] sm:$0xf]  ;;  %v5868_v51 = vor.u32 %v6717_v45, %v5867_v44  ;;  %3270 = vmatpush.bf16.msrb.mxu1 %v5612_v50  ;;  %7342 = vst [vmem:[#allocation17_spill] sm:$0xff] %v7064_v43  ;;  %v7066_v44 = vpack.c.bf16 %v94_v30, %v86_v27  ;;  %v6553_v45 = vld [vmem:[#allocation5 + $0x784] sm:$0xf]  ;;  %v4976_v50 = vor.u32 %v6489_v41, %v4973_v42 }
  0x85   :  { %v6781_v47 = vld [vmem:[#allocation5 + $0xe9c] sm:$0xf0]  ;;  %v6465_v20 = vld [vmem:[#allocation5 + $0x4c4] sm:$0xf] }
  0x86   :  { %v5323_v49 = vld [vmem:[#allocation5 + $0x840] sm:$0xf]  ;;  %v6124_v55 = vor.u32 %v6781_v47, %v6123_v46  ;;  %3284 = vmatpush.bf16.msrb.mxu2 %v5868_v51  ;;  %7343 = vst [vmem:[#allocation18_spill] sm:$0xff] %v7066_v44  ;;  %v5229_v46 = vld [vmem:[#allocation5 + $0x7a0] sm:$0xf0]  ;;  %v7068_v47 = vpack.c.bf16 %v96_v32, %v88_v31 }
  0x87   :  { %v6581_v52 = vld [vmem:[#allocation5 + $0x85c] sm:$0xf0]  ;;  %v6353_v51 = vld [vmem:[#allocation5 + $0x144] sm:$0xf] }
  0x88   :  { %v5579_v53 = vld [vmem:[#allocation5 + $0xa40] sm:$0xf]  ;;  %v5324_v63 = vor.u32 %v6581_v52, %v5323_v49  ;;  %3298 = vmatpush.bf16.msrb.mxu3 %v6124_v55  ;;  %7344 = vst [vmem:[#allocation19_spill] sm:$0xff] %v7068_v47  ;;  %v4720_v49 = vor.u32 %v6425_v37, %v4717_v40  ;;  %v4429_v52 = vld [vmem:[#allocation5 + $0x160] sm:$0xf0] }
  0x89   :  { %v6645_v54 = vld [vmem:[#allocation5 + $0xa5c] sm:$0xf0]  ;;  %v4685_v55 = vld [vmem:[#allocation5 + $0x360] sm:$0xf0] }
  0x8a   :  { %v5835_v56 = vld [vmem:[#allocation5 + $0xc40] sm:$0xf]  ;;  %v5580_v5 = vor.u32 %v6645_v54, %v5579_v53  ;;  %3257 = vmatpush.bf16.msrb.mxu0 %v5324_v63  ;;  %v6417_v53 = vld [vmem:[#allocation5 + $0x344] sm:$0xf]  ;;  %v5232_v54 = vor.u32 %v6553_v45, %v5229_v46 }
  0x8b   :  { %v6709_v57 = vld [vmem:[#allocation5 + $0xc5c] sm:$0xf0]  ;;  %v6329_v27 = vld [vmem:[#allocation5 + $0x84] sm:$0xf] }
  0x8c   :  { %v6091_v59 = vld [vmem:[#allocation5 + $0xe40] sm:$0xf]  ;;  %v5836_v6 = vor.u32 %v6709_v57, %v5835_v56  ;;  %3271 = vmatpush.bf16.msrb.mxu1 %v5580_v5  ;;  %v6481_v56 = vld [vmem:[#allocation5 + $0x544] sm:$0xf] }
  0x8d   :  { %v6773_v60 = vld [vmem:[#allocation5 + $0xe5c] sm:$0xf0]  ;;  %v4941_v57 = vld [vmem:[#allocation5 + $0x560] sm:$0xf0] }
  0x8e   :  { %v5291_v61 = vld [vmem:[#allocation5 + $0x800] sm:$0xf]  ;;  %v6092_v11 = vor.u32 %v6773_v60, %v6091_v59  ;;  %3285 = vmatpush.bf16.msrb.mxu2 %v5836_v6  ;;  %v6545_v59 = vld [vmem:[#allocation5 + $0x744] sm:$0xf]  ;;  %v4944_v63 = vor.u32 %v6481_v56, %v4941_v57 }
  0x8f   :  { %v6573_v62 = vld [vmem:[#allocation5 + $0x81c] sm:$0xf0]  ;;  %v5197_v60 = vld [vmem:[#allocation5 + $0x760] sm:$0xf0] }
  0x90   :  { %v5547_v0 = vld [vmem:[#allocation5 + $0xa00] sm:$0xf]  ;;  %v5292_v19 = vor.u32 %v6573_v62, %v5291_v61  ;;  %3299 = vmatpush.bf16.msrb.mxu3 %v6092_v11  ;;  %v4432_v61 = vor.u32 %v6353_v51, %v4429_v52  ;;  %v4688_v62 = vor.u32 %v6417_v53, %v4685_v55  ;;  %v4653_v5 = vld [vmem:[#allocation5 + $0x320] sm:$0xf0] }
  0x91   :  { %v6637_v2 = vld [vmem:[#allocation5 + $0xa1c] sm:$0xf0]  ;;  %v6473_v6 = vld [vmem:[#allocation5 + $0x504] sm:$0xf] }
  0x92   :  { %v5803_v3 = vld [vmem:[#allocation5 + $0xc00] sm:$0xf]  ;;  %v5548_v23 = vor.u32 %v6637_v2, %v5547_v0  ;;  %3258 = vmatpush.bf16.msrb.mxu0 %v5292_v19  ;;  %v6345_v0 = vld [vmem:[#allocation5 + $0x104] sm:$0xf] }
  0x93   :  { %v6701_v4 = vld [vmem:[#allocation5 + $0xc1c] sm:$0xf0]  ;;  %v4397_v2 = vld [vmem:[#allocation5 + $0x120] sm:$0xf0] }
  0x94   :  { %v6059_v7 = vld [vmem:[#allocation5 + $0xe00] sm:$0xf]  ;;  %v5804_v24 = vor.u32 %v6701_v4, %v5803_v3  ;;  %3272 = vmatpush.bf16.msrb.mxu1 %v5548_v23  ;;  %v6409_v3 = vld [vmem:[#allocation5 + $0x304] sm:$0xf]  ;;  %v5200_v4 = vor.u32 %v6545_v59, %v5197_v60  ;;  %v4400_v11 = vor.u32 %v6345_v0, %v4397_v2 }
  0x95   :  { %v6765_v8 = vld [vmem:[#allocation5 + $0xe1c] sm:$0xf0]  ;;  %v4656_v12 = vor.u32 %v6409_v3, %v4653_v5  ;;  %v4621_v19 = vld [vmem:[#allocation5 + $0x2e0] sm:$0xf0] }
  0x96   :  { %v85_v21 = vld [vmem:[#allocation2 + $0x20] sm:$0xff]  ;;  %v6060_v28 = vor.u32 %v6765_v8, %v6059_v7  ;;  %3286 = vmatpush.bf16.msrb.mxu2 %v5804_v24  ;;  %3307 = vmatpush.bf16.msra.mxu0 %v4496_v29  ;;  %v4368_v24 = vor.u32 %v6337_v14, %v4365_v15  ;;  %v4624_v25 = vor.u32 %v6401_v16, %v4621_v19 }
  0x97   :  { %v93_v22 = vld [vmem:[#allocation2 + $0x60] sm:$0xff]  ;;  %3273 = vmatmul.bf16.vlgmr.msrb.gmra.mxu1 %v7066_v44 }
  0x98   :  { %v7062_v39 = vpack.c.bf16 %v93_v22, %v85_v21  ;;  %3300 = vmatpush.bf16.msrb.mxu3 %v6060_v28  ;;  %3321 = vmatpush.bf16.msra.mxu1 %v4752_v33  ;;  %v4909_v7 = vld [vmem:[#allocation5 + $0x520] sm:$0xf0] }
  0x99   :  { %3287 = vmatmul.bf16.vlgmr.msrb.gmra.mxu2 %v7064_v43  ;;  %v6537_v8 = vld [vmem:[#allocation5 + $0x704] sm:$0xf]  ;;  %v4912_v13 = vor.u32 %v6473_v6, %v4909_v7 }
  0x9a   :  { %7341 = vst [vmem:[#allocation16_spill] sm:$0xff] %v7062_v39  ;;  %3335 = vmatpush.bf16.msra.mxu2 %v5008_v34  ;;  %3259 = vmatmul.bf16.vlgmr.msrb.gmra.mxu0 %v7062_v39  ;;  %v5168_v18 = vor.u32 %v6537_v8, %v5165_v9  ;;  %v4877_v21 = vld [vmem:[#allocation5 + $0x4e0] sm:$0xf0] }
  0x9b   :  { %3301 = vmatmul.bf16.vlgmr.msrb.gmra.mxu3 %v7068_v47  ;;  %3308 = vmatpush.bf16.msra.mxu0 %v4464_v48  ;;  %v6529_v22 = vld [vmem:[#allocation5 + $0x6c4] sm:$0xf]  ;;  %v4880_v26 = vor.u32 %v6465_v20, %v4877_v21 }
  0x9c   :  { %3349 = vmatpush.bf16.msra.mxu3 %v5264_v38  ;;  %3322 = vmatpush.bf16.msra.mxu1 %v4720_v49  ;;  %v5133_v23 = vld [vmem:[#allocation5 + $0x6e0] sm:$0xf0] }
  0x9d   :  { %v4333_v28 = vld [vmem:[#allocation5 + $0xa0] sm:$0xf0]  ;;  %v5136_v30 = vor.u32 %v6529_v22, %v5133_v23 }
  0x9e   :  { %3336 = vmatpush.bf16.msra.mxu2 %v4976_v50  ;;  %v6393_v29 = vld [vmem:[#allocation5 + $0x284] sm:$0xf]  ;;  %v4336_v36 = vor.u32 %v6329_v27, %v4333_v28 }
  0x9f   :  { %3309 = vmatpush.bf16.msra.mxu0 %v4432_v61  ;;  %v4589_v31 = vld [vmem:[#allocation5 + $0x2a0] sm:$0xf0] }
  0xa0   :  { %3350 = vmatpush.bf16.msra.mxu3 %v5232_v54  ;;  %3323 = vmatpush.bf16.msra.mxu1 %v4688_v62  ;;  %v6457_v32 = vld [vmem:[#allocation5 + $0x484] sm:$0xf]  ;;  %v4592_v37 = vor.u32 %v6393_v29, %v4589_v31 }
  0xa1   :  { %v4845_v33 = vld [vmem:[#allocation5 + $0x4a0] sm:$0xf0] }
  0xa2   :  { %3337 = vmatpush.bf16.msra.mxu2 %v4944_v63  ;;  %v6521_v34 = vld [vmem:[#allocation5 + $0x684] sm:$0xf]  ;;  %v4848_v38 = vor.u32 %v6457_v32, %v4845_v33 }
  0xa3   :  { %3310 = vmatpush.bf16.msra.mxu0 %v4400_v11  ;;  %v5101_v35 = vld [vmem:[#allocation5 + $0x6a0] sm:$0xf0] }
  0xa4   :  { %3351 = vmatpush.bf16.msra.mxu3 %v5200_v4  ;;  %3324 = vmatpush.bf16.msra.mxu1 %v4656_v12  ;;  %v6321_v40 = vld [vmem:[#allocation5 + $0x44] sm:$0xf]  ;;  %v5104_v45 = vor.u32 %v6521_v34, %v5101_v35 }
  0xa5   :  { %v4301_v41 = vld [vmem:[#allocation5 + $0x60] sm:$0xf0] }
  0xa6   :  { %3338 = vmatpush.bf16.msra.mxu2 %v4912_v13  ;;  %v6385_v42 = vld [vmem:[#allocation5 + $0x244] sm:$0xf]  ;;  %v4304_v52 = vor.u32 %v6321_v40, %v4301_v41 }
  0xa7   :  { %3311 = vmatpush.bf16.msra.mxu0 %v4368_v24  ;;  %v4557_v46 = vld [vmem:[#allocation5 + $0x260] sm:$0xf0] }
  0xa8   :  { %3352 = vmatpush.bf16.msra.mxu3 %v5168_v18  ;;  %3325 = vmatpush.bf16.msra.mxu1 %v4624_v25  ;;  %v6449_v48 = vld [vmem:[#allocation5 + $0x444] sm:$0xf]  ;;  %v4560_v55 = vor.u32 %v6385_v42, %v4557_v46 }
  0xa9   :  { %v4813_v49 = vld [vmem:[#allocation5 + $0x460] sm:$0xf0] }
  0xaa   :  { %3339 = vmatpush.bf16.msra.mxu2 %v4880_v26  ;;  %v6513_v50 = vld [vmem:[#allocation5 + $0x644] sm:$0xf]  ;;  %v4816_v56 = vor.u32 %v6449_v48, %v4813_v49 }
  0xab   :  { %v5069_v51 = vld [vmem:[#allocation5 + $0x660] sm:$0xf0]  ;;  %3312 = vmatpush.bf16.msra.mxu0 %v4336_v36 }
  0xac   :  { %3353 = vmatpush.bf16.msra.mxu3 %v5136_v30  ;;  %v6313_v53 = vld [vmem:[#allocation5 + $0x4] sm:$0xf]  ;;  %3326 = vmatpush.bf16.msra.mxu1 %v4592_v37  ;;  %v5072_v61 = vor.u32 %v6513_v50, %v5069_v51 }
  0xad   :  { %v4269_v54 = vld [vmem:[#allocation5 + $0x20] sm:$0xf0] }
  0xae   :  { %3340 = vmatpush.bf16.msra.mxu2 %v4848_v38  ;;  %v6377_v57 = vld [vmem:[#allocation5 + $0x204] sm:$0xf]  ;;  %v4272_v5 = vor.u32 %v6313_v53, %v4269_v54 }
  0xaf   :  { %v4525_v59 = vld [vmem:[#allocation5 + $0x220] sm:$0xf0]  ;;  %3313 = vmatpush.bf16.msra.mxu0 %v4304_v52 }
  0xb0   :  { %v6441_v60 = vld [vmem:[#allocation5 + $0x404] sm:$0xf]  ;;  %3354 = vmatpush.bf16.msra.mxu3 %v5104_v45  ;;  %3327 = vmatpush.bf16.msra.mxu1 %v4560_v55  ;;  %v4528_v9 = vor.u32 %v6377_v57, %v4525_v59 }
  0xb1   :  { %v4781_v62 = vld [vmem:[#allocation5 + $0x420] sm:$0xf0] }
  0xb2   :  { %v6505_v63 = vld [vmem:[#allocation5 + $0x604] sm:$0xf]  ;;  %3341 = vmatpush.bf16.msra.mxu2 %v4816_v56  ;;  %v4784_v11 = vor.u32 %v6441_v60, %v4781_v62 }
  0xb3   :  { %v5037_v0 = vld [vmem:[#allocation5 + $0x620] sm:$0xf0]  ;;  %3314 = vmatpush.bf16.msra.mxu0 %v4272_v5 }
  0xb4   :  { %v6625_v2 = vld [vmem:[#allocation5 + $0x9c4] sm:$0xf]  ;;  %3355 = vmatpush.bf16.msra.mxu3 %v5072_v61  ;;  %v5040_v14 = vor.u32 %v6505_v63, %v5037_v0  ;;  %3328 = vmatpush.bf16.msra.mxu1 %v4528_v9 }
  0xb5   :  { %v5517_v3 = vld [vmem:[#allocation5 + $0x9e0] sm:$0xf0] }
  0xb6   :  { %v6689_v4 = vld [vmem:[#allocation5 + $0xbc4] sm:$0xf]  ;;  %v5520_v15 = vor.u32 %v6625_v2, %v5517_v3  ;;  %3342 = vmatpush.bf16.msra.mxu2 %v4784_v11  ;;  %3315 = vmatmul.bf16.vlgmr.msra.gmra.mxu0 %v7050_v58 }
  0xb7   :  { %v5773_v6 = vld [vmem:[#allocation5 + $0xbe0] sm:$0xf0]  ;;  %3329 = vmatmul.bf16.vlgmr.msra.gmra.mxu1 %v7056_v10 }
  0xb8   :  { %v6753_v7 = vld [vmem:[#allocation5 + $0xdc4] sm:$0xf]  ;;  %v5776_v16 = vor.u32 %v6689_v4, %v5773_v6  ;;  %3356 = vmatpush.bf16.msra.mxu3 %v5040_v14  ;;  %3363 = vmatpush.bf16.msrb.mxu0 %v5520_v15 }
  0xb9   :  { %v6029_v8 = vld [vmem:[#allocation5 + $0xde0] sm:$0xf0]  ;;  %3343 = vmatmul.bf16.vlgmr.msra.gmra.mxu2 %v7052_v1 }
  0xba   :  { %v6817_v12 = vld [vmem:[#allocation5 + $0xfc4] sm:$0xf]  ;;  %v6032_v18 = vor.u32 %v6753_v7, %v6029_v8  ;;  %3377 = vmatpush.bf16.msrb.mxu1 %v5776_v16 }
  0xbb   :  { %v6285_v13 = vld [vmem:[#allocation5 + $0xfe0] sm:$0xf0]  ;;  %3357 = vmatmul.bf16.vlgmr.msra.gmra.mxu3 %v7058_v17 }
  0xbc   :  { %v6617_v19 = vld [vmem:[#allocation5 + $0x984] sm:$0xf]  ;;  %v6288_v22 = vor.u32 %v6817_v12, %v6285_v13  ;;  %3391 = vmatpush.bf16.msrb.mxu2 %v6032_v18 }
  0xbd   :  { %v5485_v20 = vld [vmem:[#allocation5 + $0x9a0] sm:$0xf0] }
  0xbe   :  { %v6681_v21 = vld [vmem:[#allocation5 + $0xb84] sm:$0xf]  ;;  %v5488_v28 = vor.u32 %v6617_v19, %v5485_v20  ;;  %3405 = vmatpush.bf16.msrb.mxu3 %v6288_v22 }
  0xbf   :  { %v5741_v23 = vld [vmem:[#allocation5 + $0xba0] sm:$0xf0] }
  0xc0   :  { %v6745_v24 = vld [vmem:[#allocation5 + $0xd84] sm:$0xf]  ;;  %v5744_v29 = vor.u32 %v6681_v21, %v5741_v23  ;;  %3364 = vmatpush.bf16.msrb.mxu0 %v5488_v28 }
  0xc1   :  { %v5997_v25 = vld [vmem:[#allocation5 + $0xda0] sm:$0xf0] }
  0xc2   :  { %v6809_v26 = vld [vmem:[#allocation5 + $0xf84] sm:$0xf]  ;;  %v6000_v30 = vor.u32 %v6745_v24, %v5997_v25  ;;  %3378 = vmatpush.bf16.msrb.mxu1 %v5744_v29 }
  0xc3   :  { %v6253_v27 = vld [vmem:[#allocation5 + $0xfa0] sm:$0xf0] }
  0xc4   :  { %v6609_v31 = vld [vmem:[#allocation5 + $0x944] sm:$0xf]  ;;  %v6256_v34 = vor.u32 %v6809_v26, %v6253_v27  ;;  %3392 = vmatpush.bf16.msrb.mxu2 %v6000_v30 }
  0xc5   :  { %v5453_v32 = vld [vmem:[#allocation5 + $0x960] sm:$0xf0] }
  0xc6   :  { %v6673_v33 = vld [vmem:[#allocation5 + $0xb44] sm:$0xf]  ;;  %v5456_v41 = vor.u32 %v6609_v31, %v5453_v32  ;;  %3406 = vmatpush.bf16.msrb.mxu3 %v6256_v34 }
  0xc7   :  { %v5709_v35 = vld [vmem:[#allocation5 + $0xb60] sm:$0xf0] }
  0xc8   :  { %v6737_v36 = vld [vmem:[#allocation5 + $0xd44] sm:$0xf]  ;;  %v5712_v42 = vor.u32 %v6673_v33, %v5709_v35  ;;  %3365 = vmatpush.bf16.msrb.mxu0 %v5456_v41 }
  0xc9   :  { %v5965_v37 = vld [vmem:[#allocation5 + $0xd60] sm:$0xf0] }
  0xca   :  { %v6801_v38 = vld [vmem:[#allocation5 + $0xf44] sm:$0xf]  ;;  %v5968_v45 = vor.u32 %v6737_v36, %v5965_v37  ;;  %3379 = vmatpush.bf16.msrb.mxu1 %v5712_v42 }
  0xcb   :  { %v6221_v40 = vld [vmem:[#allocation5 + $0xf60] sm:$0xf0] }
  0xcc   :  { %v6601_v46 = vld [vmem:[#allocation5 + $0x904] sm:$0xf]  ;;  %v6224_v50 = vor.u32 %v6801_v38, %v6221_v40  ;;  %3393 = vmatpush.bf16.msrb.mxu2 %v5968_v45 }
  0xcd   :  { %v5421_v48 = vld [vmem:[#allocation5 + $0x920] sm:$0xf0] }
  0xce   :  { %v6665_v49 = vld [vmem:[#allocation5 + $0xb04] sm:$0xf]  ;;  %v5424_v56 = vor.u32 %v6601_v46, %v5421_v48  ;;  %3407 = vmatpush.bf16.msrb.mxu3 %v6224_v50  ;;  %v4499_v48 = vld [vmem:[#allocation5 + $0x1c8] sm:$0xf] }
  0xcf   :  { %v5677_v51 = vld [vmem:[#allocation5 + $0xb20] sm:$0xf0]  ;;  %v4755_v50 = vld [vmem:[#allocation5 + $0x3c8] sm:$0xf] }
  0xd0   :  { %v6729_v52 = vld [vmem:[#allocation5 + $0xd04] sm:$0xf]  ;;  %v5680_v57 = vor.u32 %v6665_v49, %v5677_v51  ;;  %3366 = vmatpush.bf16.msrb.mxu0 %v5424_v56  ;;  %v6374_v49 = vld [vmem:[#allocation5 + $0x1e4] sm:$0xf0] }
  0xd1   :  { %v5933_v53 = vld [vmem:[#allocation5 + $0xd20] sm:$0xf0] }
  0xd2   :  { %v6793_v54 = vld [vmem:[#allocation5 + $0xf04] sm:$0xf]  ;;  %v5936_v59 = vor.u32 %v6729_v52, %v5933_v53  ;;  %3380 = vmatpush.bf16.msrb.mxu1 %v5680_v57  ;;  %v6438_v52 = vld [vmem:[#allocation5 + $0x3e4] sm:$0xf0] }
  0xd3   :  { %v6189_v55 = vld [vmem:[#allocation5 + $0xf20] sm:$0xf0]  ;;  %v5011_v53 = vld [vmem:[#allocation5 + $0x5c8] sm:$0xf] }
  0xd4   :  { %v6593_v60 = vld [vmem:[#allocation5 + $0x8c4] sm:$0xf]  ;;  %v6192_v63 = vor.u32 %v6793_v54, %v6189_v55  ;;  %3394 = vmatpush.bf16.msrb.mxu2 %v5936_v59  ;;  %v6502_v54 = vld [vmem:[#allocation5 + $0x5e4] sm:$0xf0] }
  0xd5   :  { %v5389_v61 = vld [vmem:[#allocation5 + $0x8e0] sm:$0xf0]  ;;  %v5267_v57 = vld [vmem:[#allocation5 + $0x7c8] sm:$0xf] }
  0xd6   :  { %v6657_v62 = vld [vmem:[#allocation5 + $0xac4] sm:$0xf]  ;;  %v5392_v6 = vor.u32 %v6593_v60, %v5389_v61  ;;  %3408 = vmatpush.bf16.msrb.mxu3 %v6192_v63  ;;  %v6566_v59 = vld [vmem:[#allocation5 + $0x7e4] sm:$0xf0]  ;;  %v4500_v61 = vor.u32 %v6374_v49, %v4499_v48  ;;  %v5012_v63 = vor.u32 %v6502_v54, %v5011_v53 }
  0xd7   :  { %v5645_v0 = vld [vmem:[#allocation5 + $0xae0] sm:$0xf0]  ;;  %v4883_v48 = vld [vmem:[#allocation5 + $0x4c8] sm:$0xf] }
  0xd8   :  { %v6721_v2 = vld [vmem:[#allocation5 + $0xcc4] sm:$0xf]  ;;  %v5648_v7 = vor.u32 %v6657_v62, %v5645_v0  ;;  %3367 = vmatpush.bf16.msrb.mxu0 %v5392_v6  ;;  %v4756_v62 = vor.u32 %v6438_v52, %v4755_v50  ;;  %v4467_v0 = vld [vmem:[#allocation5 + $0x188] sm:$0xf] }
  0xd9   :  { %v5901_v3 = vld [vmem:[#allocation5 + $0xce0] sm:$0xf0]  ;;  %v4979_v6 = vld [vmem:[#allocation5 + $0x588] sm:$0xf] }
  0xda   :  { %v6785_v4 = vld [vmem:[#allocation5 + $0xec4] sm:$0xf]  ;;  %v5904_v8 = vor.u32 %v6721_v2, %v5901_v3  ;;  %3381 = vmatpush.bf16.msrb.mxu1 %v5648_v7  ;;  %v6366_v2 = vld [vmem:[#allocation5 + $0x1a4] sm:$0xf0] }
  0xdb   :  { %v6157_v5 = vld [vmem:[#allocation5 + $0xee0] sm:$0xf0]  ;;  %v4723_v3 = vld [vmem:[#allocation5 + $0x388] sm:$0xf] }
  0xdc   :  { %v6585_v9 = vld [vmem:[#allocation5 + $0x884] sm:$0xf]  ;;  %v6160_v13 = vor.u32 %v6785_v4, %v6157_v5  ;;  %3395 = vmatpush.bf16.msrb.mxu2 %v5904_v8  ;;  %v5268_v4 = vor.u32 %v6566_v59, %v5267_v57  ;;  %v6430_v5 = vld [vmem:[#allocation5 + $0x3a4] sm:$0xf0] }
  0xdd   :  { %v5357_v11 = vld [vmem:[#allocation5 + $0x8a0] sm:$0xf0]  ;;  %v6494_v7 = vld [vmem:[#allocation5 + $0x5a4] sm:$0xf0] }
  0xde   :  { %v6649_v12 = vld [vmem:[#allocation5 + $0xa84] sm:$0xf]  ;;  %v5360_v20 = vor.u32 %v6585_v9, %v5357_v11  ;;  %3409 = vmatpush.bf16.msrb.mxu3 %v6160_v13  ;;  %v5235_v8 = vld [vmem:[#allocation5 + $0x788] sm:$0xf]  ;;  %v4468_v11 = vor.u32 %v6366_v2, %v4467_v0  ;;  %v4980_v13 = vor.u32 %v6494_v7, %v4979_v6 }
  0xdf   :  { %v5613_v14 = vld [vmem:[#allocation5 + $0xaa0] sm:$0xf0]  ;;  %v6558_v9 = vld [vmem:[#allocation5 + $0x7a4] sm:$0xf0] }
  0xe0   :  { %v6713_v15 = vld [vmem:[#allocation5 + $0xc84] sm:$0xf]  ;;  %v5616_v21 = vor.u32 %v6649_v12, %v5613_v14  ;;  %3368 = vmatpush.bf16.msrb.mxu0 %v5360_v20  ;;  %v4724_v12 = vor.u32 %v6430_v5, %v4723_v3  ;;  %v4435_v14 = vld [vmem:[#allocation5 + $0x148] sm:$0xf] }
  0xe1   :  { %v5869_v16 = vld [vmem:[#allocation5 + $0xca0] sm:$0xf0]  ;;  %v4947_v20 = vld [vmem:[#allocation5 + $0x548] sm:$0xf] }
  0xe2   :  { %v6777_v18 = vld [vmem:[#allocation5 + $0xe84] sm:$0xf]  ;;  %v5872_v22 = vor.u32 %v6713_v15, %v5869_v16  ;;  %3382 = vmatpush.bf16.msrb.mxu1 %v5616_v21  ;;  %v6358_v15 = vld [vmem:[#allocation5 + $0x164] sm:$0xf0] }
  0xe3   :  { %v6125_v19 = vld [vmem:[#allocation5 + $0xea0] sm:$0xf0]  ;;  %v4691_v16 = vld [vmem:[#allocation5 + $0x348] sm:$0xf] }
  0xe4   :  { %v6577_v23 = vld [vmem:[#allocation5 + $0x844] sm:$0xf]  ;;  %v6128_v26 = vor.u32 %v6777_v18, %v6125_v19  ;;  %3396 = vmatpush.bf16.msrb.mxu2 %v5872_v22  ;;  %v5236_v18 = vor.u32 %v6558_v9, %v5235_v8  ;;  %v6422_v19 = vld [vmem:[#allocation5 + $0x364] sm:$0xf0] }
  0xe5   :  { %v5325_v24 = vld [vmem:[#allocation5 + $0x860] sm:$0xf0]  ;;  %v6486_v21 = vld [vmem:[#allocation5 + $0x564] sm:$0xf0] }
  0xe6   :  { %v6641_v25 = vld [vmem:[#allocation5 + $0xa44] sm:$0xf]  ;;  %v5328_v32 = vor.u32 %v6577_v23, %v5325_v24  ;;  %3410 = vmatpush.bf16.msrb.mxu3 %v6128_v26  ;;  %v5203_v22 = vld [vmem:[#allocation5 + $0x748] sm:$0xf]  ;;  %v4436_v24 = vor.u32 %v6358_v15, %v4435_v14  ;;  %v4948_v26 = vor.u32 %v6486_v21, %v4947_v20 }
  0xe7   :  { %v5581_v27 = vld [vmem:[#allocation5 + $0xa60] sm:$0xf0]  ;;  %v6550_v23 = vld [vmem:[#allocation5 + $0x764] sm:$0xf0] }
  0xe8   :  { %v6705_v28 = vld [vmem:[#allocation5 + $0xc44] sm:$0xf]  ;;  %v5584_v35 = vor.u32 %v6641_v25, %v5581_v27  ;;  %3369 = vmatpush.bf16.msrb.mxu0 %v5328_v32  ;;  %v4692_v25 = vor.u32 %v6422_v19, %v4691_v16  ;;  %v4403_v27 = vld [vmem:[#allocation5 + $0x108] sm:$0xf] }
  0xe9   :  { %v5837_v29 = vld [vmem:[#allocation5 + $0xc60] sm:$0xf0]  ;;  %v4915_v32 = vld [vmem:[#allocation5 + $0x508] sm:$0xf] }
  0xea   :  { %v6769_v30 = vld [vmem:[#allocation5 + $0xe44] sm:$0xf]  ;;  %v5840_v36 = vor.u32 %v6705_v28, %v5837_v29  ;;  %3383 = vmatpush.bf16.msrb.mxu1 %v5584_v35  ;;  %v6350_v28 = vld [vmem:[#allocation5 + $0x124] sm:$0xf0] }
  0xeb   :  { %v6093_v31 = vld [vmem:[#allocation5 + $0xe60] sm:$0xf0]  ;;  %v4659_v29 = vld [vmem:[#allocation5 + $0x308] sm:$0xf] }
  0xec   :  { %v6569_v33 = vld [vmem:[#allocation5 + $0x804] sm:$0xf]  ;;  %v6096_v41 = vor.u32 %v6769_v30, %v6093_v31  ;;  %3397 = vmatpush.bf16.msrb.mxu2 %v5840_v36  ;;  %v5204_v30 = vor.u32 %v6550_v23, %v5203_v22  ;;  %v6414_v31 = vld [vmem:[#allocation5 + $0x324] sm:$0xf0]  ;;  %v4404_v36 = vor.u32 %v6350_v28, %v4403_v27 }
  0xed   :  { %v5293_v34 = vld [vmem:[#allocation5 + $0x820] sm:$0xf0]  ;;  %v6542_v35 = vld [vmem:[#allocation5 + $0x724] sm:$0xf0] }
  0xee   :  { %v6633_v37 = vld [vmem:[#allocation5 + $0xa04] sm:$0xf]  ;;  %v5296_v51 = vor.u32 %v6569_v33, %v5293_v34  ;;  %3411 = vmatpush.bf16.msrb.mxu3 %v6096_v41  ;;  %v6478_v33 = vld [vmem:[#allocation5 + $0x524] sm:$0xf0] }
  0xef   :  { %v5549_v38 = vld [vmem:[#allocation5 + $0xa20] sm:$0xf0]  ;;  %v5171_v34 = vld [vmem:[#allocation5 + $0x708] sm:$0xf] }
  0xf0   :  { %v6697_v40 = vld [vmem:[#allocation5 + $0xc04] sm:$0xf]  ;;  %v5552_v55 = vor.u32 %v6633_v37, %v5549_v38  ;;  %3370 = vmatpush.bf16.msrb.mxu0 %v5296_v51  ;;  %v4660_v37 = vor.u32 %v6414_v31, %v4659_v29  ;;  %v4916_v38 = vor.u32 %v6478_v33, %v4915_v32  ;;  %v6342_v41 = vld [vmem:[#allocation5 + $0xe4] sm:$0xf0] }
  0xf1   :  { %v5805_v42 = vld [vmem:[#allocation5 + $0xc20] sm:$0xf0]  ;;  %v6470_v49 = vld [vmem:[#allocation5 + $0x4e4] sm:$0xf0] }
  0xf2   :  { %v6761_v45 = vld [vmem:[#allocation5 + $0xe04] sm:$0xf]  ;;  %v5808_v56 = vor.u32 %v6697_v40, %v5805_v42  ;;  %3384 = vmatpush.bf16.msrb.mxu1 %v5552_v55  ;;  %v4371_v40 = vld [vmem:[#allocation5 + $0xc8] sm:$0xf]  ;;  %v4884_v54 = vor.u32 %v6470_v49, %v4883_v48 }
  0xf3   :  { %v6061_v46 = vld [vmem:[#allocation5 + $0xe20] sm:$0xf0]  ;;  %3371 = vmatmul.bf16.vlgmr.msrb.gmra.mxu0 %v7062_v39  ;;  %v4627_v42 = vld [vmem:[#allocation5 + $0x2c8] sm:$0xf]  ;;  %v4372_v52 = vor.u32 %v6342_v41, %v4371_v40 }
  0xf4   :  { %v6064_v60 = vor.u32 %v6761_v45, %v6061_v46  ;;  %3398 = vmatpush.bf16.msrb.mxu2 %v5808_v56  ;;  %3419 = vmatpush.bf16.msra.mxu0 %v4500_v61  ;;  %v5172_v45 = vor.u32 %v6542_v35, %v5171_v34  ;;  %v6406_v46 = vld [vmem:[#allocation5 + $0x2e4] sm:$0xf0] }
  0xf5   :  { %3385 = vmatmul.bf16.vlgmr.msrb.gmra.mxu1 %v7066_v44  ;;  %v5139_v50 = vld [vmem:[#allocation5 + $0x6c8] sm:$0xf]  ;;  %v4628_v53 = vor.u32 %v6406_v46, %v4627_v42 }
  0xf6   :  { %3412 = vmatpush.bf16.msrb.mxu3 %v6064_v60  ;;  %3433 = vmatpush.bf16.msra.mxu1 %v4756_v62  ;;  %v6534_v51 = vld [vmem:[#allocation5 + $0x6e4] sm:$0xf0] }
  0xf7   :  { %3399 = vmatmul.bf16.vlgmr.msrb.gmra.mxu2 %v7064_v43  ;;  %v4339_v55 = vld [vmem:[#allocation5 + $0x88] sm:$0xf]  ;;  %v5140_v59 = vor.u32 %v6534_v51, %v5139_v50 }
  0xf8   :  { %3447 = vmatpush.bf16.msra.mxu2 %v5012_v63  ;;  %3420 = vmatpush.bf16.msra.mxu0 %v4468_v11  ;;  %v6334_v56 = vld [vmem:[#allocation5 + $0xa4] sm:$0xf0] }
  0xf9   :  { %3413 = vmatmul.bf16.vlgmr.msrb.gmra.mxu3 %v7068_v47  ;;  %v4595_v57 = vld [vmem:[#allocation5 + $0x288] sm:$0xf]  ;;  %v4340_v2 = vor.u32 %v6334_v56, %v4339_v55 }
  0xfa   :  { %3461 = vmatpush.bf16.msra.mxu3 %v5268_v4  ;;  %3434 = vmatpush.bf16.msra.mxu1 %v4724_v12  ;;  %v6398_v60 = vld [vmem:[#allocation5 + $0x2a4] sm:$0xf0] }
  0xfb   :  { %v4851_v61 = vld [vmem:[#allocation5 + $0x488] sm:$0xf]  ;;  %v4596_v3 = vor.u32 %v6398_v60, %v4595_v57 }
  0xfc   :  { %3448 = vmatpush.bf16.msra.mxu2 %v4980_v13  ;;  %3421 = vmatpush.bf16.msra.mxu0 %v4436_v24  ;;  %v6462_v62 = vld [vmem:[#allocation5 + $0x4a4] sm:$0xf0] }
  0xfd   :  { %v5107_v63 = vld [vmem:[#allocation5 + $0x688] sm:$0xf]  ;;  %v4852_v4 = vor.u32 %v6462_v62, %v4851_v61 }
  0xfe   :  { %3462 = vmatpush.bf16.msra.mxu3 %v5236_v18  ;;  %3435 = vmatpush.bf16.msra.mxu1 %v4692_v25  ;;  %v6526_v0 = vld [vmem:[#allocation5 + $0x6a4] sm:$0xf0] }
  0xff   :  { %v4307_v5 = vld [vmem:[#allocation5 + $0x48] sm:$0xf]  ;;  %v5108_v8 = vor.u32 %v6526_v0, %v5107_v63  ;;  %v7082_v63 = vld [vmem:[#allocation7] sm:$0xff] }
 0x100   :  { %3449 = vmatpush.bf16.msra.mxu2 %v4948_v26  ;;  %3422 = vmatpush.bf16.msra.mxu0 %v4404_v36  ;;  %v6326_v6 = vld [vmem:[#allocation5 + $0x64] sm:$0xf0] }
 0x101   :  { %v4563_v7 = vld [vmem:[#allocation5 + $0x248] sm:$0xf]  ;;  %v4308_v15 = vor.u32 %v6326_v6, %v4307_v5 }
 0x102   :  { %3463 = vmatpush.bf16.msra.mxu3 %v5204_v30  ;;  %3436 = vmatpush.bf16.msra.mxu1 %v4660_v37  ;;  %v6390_v9 = vld [vmem:[#allocation5 + $0x264] sm:$0xf0] }
 0x103   :  { %v4819_v11 = vld [vmem:[#allocation5 + $0x448] sm:$0xf]  ;;  %v4564_v19 = vor.u32 %v6390_v9, %v4563_v7 }
 0x104   :  { %3450 = vmatpush.bf16.msra.mxu2 %v4916_v38  ;;  %3423 = vmatpush.bf16.msra.mxu0 %v4372_v52  ;;  %v6454_v12 = vld [vmem:[#allocation5 + $0x464] sm:$0xf0] }
 0x105   :  { %v5075_v13 = vld [vmem:[#allocation5 + $0x648] sm:$0xf]  ;;  %v4820_v20 = vor.u32 %v6454_v12, %v4819_v11 }
 0x106   :  { %3464 = vmatpush.bf16.msra.mxu3 %v5172_v45  ;;  %3437 = vmatpush.bf16.msra.mxu1 %v4628_v53  ;;  %v6518_v14 = vld [vmem:[#allocation5 + $0x664] sm:$0xf0] }
 0x107   :  { %v4275_v16 = vld [vmem:[#allocation5 + $0x8] sm:$0xf]  ;;  %v5076_v24 = vor.u32 %v6518_v14, %v5075_v13 }
 0x108   :  { %3451 = vmatpush.bf16.msra.mxu2 %v4884_v54  ;;  %3424 = vmatpush.bf16.msra.mxu0 %v4340_v2  ;;  %v6318_v18 = vld [vmem:[#allocation5 + $0x24] sm:$0xf0] }
 0x109   :  { %v4531_v21 = vld [vmem:[#allocation5 + $0x208] sm:$0xf]  ;;  %v4276_v31 = vor.u32 %v6318_v18, %v4275_v16 }
 0x10a   :  { %3465 = vmatpush.bf16.msra.mxu3 %v5140_v59  ;;  %3438 = vmatpush.bf16.msra.mxu1 %v4596_v3  ;;  %v6382_v22 = vld [vmem:[#allocation5 + $0x224] sm:$0xf0] }
 0x10b   :  { %v4787_v23 = vld [vmem:[#allocation5 + $0x408] sm:$0xf]  ;;  %v4532_v35 = vor.u32 %v6382_v22, %v4531_v21  ;;  %v3204_v22 = vpop.f32.mrf.mxu0 }
 0x10c   :  { %3452 = vmatpush.bf16.msra.mxu2 %v4852_v4  ;;  %v6446_v25 = vld [vmem:[#allocation5 + $0x424] sm:$0xf0]  ;;  %3425 = vmatpush.bf16.msra.mxu0 %v4308_v15 }
 0x10d   :  { %v5043_v26 = vld [vmem:[#allocation5 + $0x608] sm:$0xf]  ;;  %v4788_v36 = vor.u32 %v6446_v25, %v4787_v23 }
 0x10e   :  { %3466 = vmatpush.bf16.msra.mxu3 %v5108_v8  ;;  %v6510_v27 = vld [vmem:[#allocation5 + $0x624] sm:$0xf0]  ;;  %3439 = vmatpush.bf16.msra.mxu1 %v4564_v19  ;;  %v7332_v8 = vperm.slane %v7082_v63, 0 }
 0x10f   :  { %v5523_v28 = vld [vmem:[#allocation5 + $0x9c8] sm:$0xf]  ;;  %v5044_v40 = vor.u32 %v6510_v27, %v5043_v26 }
 0x110   :  { %v6630_v29 = vld [vmem:[#allocation5 + $0x9e4] sm:$0xf0]  ;;  %3453 = vmatpush.bf16.msra.mxu2 %v4820_v20  ;;  %3426 = vmatpush.bf16.msra.mxu0 %v4276_v31 }
 0x111   :  { %v5779_v30 = vld [vmem:[#allocation5 + $0xbc8] sm:$0xf]  ;;  %v5524_v41 = vor.u32 %v6630_v29, %v5523_v28 }
 0x112   :  { %v6694_v32 = vld [vmem:[#allocation5 + $0xbe4] sm:$0xf0]  ;;  %3467 = vmatpush.bf16.msra.mxu3 %v5076_v24  ;;  %3440 = vmatpush.bf16.msra.mxu1 %v4532_v35  ;;  %v3205_v24 = vadd.f32 %v3204_v22, %v7332_v8  ;;  %v6013_v8 = vld [vmem:[#allocation5 + $0xdb0] sm:$0xf0] }
 0x113   :  { %v6035_v33 = vld [vmem:[#allocation5 + $0xdc8] sm:$0xf]  ;;  %v5780_v42 = vor.u32 %v6694_v32, %v5779_v30  ;;  %3427 = vmatmul.bf16.vlgmr.msra.gmra.mxu0 %v7050_v58 }
 0x114   :  { %v6758_v34 = vld [vmem:[#allocation5 + $0xde4] sm:$0xf0]  ;;  %3454 = vmatpush.bf16.msra.mxu2 %v4788_v36  ;;  %3475 = vmatpush.bf16.msrb.mxu0 %v5524_v41  ;;  %v3218_v36 = vpop.f32.mrf.mxu1 }
 0x115   :  { %v6291_v37 = vld [vmem:[#allocation5 + $0xfc8] sm:$0xf]  ;;  %v6036_v45 = vor.u32 %v6758_v34, %v6035_v33  ;;  %3441 = vmatmul.bf16.vlgmr.msra.gmra.mxu1 %v7056_v10 }
 0x116   :  { %v6822_v38 = vld [vmem:[#allocation5 + $0xfe4] sm:$0xf0]  ;;  %3468 = vmatpush.bf16.msra.mxu3 %v5044_v40  ;;  %3489 = vmatpush.bf16.msrb.mxu1 %v5780_v42 }
 0x117   :  { %v5491_v46 = vld [vmem:[#allocation5 + $0x988] sm:$0xf]  ;;  %v6292_v50 = vor.u32 %v6822_v38, %v6291_v37  ;;  %3455 = vmatmul.bf16.vlgmr.msra.gmra.mxu2 %v7052_v1  ;;  %v3219_v38 = vadd.f32 %v3218_v36, %v3205_v24  ;;  %v6370_v24 = vld [vmem:[#allocation5 + $0x1cc] sm:$0xf] }
 0x118   :  { %v6622_v48 = vld [vmem:[#allocation5 + $0x9a4] sm:$0xf0]  ;;  %3503 = vmatpush.bf16.msrb.mxu2 %v6036_v45 }
 0x119   :  { %v5747_v49 = vld [vmem:[#allocation5 + $0xb88] sm:$0xf]  ;;  %v5492_v56 = vor.u32 %v6622_v48, %v5491_v46  ;;  %3469 = vmatmul.bf16.vlgmr.msra.gmra.mxu3 %v7058_v17 }
 0x11a   :  { %v6686_v51 = vld [vmem:[#allocation5 + $0xba4] sm:$0xf0]  ;;  %3517 = vmatpush.bf16.msrb.mxu3 %v6292_v50 }
 0x11b   :  { %v6003_v52 = vld [vmem:[#allocation5 + $0xd88] sm:$0xf]  ;;  %v5748_v59 = vor.u32 %v6686_v51, %v5747_v49  ;;  %3476 = vmatpush.bf16.msrb.mxu0 %v5492_v56 }
 0x11c   :  { %v6750_v53 = vld [vmem:[#allocation5 + $0xda4] sm:$0xf0] }
 0x11d   :  { %v6259_v54 = vld [vmem:[#allocation5 + $0xf88] sm:$0xf]  ;;  %v6004_v60 = vor.u32 %v6750_v53, %v6003_v52  ;;  %3490 = vmatpush.bf16.msrb.mxu1 %v5748_v59  ;;  %v3232_v52 = vpop.f32.mrf.mxu2 }
 0x11e   :  { %v6814_v55 = vld [vmem:[#allocation5 + $0xfa4] sm:$0xf0] }
 0x11f   :  { %v5459_v57 = vld [vmem:[#allocation5 + $0x948] sm:$0xf]  ;;  %v6260_v0 = vor.u32 %v6814_v55, %v6259_v54  ;;  %3504 = vmatpush.bf16.msrb.mxu2 %v6004_v60  ;;  %v3233_v55 = vadd.f32 %v3232_v52, %v3219_v38  ;;  %v5237_v52 = vld [vmem:[#allocation5 + $0x7a8] sm:$0xf0] }
 0x120   :  { %v6614_v61 = vld [vmem:[#allocation5 + $0x964] sm:$0xf0] }
 0x121   :  { %v5715_v62 = vld [vmem:[#allocation5 + $0xb48] sm:$0xf]  ;;  %v5460_v7 = vor.u32 %v6614_v61, %v5459_v57  ;;  %3518 = vmatpush.bf16.msrb.mxu3 %v6260_v0 }
 0x122   :  { %v6678_v2 = vld [vmem:[#allocation5 + $0xb64] sm:$0xf0] }
 0x123   :  { %v5971_v3 = vld [vmem:[#allocation5 + $0xd48] sm:$0xf]  ;;  %v5716_v9 = vor.u32 %v6678_v2, %v5715_v62  ;;  %3477 = vmatpush.bf16.msrb.mxu0 %v5460_v7 }
 0x124   :  { %v6742_v4 = vld [vmem:[#allocation5 + $0xd64] sm:$0xf0] }
 0x125   :  { %v6227_v5 = vld [vmem:[#allocation5 + $0xf48] sm:$0xf]  ;;  %v5972_v11 = vor.u32 %v6742_v4, %v5971_v3  ;;  %3491 = vmatpush.bf16.msrb.mxu1 %v5716_v9 }
 0x126   :  { %v6806_v6 = vld [vmem:[#allocation5 + $0xf64] sm:$0xf0] }
 0x127   :  { %v5427_v12 = vld [vmem:[#allocation5 + $0x908] sm:$0xf]  ;;  %v6228_v15 = vor.u32 %v6806_v6, %v6227_v5  ;;  %3505 = vmatpush.bf16.msrb.mxu2 %v5972_v11  ;;  %v3246_v5 = vpop.f32.mrf.mxu3 }
 0x128   :  { %v6606_v13 = vld [vmem:[#allocation5 + $0x924] sm:$0xf0]  ;;  %v7091_v9 = vadd.f32 %v3246_v5, %v3233_v55 }
 0x129   :  { %v5683_v14 = vld [vmem:[#allocation5 + $0xb08] sm:$0xf]  ;;  %v5428_v23 = vor.u32 %v6606_v13, %v5427_v12  ;;  %3519 = vmatpush.bf16.msrb.mxu3 %v6228_v15 }
 0x12a   :  { %v6670_v16 = vld [vmem:[#allocation5 + $0xb24] sm:$0xf0] }
 0x12b   :  { %v5939_v18 = vld [vmem:[#allocation5 + $0xd08] sm:$0xf]  ;;  %v5684_v25 = vor.u32 %v6670_v16, %v5683_v14  ;;  %3478 = vmatpush.bf16.msrb.mxu0 %v5428_v23 }
 0x12c   :  { %v6734_v19 = vld [vmem:[#allocation5 + $0xd24] sm:$0xf0] }
 0x12d   :  { %v6195_v20 = vld [vmem:[#allocation5 + $0xf08] sm:$0xf]  ;;  %v5940_v26 = vor.u32 %v6734_v19, %v5939_v18  ;;  %3492 = vmatpush.bf16.msrb.mxu1 %v5684_v25  ;;  %v4501_v25 = vld [vmem:[#allocation5 + $0x1e8] sm:$0xf0] }
 0x12e   :  { %v6798_v21 = vld [vmem:[#allocation5 + $0xf24] sm:$0xf0]  ;;  %v4504_v36 = vor.u32 %v6370_v24, %v4501_v25 }
 0x12f   :  { %v5395_v27 = vld [vmem:[#allocation5 + $0x8c8] sm:$0xf]  ;;  %v6196_v30 = vor.u32 %v6798_v21, %v6195_v20  ;;  %3506 = vmatpush.bf16.msrb.mxu2 %v5940_v26  ;;  %v6434_v26 = vld [vmem:[#allocation5 + $0x3cc] sm:$0xf] }
 0x130   :  { %v6598_v28 = vld [vmem:[#allocation5 + $0x8e4] sm:$0xf0] }
 0x131   :  { %v5651_v29 = vld [vmem:[#allocation5 + $0xac8] sm:$0xf]  ;;  %v5396_v37 = vor.u32 %v6598_v28, %v5395_v27  ;;  %3520 = vmatpush.bf16.msrb.mxu3 %v6196_v30  ;;  %v4757_v28 = vld [vmem:[#allocation5 + $0x3e8] sm:$0xf0] }
 0x132   :  { %v6662_v31 = vld [vmem:[#allocation5 + $0xae4] sm:$0xf0]  ;;  %v5013_v30 = vld [vmem:[#allocation5 + $0x5e8] sm:$0xf0] }
 0x133   :  { %v5907_v32 = vld [vmem:[#allocation5 + $0xcc8] sm:$0xf]  ;;  %v5652_v40 = vor.u32 %v6662_v31, %v5651_v29  ;;  %3479 = vmatpush.bf16.msrb.mxu0 %v5396_v37  ;;  %v6498_v29 = vld [vmem:[#allocation5 + $0x5cc] sm:$0xf]  ;;  %v4760_v37 = vor.u32 %v6434_v26, %v4757_v28 }
 0x134   :  { %v6726_v33 = vld [vmem:[#allocation5 + $0xce4] sm:$0xf0]  ;;  %v5016_v38 = vor.u32 %v6498_v29, %v5013_v30  ;;  %v6338_v29 = vld [vmem:[#allocation5 + $0xcc] sm:$0xf] }
 0x135   :  { %v6163_v34 = vld [vmem:[#allocation5 + $0xec8] sm:$0xf]  ;;  %v5908_v41 = vor.u32 %v6726_v33, %v5907_v32  ;;  %3493 = vmatpush.bf16.msrb.mxu1 %v5652_v40  ;;  %v6562_v33 = vld [vmem:[#allocation5 + $0x7cc] sm:$0xf]  ;;  %v7093_v40 = vpop.f32.mrf.mxu0 }
 0x136   :  { %v6790_v35 = vld [vmem:[#allocation5 + $0xee4] sm:$0xf0]  ;;  %v4373_v30 = vld [vmem:[#allocation5 + $0xe8] sm:$0xf0] }
 0x137   :  { %v5363_v42 = vld [vmem:[#allocation5 + $0x888] sm:$0xf]  ;;  %v6164_v48 = vor.u32 %v6790_v35, %v6163_v34  ;;  %3507 = vmatpush.bf16.msrb.mxu2 %v5908_v41  ;;  %v5269_v34 = vld [vmem:[#allocation5 + $0x7e8] sm:$0xf0] }
 0x138   :  { %v6590_v45 = vld [vmem:[#allocation5 + $0x8a4] sm:$0xf0]  ;;  %v6362_v41 = vld [vmem:[#allocation5 + $0x18c] sm:$0xf] }
 0x139   :  { %v5619_v46 = vld [vmem:[#allocation5 + $0xa88] sm:$0xf]  ;;  %v5364_v56 = vor.u32 %v6590_v45, %v5363_v42  ;;  %3521 = vmatpush.bf16.msrb.mxu3 %v6164_v48  ;;  %v4469_v42 = vld [vmem:[#allocation5 + $0x1a8] sm:$0xf0] }
 0x13a   :  { %v6654_v49 = vld [vmem:[#allocation5 + $0xaa4] sm:$0xf0]  ;;  %v6426_v45 = vld [vmem:[#allocation5 + $0x38c] sm:$0xf] }
 0x13b   :  { %v5875_v50 = vld [vmem:[#allocation5 + $0xc88] sm:$0xf]  ;;  %v5620_v57 = vor.u32 %v6654_v49, %v5619_v46  ;;  %3480 = vmatpush.bf16.msrb.mxu0 %v5364_v56  ;;  %v5272_v46 = vor.u32 %v6562_v33, %v5269_v34  ;;  %v4725_v48 = vld [vmem:[#allocation5 + $0x3a8] sm:$0xf0] }
 0x13c   :  { %v6718_v51 = vld [vmem:[#allocation5 + $0xca4] sm:$0xf0]  ;;  %v6490_v49 = vld [vmem:[#allocation5 + $0x58c] sm:$0xf]  ;;  %v4728_v55 = vor.u32 %v6426_v45, %v4725_v48 }
 0x13d   :  { %v6131_v53 = vld [vmem:[#allocation5 + $0xe88] sm:$0xf]  ;;  %v5876_v59 = vor.u32 %v6718_v51, %v5875_v50  ;;  %3494 = vmatpush.bf16.msrb.mxu1 %v5620_v57  ;;  %v4981_v50 = vld [vmem:[#allocation5 + $0x5a8] sm:$0xf0] }
 0x13e   :  { %v6782_v54 = vld [vmem:[#allocation5 + $0xea4] sm:$0xf0]  ;;  %v6554_v51 = vld [vmem:[#allocation5 + $0x78c] sm:$0xf]  ;;  %v4984_v56 = vor.u32 %v6490_v49, %v4981_v50 }
 0x13f   :  { %v5331_v60 = vld [vmem:[#allocation5 + $0x848] sm:$0xf]  ;;  %v6132_v0 = vor.u32 %v6782_v54, %v6131_v53  ;;  %3508 = vmatpush.bf16.msrb.mxu2 %v5876_v59  ;;  %v7095_v53 = vpop.f32.mrf.mxu1  ;;  %v4472_v54 = vor.u32 %v6362_v41, %v4469_v42  ;;  %v6354_v57 = vld [vmem:[#allocation5 + $0x14c] sm:$0xf]  ;;  %v4376_v41 = vor.u32 %v6338_v29, %v4373_v30 }
 0x140   :  { %v6582_v61 = vld [vmem:[#allocation5 + $0x864] sm:$0xf0]  ;;  %v4437_v59 = vld [vmem:[#allocation5 + $0x168] sm:$0xf0] }
 0x141   :  { %v5587_v62 = vld [vmem:[#allocation5 + $0xa48] sm:$0xf]  ;;  %v5332_v11 = vor.u32 %v6582_v61, %v5331_v60  ;;  %3522 = vmatpush.bf16.msrb.mxu3 %v6132_v0  ;;  %v6418_v60 = vld [vmem:[#allocation5 + $0x34c] sm:$0xf]  ;;  %v5240_v61 = vor.u32 %v6554_v51, %v5237_v52  ;;  %v4440_v5 = vor.u32 %v6354_v57, %v4437_v59 }
 0x142   :  { %v6646_v2 = vld [vmem:[#allocation5 + $0xa64] sm:$0xf0]  ;;  %v6482_v0 = vld [vmem:[#allocation5 + $0x54c] sm:$0xf] }
 0x143   :  { %v5843_v3 = vld [vmem:[#allocation5 + $0xc48] sm:$0xf]  ;;  %v5588_v14 = vor.u32 %v6646_v2, %v5587_v62  ;;  %3481 = vmatpush.bf16.msrb.mxu0 %v5332_v11  ;;  %v4693_v62 = vld [vmem:[#allocation5 + $0x368] sm:$0xf0] }
 0x144   :  { %v6710_v4 = vld [vmem:[#allocation5 + $0xc64] sm:$0xf0]  ;;  %v4949_v2 = vld [vmem:[#allocation5 + $0x568] sm:$0xf0] }
 0x145   :  { %v6099_v6 = vld [vmem:[#allocation5 + $0xe48] sm:$0xf]  ;;  %v5844_v15 = vor.u32 %v6710_v4, %v5843_v3  ;;  %3495 = vmatpush.bf16.msrb.mxu1 %v5588_v14  ;;  %v6546_v3 = vld [vmem:[#allocation5 + $0x74c] sm:$0xf]  ;;  %v4952_v11 = vor.u32 %v6482_v0, %v4949_v2 }
 0x146   :  { %v6774_v7 = vld [vmem:[#allocation5 + $0xe64] sm:$0xf0]  ;;  %v5205_v4 = vld [vmem:[#allocation5 + $0x768] sm:$0xf0] }
 0x147   :  { %v5299_v12 = vld [vmem:[#allocation5 + $0x808] sm:$0xf]  ;;  %v6100_v20 = vor.u32 %v6774_v7, %v6099_v6  ;;  %3509 = vmatpush.bf16.msrb.mxu2 %v5844_v15  ;;  %v7101_v6 = vpop.f32.mrf.mxu2  ;;  %v4696_v7 = vor.u32 %v6418_v60, %v4693_v62  ;;  %v6410_v14 = vld [vmem:[#allocation5 + $0x30c] sm:$0xf]  ;;  %v5208_v15 = vor.u32 %v6546_v3, %v5205_v4  ;;  %v3274_v28 = vpop.f32.mrf.mxu1 }
 0x148   :  { %v6574_v13 = vld [vmem:[#allocation5 + $0x824] sm:$0xf0]  ;;  %v4629_v34 = vld [vmem:[#allocation5 + $0x2e8] sm:$0xf0] }
 0x149   :  { %v5555_v16 = vld [vmem:[#allocation5 + $0xa08] sm:$0xf]  ;;  %v5300_v27 = vor.u32 %v6574_v13, %v5299_v12  ;;  %3523 = vmatpush.bf16.msrb.mxu3 %v6100_v20  ;;  %v6346_v12 = vld [vmem:[#allocation5 + $0x10c] sm:$0xf] }
 0x14a   :  { %v6638_v18 = vld [vmem:[#allocation5 + $0xa24] sm:$0xf0]  ;;  %v4405_v13 = vld [vmem:[#allocation5 + $0x128] sm:$0xf0] }
 0x14b   :  { %v5811_v19 = vld [vmem:[#allocation5 + $0xc08] sm:$0xf]  ;;  %v5556_v31 = vor.u32 %v6638_v18, %v5555_v16  ;;  %3482 = vmatpush.bf16.msrb.mxu0 %v5300_v27  ;;  %v7103_v16 = vpop.f32.mrf.mxu3  ;;  %v4661_v18 = vld [vmem:[#allocation5 + $0x328] sm:$0xf0]  ;;  %v4408_v25 = vor.u32 %v6346_v12, %v4405_v13 }
 0x14c   :  { %v6702_v21 = vld [vmem:[#allocation5 + $0xc24] sm:$0xf0]  ;;  %v4917_v20 = vld [vmem:[#allocation5 + $0x528] sm:$0xf0]  ;;  %v4664_v26 = vor.u32 %v6410_v14, %v4661_v18 }
 0x14d   :  { %v6067_v22 = vld [vmem:[#allocation5 + $0xe08] sm:$0xf]  ;;  %v5812_v32 = vor.u32 %v6702_v21, %v5811_v19  ;;  %3496 = vmatpush.bf16.msrb.mxu1 %v5556_v31  ;;  %v6474_v19 = vld [vmem:[#allocation5 + $0x50c] sm:$0xf]  ;;  %v3260_v21 = vpop.f32.mrf.mxu0 }
 0x14e   :  { %v6766_v23 = vld [vmem:[#allocation5 + $0xe24] sm:$0xf0]  ;;  %3483 = vmatmul.bf16.vlgmr.msrb.gmra.mxu0 %v7062_v39  ;;  %v3261_v24 = vadd.f32 %v3260_v21, %v7091_v9  ;;  %v4920_v27 = vor.u32 %v6474_v19, %v4917_v20  ;;  %v6402_v31 = vld [vmem:[#allocation5 + $0x2cc] sm:$0xf] }
 0x14f   :  { %v6068_v35 = vor.u32 %v6766_v23, %v6067_v22  ;;  %3510 = vmatpush.bf16.msrb.mxu2 %v5812_v32  ;;  %3531 = vmatpush.bf16.msra.mxu0 %v4504_v36  ;;  %v6538_v22 = vld [vmem:[#allocation5 + $0x70c] sm:$0xf]  ;;  %v4632_v9 = vor.u32 %v6402_v31, %v4629_v34  ;;  %v3288_v50 = vpop.f32.mrf.mxu2 }
 0x150   :  { %3497 = vmatmul.bf16.vlgmr.msrb.gmra.mxu1 %v7066_v44  ;;  %v5173_v23 = vld [vmem:[#allocation5 + $0x728] sm:$0xf0]  ;;  %v3275_v33 = vadd.f32 %v3274_v28, %v3261_v24 }
 0x151   :  { %3524 = vmatpush.bf16.msrb.mxu3 %v6068_v35  ;;  %3545 = vmatpush.bf16.msra.mxu1 %v4760_v37  ;;  %v5176_v32 = vor.u32 %v6538_v22, %v5173_v23  ;;  %v6466_v35 = vld [vmem:[#allocation5 + $0x4cc] sm:$0xf] }
 0x152   :  { %3511 = vmatmul.bf16.vlgmr.msrb.gmra.mxu2 %v7064_v43  ;;  %v4885_v36 = vld [vmem:[#allocation5 + $0x4e8] sm:$0xf0] }
 0x153   :  { %3559 = vmatpush.bf16.msra.mxu2 %v5016_v38  ;;  %3532 = vmatpush.bf16.msra.mxu0 %v4472_v54  ;;  %v6530_v37 = vld [vmem:[#allocation5 + $0x6cc] sm:$0xf]  ;;  %v4888_v42 = vor.u32 %v6466_v35, %v4885_v36  ;;  %v3302_v59 = vpop.f32.mrf.mxu3 }
 0x154   :  { %3525 = vmatmul.bf16.vlgmr.msrb.gmra.mxu3 %v7068_v47  ;;  %v5141_v38 = vld [vmem:[#allocation5 + $0x6e8] sm:$0xf0] }
 0x155   :  { %3573 = vmatpush.bf16.msra.mxu3 %v5272_v46  ;;  %3546 = vmatpush.bf16.msra.mxu1 %v4728_v55  ;;  %v6330_v45 = vld [vmem:[#allocation5 + $0x8c] sm:$0xf]  ;;  %v5144_v49 = vor.u32 %v6530_v37, %v5141_v38  ;;  %v3289_v55 = vadd.f32 %v3288_v50, %v3275_v33 }
 0x156   :  { %v4341_v46 = vld [vmem:[#allocation5 + $0xa8] sm:$0xf0] }
 0x157   :  { %3560 = vmatpush.bf16.msra.mxu2 %v4984_v56  ;;  %3533 = vmatpush.bf16.msra.mxu0 %v4440_v5  ;;  %v6394_v48 = vld [vmem:[#allocation5 + $0x28c] sm:$0xf]  ;;  %v4344_v60 = vor.u32 %v6330_v45, %v4341_v46 }
 0x158   :  { %v4597_v51 = vld [vmem:[#allocation5 + $0x2a8] sm:$0xf0] }
 0x159   :  { %3574 = vmatpush.bf16.msra.mxu3 %v5240_v61  ;;  %3547 = vmatpush.bf16.msra.mxu1 %v4696_v7  ;;  %v6458_v52 = vld [vmem:[#allocation5 + $0x48c] sm:$0xf]  ;;  %v7106_v61 = vadd.f32 %v3302_v59, %v3289_v55  ;;  %v4600_v62 = vor.u32 %v6394_v48, %v4597_v51 }
 0x15a   :  { %v4853_v54 = vld [vmem:[#allocation5 + $0x4a8] sm:$0xf0] }
 0x15b   :  { %3561 = vmatpush.bf16.msra.mxu2 %v4952_v11  ;;  %3534 = vmatpush.bf16.msra.mxu0 %v4408_v25  ;;  %v6522_v56 = vld [vmem:[#allocation5 + $0x68c] sm:$0xf]  ;;  %7345 = vst [vmem:[#allocation20_spill] sm:$0xff] %v7106_v61  ;;  %v4856_v0 = vor.u32 %v6458_v52, %v4853_v54 }
 0x15c   :  { %v5109_v57 = vld [vmem:[#allocation5 + $0x6a8] sm:$0xf0] }
 0x15d   :  { %3575 = vmatpush.bf16.msra.mxu3 %v5208_v15  ;;  %3548 = vmatpush.bf16.msra.mxu1 %v4664_v26  ;;  %v6322_v2 = vld [vmem:[#allocation5 + $0x4c] sm:$0xf]  ;;  %v5112_v5 = vor.u32 %v6522_v56, %v5109_v57  ;;  %v7108_v56 = vpop.f32.mrf.mxu0 }
 0x15e   :  { %v4309_v3 = vld [vmem:[#allocation5 + $0x68] sm:$0xf0] }
 0x15f   :  { %3562 = vmatpush.bf16.msra.mxu2 %v4920_v27  ;;  %3535 = vmatpush.bf16.msra.mxu0 %v4376_v41  ;;  %v6386_v4 = vld [vmem:[#allocation5 + $0x24c] sm:$0xf]  ;;  %v4312_v15 = vor.u32 %v6322_v2, %v4309_v3 }
 0x160   :  { %v4565_v7 = vld [vmem:[#allocation5 + $0x268] sm:$0xf0] }
 0x161   :  { %3576 = vmatpush.bf16.msra.mxu3 %v5176_v32  ;;  %3549 = vmatpush.bf16.msra.mxu1 %v4632_v9  ;;  %v6450_v11 = vld [vmem:[#allocation5 + $0x44c] sm:$0xf]  ;;  %v4568_v20 = vor.u32 %v6386_v4, %v4565_v7 }
 0x162   :  { %v4821_v12 = vld [vmem:[#allocation5 + $0x468] sm:$0xf0] }
 0x163   :  { %3563 = vmatpush.bf16.msra.mxu2 %v4888_v42  ;;  %v6514_v13 = vld [vmem:[#allocation5 + $0x64c] sm:$0xf]  ;;  %3536 = vmatpush.bf16.msra.mxu0 %v4344_v60  ;;  %v4824_v21 = vor.u32 %v6450_v11, %v4821_v12 }
 0x164   :  { %v5077_v14 = vld [vmem:[#allocation5 + $0x668] sm:$0xf0] }
 0x165   :  { %3577 = vmatpush.bf16.msra.mxu3 %v5144_v49  ;;  %v6314_v18 = vld [vmem:[#allocation5 + $0xc] sm:$0xf]  ;;  %3550 = vmatpush.bf16.msra.mxu1 %v4600_v62  ;;  %v5080_v25 = vor.u32 %v6514_v13, %v5077_v14  ;;  %v7110_v62 = vpop.f32.mrf.mxu1 }
 0x166   :  { %v4277_v19 = vld [vmem:[#allocation5 + $0x28] sm:$0xf0] }
 0x167   :  { %3564 = vmatpush.bf16.msra.mxu2 %v4856_v0  ;;  %v6378_v22 = vld [vmem:[#allocation5 + $0x20c] sm:$0xf]  ;;  %3537 = vmatpush.bf16.msra.mxu0 %v4312_v15  ;;  %v4280_v32 = vor.u32 %v6314_v18, %v4277_v19  ;;  %v7331_v19 = vperm.slane %v7082_v63, 1 }
 0x168   :  { %v4533_v23 = vld [vmem:[#allocation5 + $0x228] sm:$0xf0] }
 0x169   :  { %v6442_v24 = vld [vmem:[#allocation5 + $0x40c] sm:$0xf]  ;;  %3578 = vmatpush.bf16.msra.mxu3 %v5112_v5  ;;  %3551 = vmatpush.bf16.msra.mxu1 %v4568_v20  ;;  %v4536_v36 = vor.u32 %v6378_v22, %v4533_v23 }
 0x16a   :  { %v4789_v26 = vld [vmem:[#allocation5 + $0x428] sm:$0xf0] }
 0x16b   :  { %v6506_v27 = vld [vmem:[#allocation5 + $0x60c] sm:$0xf]  ;;  %3565 = vmatpush.bf16.msra.mxu2 %v4824_v21  ;;  %v4792_v37 = vor.u32 %v6442_v24, %v4789_v26  ;;  %3538 = vmatpush.bf16.msra.mxu0 %v4280_v32  ;;  %v3316_v32 = vpop.f32.mrf.mxu0 }
 0x16c   :  { %v5045_v28 = vld [vmem:[#allocation5 + $0x628] sm:$0xf0] }
 0x16d   :  { %v6626_v29 = vld [vmem:[#allocation5 + $0x9cc] sm:$0xf]  ;;  %3579 = vmatpush.bf16.msra.mxu3 %v5080_v25  ;;  %v5048_v9 = vor.u32 %v6506_v27, %v5045_v28  ;;  %3552 = vmatpush.bf16.msra.mxu1 %v4536_v36  ;;  %v7117_v25 = vpop.f32.mrf.mxu2 }
 0x16e   :  { %v5525_v30 = vld [vmem:[#allocation5 + $0x9e8] sm:$0xf0]  ;;  %3539 = vmatmul.bf16.vlgmr.msra.gmra.mxu0 %v7050_v58  ;;  %7346 = vst [vmem:[#allocation21_spill] sm:$0xff] %v7117_v25 }
 0x16f   :  { %v6690_v31 = vld [vmem:[#allocation5 + $0xbcc] sm:$0xf]  ;;  %v5528_v42 = vor.u32 %v6626_v29, %v5525_v30  ;;  %3566 = vmatpush.bf16.msra.mxu2 %v4792_v37 }
 0x170   :  { %v5781_v33 = vld [vmem:[#allocation5 + $0xbe8] sm:$0xf0]  ;;  %3553 = vmatmul.bf16.vlgmr.msra.gmra.mxu1 %v7056_v10 }
 0x171   :  { %v6754_v34 = vld [vmem:[#allocation5 + $0xdcc] sm:$0xf]  ;;  %v5784_v45 = vor.u32 %v6690_v31, %v5781_v33  ;;  %3580 = vmatpush.bf16.msra.mxu3 %v5048_v9  ;;  %3587 = vmatpush.bf16.msrb.mxu0 %v5528_v42  ;;  %v7119_v33 = vpop.f32.mrf.mxu3  ;;  %v3330_v42 = vpop.f32.mrf.mxu1 }
 0x172   :  { %v6037_v35 = vld [vmem:[#allocation5 + $0xde8] sm:$0xf0]  ;;  %3567 = vmatmul.bf16.vlgmr.msra.gmra.mxu2 %v7052_v1  ;;  %7347 = vst [vmem:[#allocation22_spill] sm:$0xff] %v7119_v33  ;;  %v6768_v33 = vld [vmem:[#allocation5 + $0xe34] sm:$0xf0] }
 0x173   :  { %v6818_v38 = vld [vmem:[#allocation5 + $0xfcc] sm:$0xf]  ;;  %v6040_v46 = vor.u32 %v6754_v34, %v6037_v35  ;;  %3601 = vmatpush.bf16.msrb.mxu1 %v5784_v45  ;;  %v3317_v35 = vadd.f32 %v3316_v32, %v7331_v19  ;;  %v6683_v19 = vld [vmem:[#allocation5 + $0xb94] sm:$0xf] }
 0x174   :  { %v6293_v41 = vld [vmem:[#allocation5 + $0xfe8] sm:$0xf0]  ;;  %3581 = vmatmul.bf16.vlgmr.msra.gmra.mxu3 %v7058_v17 }
 0x175   :  { %v6618_v48 = vld [vmem:[#allocation5 + $0x98c] sm:$0xf]  ;;  %v6296_v51 = vor.u32 %v6818_v38, %v6293_v41  ;;  %3615 = vmatpush.bf16.msrb.mxu2 %v6040_v46 }
 0x176   :  { %v5493_v49 = vld [vmem:[#allocation5 + $0x9a8] sm:$0xf0] }
 0x177   :  { %v6682_v50 = vld [vmem:[#allocation5 + $0xb8c] sm:$0xf]  ;;  %v5496_v60 = vor.u32 %v6618_v48, %v5493_v49  ;;  %3629 = vmatpush.bf16.msrb.mxu3 %v6296_v51 }
 0x178   :  { %v5749_v52 = vld [vmem:[#allocation5 + $0xba8] sm:$0xf0] }
 0x179   :  { %v6746_v54 = vld [vmem:[#allocation5 + $0xd8c] sm:$0xf]  ;;  %v5752_v0 = vor.u32 %v6682_v50, %v5749_v52  ;;  %3588 = vmatpush.bf16.msrb.mxu0 %v5496_v60  ;;  %v3331_v50 = vadd.f32 %v3330_v42, %v3317_v35 }
 0x17a   :  { %v6005_v55 = vld [vmem:[#allocation5 + $0xda8] sm:$0xf0] }
 0x17b   :  { %v6810_v57 = vld [vmem:[#allocation5 + $0xf8c] sm:$0xf]  ;;  %v6008_v2 = vor.u32 %v6746_v54, %v6005_v55  ;;  %3602 = vmatpush.bf16.msrb.mxu1 %v5752_v0 }
 0x17c   :  { %v6261_v59 = vld [vmem:[#allocation5 + $0xfa8] sm:$0xf0] }
 0x17d   :  { %v6610_v3 = vld [vmem:[#allocation5 + $0x94c] sm:$0xf]  ;;  %v6264_v7 = vor.u32 %v6810_v57, %v6261_v59  ;;  %3616 = vmatpush.bf16.msrb.mxu2 %v6008_v2 }
 0x17e   :  { %v5461_v4 = vld [vmem:[#allocation5 + $0x968] sm:$0xf0] }
 0x17f   :  { %v6674_v5 = vld [vmem:[#allocation5 + $0xb4c] sm:$0xf]  ;;  %v5464_v18 = vor.u32 %v6610_v3, %v5461_v4  ;;  %3630 = vmatpush.bf16.msrb.mxu3 %v6264_v7  ;;  %v3344_v7 = vpop.f32.mrf.mxu2 }
 0x180   :  { %v5717_v11 = vld [vmem:[#allocation5 + $0xb68] sm:$0xf0] }
 0x181   :  { %v6738_v12 = vld [vmem:[#allocation5 + $0xd4c] sm:$0xf]  ;;  %v5720_v20 = vor.u32 %v6674_v5, %v5717_v11  ;;  %3589 = vmatpush.bf16.msrb.mxu0 %v5464_v18 }
 0x182   :  { %v5973_v13 = vld [vmem:[#allocation5 + $0xd68] sm:$0xf0] }
 0x183   :  { %v6802_v14 = vld [vmem:[#allocation5 + $0xf4c] sm:$0xf]  ;;  %v5976_v21 = vor.u32 %v6738_v12, %v5973_v13  ;;  %3603 = vmatpush.bf16.msrb.mxu1 %v5720_v20  ;;  %v3345_v13 = vadd.f32 %v3344_v7, %v3331_v50  ;;  %v6375_v50 = vld [vmem:[#allocation5 + $0x1ec] sm:$0xf0] }
 0x184   :  { %v6229_v15 = vld [vmem:[#allocation5 + $0xf68] sm:$0xf0] }
 0x185   :  { %v6602_v22 = vld [vmem:[#allocation5 + $0x90c] sm:$0xf]  ;;  %v6232_v26 = vor.u32 %v6802_v14, %v6229_v15  ;;  %3617 = vmatpush.bf16.msrb.mxu2 %v5976_v21  ;;  %v3358_v15 = vpop.f32.mrf.mxu3 }
 0x186   :  { %v5429_v23 = vld [vmem:[#allocation5 + $0x928] sm:$0xf0] }
 0x187   :  { %v6666_v24 = vld [vmem:[#allocation5 + $0xb0c] sm:$0xf]  ;;  %v5432_v34 = vor.u32 %v6602_v22, %v5429_v23  ;;  %3631 = vmatpush.bf16.msrb.mxu3 %v6232_v26 }
 0x188   :  { %v5685_v27 = vld [vmem:[#allocation5 + $0xb28] sm:$0xf0] }
 0x189   :  { %v6730_v28 = vld [vmem:[#allocation5 + $0xd0c] sm:$0xf]  ;;  %v5688_v36 = vor.u32 %v6666_v24, %v5685_v27  ;;  %3590 = vmatpush.bf16.msrb.mxu0 %v5432_v34  ;;  %v7123_v24 = vadd.f32 %v3358_v15, %v3345_v13  ;;  %v6367_v13 = vld [vmem:[#allocation5 + $0x1ac] sm:$0xf0] }
 0x18a   :  { %v5941_v29 = vld [vmem:[#allocation5 + $0xd28] sm:$0xf0] }
 0x18b   :  { %v6794_v30 = vld [vmem:[#allocation5 + $0xf0c] sm:$0xf]  ;;  %v5944_v37 = vor.u32 %v6730_v28, %v5941_v29  ;;  %3604 = vmatpush.bf16.msrb.mxu1 %v5688_v36 }
 0x18c   :  { %v6197_v31 = vld [vmem:[#allocation5 + $0xf28] sm:$0xf0] }
 0x18d   :  { %v6594_v38 = vld [vmem:[#allocation5 + $0x8cc] sm:$0xf]  ;;  %v6200_v45 = vor.u32 %v6794_v30, %v6197_v31  ;;  %3618 = vmatpush.bf16.msrb.mxu2 %v5944_v37 }
 0x18e   :  { %v5397_v41 = vld [vmem:[#allocation5 + $0x8e8] sm:$0xf0] }
 0x18f   :  { %v6658_v9 = vld [vmem:[#allocation5 + $0xacc] sm:$0xf]  ;;  %v5400_v54 = vor.u32 %v6594_v38, %v5397_v41  ;;  %3632 = vmatpush.bf16.msrb.mxu3 %v6200_v45 }
 0x190   :  { %v5653_v46 = vld [vmem:[#allocation5 + $0xae8] sm:$0xf0] }
 0x191   :  { %v6722_v48 = vld [vmem:[#allocation5 + $0xccc] sm:$0xf]  ;;  %v5656_v55 = vor.u32 %v6658_v9, %v5653_v46  ;;  %3591 = vmatpush.bf16.msrb.mxu0 %v5400_v54  ;;  %v6439_v54 = vld [vmem:[#allocation5 + $0x3ec] sm:$0xf0] }
 0x192   :  { %v5909_v49 = vld [vmem:[#allocation5 + $0xce8] sm:$0xf0] }
 0x193   :  { %v6786_v51 = vld [vmem:[#allocation5 + $0xecc] sm:$0xf]  ;;  %v5912_v57 = vor.u32 %v6722_v48, %v5909_v49  ;;  %3605 = vmatpush.bf16.msrb.mxu1 %v5656_v55  ;;  %v4507_v49 = vld [vmem:[#allocation5 + $0x1d0] sm:$0xf] }
 0x194   :  { %v6165_v52 = vld [vmem:[#allocation5 + $0xee8] sm:$0xf0]  ;;  %v5019_v55 = vld [vmem:[#allocation5 + $0x5d0] sm:$0xf] }
 0x195   :  { %v6586_v59 = vld [vmem:[#allocation5 + $0x88c] sm:$0xf]  ;;  %v6168_v2 = vor.u32 %v6786_v51, %v6165_v52  ;;  %3619 = vmatpush.bf16.msrb.mxu2 %v5912_v57  ;;  %v4763_v51 = vld [vmem:[#allocation5 + $0x3d0] sm:$0xf] }
 0x196   :  { %v5365_v60 = vld [vmem:[#allocation5 + $0x8a8] sm:$0xf0]  ;;  %v6503_v57 = vld [vmem:[#allocation5 + $0x5ec] sm:$0xf0] }
 0x197   :  { %v6650_v0 = vld [vmem:[#allocation5 + $0xa8c] sm:$0xf]  ;;  %v5368_v14 = vor.u32 %v6586_v59, %v5365_v60  ;;  %3633 = vmatpush.bf16.msrb.mxu3 %v6168_v2  ;;  %v6567_v2 = vld [vmem:[#allocation5 + $0x7ec] sm:$0xf0]  ;;  %v5020_v7 = vor.u32 %v6503_v57, %v5019_v55 }
 0x198   :  { %v5621_v3 = vld [vmem:[#allocation5 + $0xaa8] sm:$0xf0]  ;;  %v4923_v55 = vld [vmem:[#allocation5 + $0x510] sm:$0xf] }
 0x199   :  { %v6714_v4 = vld [vmem:[#allocation5 + $0xc8c] sm:$0xf]  ;;  %v5624_v18 = vor.u32 %v6650_v0, %v5621_v3  ;;  %3592 = vmatpush.bf16.msrb.mxu0 %v5368_v14  ;;  %v5275_v0 = vld [vmem:[#allocation5 + $0x7d0] sm:$0xf] }
 0x19a   :  { %v5877_v5 = vld [vmem:[#allocation5 + $0xca8] sm:$0xf0]  ;;  %v4731_v14 = vld [vmem:[#allocation5 + $0x390] sm:$0xf]  ;;  %v5276_v15 = vor.u32 %v6567_v2, %v5275_v0 }
 0x19b   :  { %v6778_v11 = vld [vmem:[#allocation5 + $0xe8c] sm:$0xf]  ;;  %v5880_v20 = vor.u32 %v6714_v4, %v5877_v5  ;;  %3606 = vmatpush.bf16.msrb.mxu1 %v5624_v18  ;;  %v4508_v4 = vor.u32 %v6375_v50, %v4507_v49  ;;  %v4764_v5 = vor.u32 %v6439_v54, %v4763_v51  ;;  %v6431_v18 = vld [vmem:[#allocation5 + $0x3ac] sm:$0xf0] }
 0x19c   :  { %v6133_v12 = vld [vmem:[#allocation5 + $0xea8] sm:$0xf0]  ;;  %v6351_v49 = vld [vmem:[#allocation5 + $0x12c] sm:$0xf0] }
 0x19d   :  { %v6578_v21 = vld [vmem:[#allocation5 + $0x84c] sm:$0xf]  ;;  %v6136_v26 = vor.u32 %v6778_v11, %v6133_v12  ;;  %3620 = vmatpush.bf16.msrb.mxu2 %v5880_v20  ;;  %v7125_v11 = vpop.f32.mrf.mxu0  ;;  %v4475_v12 = vld [vmem:[#allocation5 + $0x190] sm:$0xf] }
 0x19e   :  { %v5333_v22 = vld [vmem:[#allocation5 + $0x868] sm:$0xf0]  ;;  %v4987_v20 = vld [vmem:[#allocation5 + $0x590] sm:$0xf] }
 0x19f   :  { %v6642_v23 = vld [vmem:[#allocation5 + $0xa4c] sm:$0xf]  ;;  %v5336_v32 = vor.u32 %v6578_v21, %v5333_v22  ;;  %3634 = vmatpush.bf16.msrb.mxu3 %v6136_v26  ;;  %v6495_v21 = vld [vmem:[#allocation5 + $0x5ac] sm:$0xf0]  ;;  %v7127_v26 = vpop.f32.mrf.mxu1 }
 0x1a0   :  { %v5589_v27 = vld [vmem:[#allocation5 + $0xa68] sm:$0xf0]  ;;  %v5243_v22 = vld [vmem:[#allocation5 + $0x790] sm:$0xf] }
 0x1a1   :  { %v6706_v28 = vld [vmem:[#allocation5 + $0xc4c] sm:$0xf]  ;;  %v5592_v36 = vor.u32 %v6642_v23, %v5589_v27  ;;  %3593 = vmatpush.bf16.msrb.mxu0 %v5336_v32  ;;  %v6559_v23 = vld [vmem:[#allocation5 + $0x7ac] sm:$0xf0]  ;;  %v4476_v27 = vor.u32 %v6367_v13, %v4475_v12 }
 0x1a2   :  { %v5845_v29 = vld [vmem:[#allocation5 + $0xc68] sm:$0xf0]  ;;  %v4699_v32 = vld [vmem:[#allocation5 + $0x350] sm:$0xf] }
 0x1a3   :  { %v6770_v30 = vld [vmem:[#allocation5 + $0xe4c] sm:$0xf]  ;;  %v5848_v37 = vor.u32 %v6706_v28, %v5845_v29  ;;  %3607 = vmatpush.bf16.msrb.mxu1 %v5592_v36  ;;  %v4732_v28 = vor.u32 %v6431_v18, %v4731_v14  ;;  %v4988_v29 = vor.u32 %v6495_v21, %v4987_v20  ;;  %v4955_v36 = vld [vmem:[#allocation5 + $0x550] sm:$0xf] }
 0x1a4   :  { %v6101_v31 = vld [vmem:[#allocation5 + $0xe68] sm:$0xf0]  ;;  %v4667_v50 = vld [vmem:[#allocation5 + $0x310] sm:$0xf] }
 0x1a5   :  { %v6570_v34 = vld [vmem:[#allocation5 + $0x80c] sm:$0xf]  ;;  %v6104_v42 = vor.u32 %v6770_v30, %v6101_v31  ;;  %3621 = vmatpush.bf16.msrb.mxu2 %v5848_v37  ;;  %v4443_v30 = vld [vmem:[#allocation5 + $0x150] sm:$0xf] }
 0x1a6   :  { %v5301_v35 = vld [vmem:[#allocation5 + $0x828] sm:$0xf0]  ;;  %v6359_v31 = vld [vmem:[#allocation5 + $0x16c] sm:$0xf0] }
 0x1a7   :  { %v6634_v38 = vld [vmem:[#allocation5 + $0xa0c] sm:$0xf]  ;;  %v5304_v52 = vor.u32 %v6570_v34, %v5301_v35  ;;  %3635 = vmatpush.bf16.msrb.mxu3 %v6104_v42  ;;  %v5244_v34 = vor.u32 %v6559_v23, %v5243_v22  ;;  %v6423_v35 = vld [vmem:[#allocation5 + $0x36c] sm:$0xf0]  ;;  %v7133_v42 = vpop.f32.mrf.mxu2 }
 0x1a8   :  { %v5557_v41 = vld [vmem:[#allocation5 + $0xa28] sm:$0xf0]  ;;  %v6487_v37 = vld [vmem:[#allocation5 + $0x56c] sm:$0xf0] }
 0x1a9   :  { %v6698_v9 = vld [vmem:[#allocation5 + $0xc0c] sm:$0xf]  ;;  %v5560_v59 = vor.u32 %v6634_v38, %v5557_v41  ;;  %3594 = vmatpush.bf16.msrb.mxu0 %v5304_v52  ;;  %v5211_v38 = vld [vmem:[#allocation5 + $0x750] sm:$0xf]  ;;  %v7135_v52 = vpop.f32.mrf.mxu3 }
 0x1aa   :  { %v5813_v45 = vld [vmem:[#allocation5 + $0xc28] sm:$0xf0]  ;;  %v6551_v41 = vld [vmem:[#allocation5 + $0x76c] sm:$0xf0] }
 0x1ab   :  { %v6762_v46 = vld [vmem:[#allocation5 + $0xe0c] sm:$0xf]  ;;  %v5816_v60 = vor.u32 %v6698_v9, %v5813_v45  ;;  %3608 = vmatpush.bf16.msrb.mxu1 %v5560_v59  ;;  %v4444_v9 = vor.u32 %v6359_v31, %v4443_v30  ;;  %v4700_v45 = vor.u32 %v6423_v35, %v4699_v32  ;;  %v5212_v51 = vor.u32 %v6551_v41, %v5211_v38  ;;  %v6415_v54 = vld [vmem:[#allocation5 + $0x32c] sm:$0xf0]  ;;  %v3372_v59 = vpop.f32.mrf.mxu0 }
 0x1ac   :  { %v6069_v48 = vld [vmem:[#allocation5 + $0xe28] sm:$0xf0]  ;;  %3595 = vmatmul.bf16.vlgmr.msrb.gmra.mxu0 %v7062_v39  ;;  %v6479_v57 = vld [vmem:[#allocation5 + $0x52c] sm:$0xf0]  ;;  %v3373_v2 = vadd.f32 %v3372_v59, %v7123_v24 }
 0x1ad   :  { %v6072_v3 = vor.u32 %v6762_v46, %v6069_v48  ;;  %3622 = vmatpush.bf16.msrb.mxu2 %v5816_v60  ;;  %3643 = vmatpush.bf16.msra.mxu0 %v4508_v4  ;;  %v4956_v46 = vor.u32 %v6487_v37, %v4955_v36  ;;  %v4411_v48 = vld [vmem:[#allocation5 + $0x110] sm:$0xf]  ;;  %v4668_v4 = vor.u32 %v6415_v54, %v4667_v50 }
 0x1ae   :  { %3609 = vmatmul.bf16.vlgmr.msrb.gmra.mxu1 %v7066_v44  ;;  %v5179_v60 = vld [vmem:[#allocation5 + $0x710] sm:$0xf] }
 0x1af   :  { %3636 = vmatpush.bf16.msrb.mxu3 %v6072_v3  ;;  %3657 = vmatpush.bf16.msra.mxu1 %v4764_v5  ;;  %v6543_v0 = vld [vmem:[#allocation5 + $0x72c] sm:$0xf0]  ;;  %v4412_v3 = vor.u32 %v6351_v49, %v4411_v48  ;;  %v4924_v5 = vor.u32 %v6479_v57, %v4923_v55  ;;  %v3400_v35 = vpop.f32.mrf.mxu2 }
 0x1b0   :  { %3623 = vmatmul.bf16.vlgmr.msrb.gmra.mxu2 %v7064_v43  ;;  %v4379_v12 = vld [vmem:[#allocation5 + $0xd0] sm:$0xf] }
 0x1b1   :  { %3671 = vmatpush.bf16.msra.mxu2 %v5020_v7  ;;  %3644 = vmatpush.bf16.msra.mxu0 %v4476_v27  ;;  %v3386_v7 = vpop.f32.mrf.mxu1  ;;  %v6343_v13 = vld [vmem:[#allocation5 + $0xec] sm:$0xf0] }
 0x1b2   :  { %3637 = vmatmul.bf16.vlgmr.msrb.gmra.mxu3 %v7068_v47  ;;  %v4635_v14 = vld [vmem:[#allocation5 + $0x2d0] sm:$0xf]  ;;  %v3387_v18 = vadd.f32 %v3386_v7, %v3373_v2 }
 0x1b3   :  { %3685 = vmatpush.bf16.msra.mxu3 %v5276_v15  ;;  %3658 = vmatpush.bf16.msra.mxu1 %v4732_v28  ;;  %v5180_v15 = vor.u32 %v6543_v0, %v5179_v60  ;;  %v6407_v20 = vld [vmem:[#allocation5 + $0x2ec] sm:$0xf0]  ;;  %v4380_v28 = vor.u32 %v6343_v13, %v4379_v12 }
 0x1b4   :  { %v4891_v21 = vld [vmem:[#allocation5 + $0x4d0] sm:$0xf]  ;;  %v4636_v24 = vor.u32 %v6407_v20, %v4635_v14  ;;  %v3401_v41 = vadd.f32 %v3400_v35, %v3387_v18 }
 0x1b5   :  { %3672 = vmatpush.bf16.msra.mxu2 %v4988_v29  ;;  %3645 = vmatpush.bf16.msra.mxu0 %v4444_v9  ;;  %v6471_v22 = vld [vmem:[#allocation5 + $0x4ec] sm:$0xf0] }
 0x1b6   :  { %v5147_v23 = vld [vmem:[#allocation5 + $0x6d0] sm:$0xf]  ;;  %v4892_v29 = vor.u32 %v6471_v22, %v4891_v21 }
 0x1b7   :  { %3686 = vmatpush.bf16.msra.mxu3 %v5244_v34  ;;  %3659 = vmatpush.bf16.msra.mxu1 %v4700_v45  ;;  %v6535_v27 = vld [vmem:[#allocation5 + $0x6ec] sm:$0xf0] }
 0x1b8   :  { %v4347_v30 = vld [vmem:[#allocation5 + $0x90] sm:$0xf]  ;;  %v5148_v34 = vor.u32 %v6535_v27, %v5147_v23 }
 0x1b9   :  { %3673 = vmatpush.bf16.msra.mxu2 %v4956_v46  ;;  %3646 = vmatpush.bf16.msra.mxu0 %v4412_v3  ;;  %v6335_v31 = vld [vmem:[#allocation5 + $0xac] sm:$0xf0]  ;;  %v3414_v46 = vpop.f32.mrf.mxu3 }
 0x1ba   :  { %v4603_v32 = vld [vmem:[#allocation5 + $0x290] sm:$0xf]  ;;  %v4348_v48 = vor.u32 %v6335_v31, %v4347_v30  ;;  %v7138_v49 = vadd.f32 %v3414_v46, %v3401_v41 }
 0x1bb   :  { %3687 = vmatpush.bf16.msra.mxu3 %v5212_v51  ;;  %3660 = vmatpush.bf16.msra.mxu1 %v4668_v4  ;;  %v6399_v36 = vld [vmem:[#allocation5 + $0x2ac] sm:$0xf0] }
 0x1bc   :  { %v4859_v37 = vld [vmem:[#allocation5 + $0x490] sm:$0xf]  ;;  %7348 = vst [vmem:[#allocation23_spill] sm:$0xff] %v7138_v49  ;;  %v4604_v50 = vor.u32 %v6399_v36, %v4603_v32  ;;  %v6792_v49 = vld [vmem:[#allocation5 + $0xef4] sm:$0xf0] }
 0x1bd   :  { %3674 = vmatpush.bf16.msra.mxu2 %v4924_v5  ;;  %v6463_v38 = vld [vmem:[#allocation5 + $0x4ac] sm:$0xf0]  ;;  %3647 = vmatpush.bf16.msra.mxu0 %v4380_v28 }
 0x1be   :  { %v5115_v9 = vld [vmem:[#allocation5 + $0x690] sm:$0xf]  ;;  %v4860_v51 = vor.u32 %v6463_v38, %v4859_v37 }
 0x1bf   :  { %3688 = vmatpush.bf16.msra.mxu3 %v5180_v15  ;;  %v6527_v45 = vld [vmem:[#allocation5 + $0x6ac] sm:$0xf0]  ;;  %3661 = vmatpush.bf16.msra.mxu1 %v4636_v24 }
 0x1c0   :  { %v4315_v54 = vld [vmem:[#allocation5 + $0x50] sm:$0xf]  ;;  %v5116_v59 = vor.u32 %v6527_v45, %v5115_v9 }
 0x1c1   :  { %3675 = vmatpush.bf16.msra.mxu2 %v4892_v29  ;;  %v6327_v55 = vld [vmem:[#allocation5 + $0x6c] sm:$0xf0]  ;;  %3648 = vmatpush.bf16.msra.mxu0 %v4348_v48 }
 0x1c2   :  { %v4571_v57 = vld [vmem:[#allocation5 + $0x250] sm:$0xf]  ;;  %v4316_v5 = vor.u32 %v6327_v55, %v4315_v54 }
 0x1c3   :  { %3689 = vmatpush.bf16.msra.mxu3 %v5148_v34  ;;  %v6391_v60 = vld [vmem:[#allocation5 + $0x26c] sm:$0xf0]  ;;  %3662 = vmatpush.bf16.msra.mxu1 %v4604_v50 }
 0x1c4   :  { %v4827_v0 = vld [vmem:[#allocation5 + $0x450] sm:$0xf]  ;;  %v4572_v13 = vor.u32 %v6391_v60, %v4571_v57  ;;  %v7140_v60 = vpop.f32.mrf.mxu0 }
 0x1c5   :  { %v6455_v2 = vld [vmem:[#allocation5 + $0x46c] sm:$0xf0]  ;;  %3676 = vmatpush.bf16.msra.mxu2 %v4860_v51  ;;  %3649 = vmatpush.bf16.msra.mxu0 %v4316_v5 }
 0x1c6   :  { %v5083_v3 = vld [vmem:[#allocation5 + $0x650] sm:$0xf]  ;;  %v4828_v14 = vor.u32 %v6455_v2, %v4827_v0 }
 0x1c7   :  { %v6519_v4 = vld [vmem:[#allocation5 + $0x66c] sm:$0xf0]  ;;  %3690 = vmatpush.bf16.msra.mxu3 %v5116_v59  ;;  %3663 = vmatpush.bf16.msra.mxu1 %v4572_v13 }
 0x1c8   :  { %v4283_v7 = vld [vmem:[#allocation5 + $0x10] sm:$0xf]  ;;  %v5084_v21 = vor.u32 %v6519_v4, %v5083_v3  ;;  %v7142_v4 = vpop.f32.mrf.mxu1 }
 0x1c9   :  { %v6319_v12 = vld [vmem:[#allocation5 + $0x2c] sm:$0xf0]  ;;  %3677 = vmatpush.bf16.msra.mxu2 %v4828_v14 }
 0x1ca   :  { %v4539_v15 = vld [vmem:[#allocation5 + $0x210] sm:$0xf]  ;;  %v4284_v30 = vor.u32 %v6319_v12, %v4283_v7 }
 0x1cb   :  { %v6383_v18 = vld [vmem:[#allocation5 + $0x22c] sm:$0xf0]  ;;  %3691 = vmatpush.bf16.msra.mxu3 %v5084_v21 }
 0x1cc   :  { %v4795_v20 = vld [vmem:[#allocation5 + $0x410] sm:$0xf]  ;;  %v4540_v35 = vor.u32 %v6383_v18, %v4539_v15  ;;  %3650 = vmatpush.bf16.msra.mxu0 %v4284_v30 }
 0x1cd   :  { %v6447_v22 = vld [vmem:[#allocation5 + $0x42c] sm:$0xf0] }
 0x1ce   :  { %v5051_v23 = vld [vmem:[#allocation5 + $0x610] sm:$0xf]  ;;  %v4796_v36 = vor.u32 %v6447_v22, %v4795_v20  ;;  %3664 = vmatpush.bf16.msra.mxu1 %v4540_v35  ;;  %v7151_v35 = vpop.f32.mrf.mxu2 }
 0x1cf   :  { %v6511_v27 = vld [vmem:[#allocation5 + $0x62c] sm:$0xf0]  ;;  %3651 = vmatmul.bf16.vlgmr.msra.gmra.mxu0 %v7050_v58  ;;  %7349 = vst [vmem:[#allocation24_spill] sm:$0xff] %v7151_v35  ;;  %v4517_v35 = vld [vmem:[#allocation5 + $0x1f8] sm:$0xf0] }
 0x1d0   :  { %v5531_v28 = vld [vmem:[#allocation5 + $0x9d0] sm:$0xf]  ;;  %v5052_v41 = vor.u32 %v6511_v27, %v5051_v23  ;;  %3678 = vmatpush.bf16.msra.mxu2 %v4796_v36 }
 0x1d1   :  { %v6631_v24 = vld [vmem:[#allocation5 + $0x9ec] sm:$0xf0]  ;;  %3665 = vmatmul.bf16.vlgmr.msra.gmra.mxu1 %v7056_v10 }
 0x1d2   :  { %v5787_v29 = vld [vmem:[#allocation5 + $0xbd0] sm:$0xf]  ;;  %v5532_v9 = vor.u32 %v6631_v24, %v5531_v28  ;;  %3692 = vmatpush.bf16.msra.mxu3 %v5052_v41  ;;  %v7148_v28 = vld [vmem:[#allocation7] sm:$0xff] }
 0x1d3   :  { %v6695_v31 = vld [vmem:[#allocation5 + $0xbec] sm:$0xf0]  ;;  %3679 = vmatmul.bf16.vlgmr.msra.gmra.mxu2 %v7052_v1  ;;  %v7330_v24 = vperm.slane %v7148_v28, 2 }
 0x1d4   :  { %v6043_v32 = vld [vmem:[#allocation5 + $0xdd0] sm:$0xf]  ;;  %v5788_v45 = vor.u32 %v6695_v31, %v5787_v29  ;;  %3699 = vmatpush.bf16.msrb.mxu0 %v5532_v9 }
 0x1d5   :  { %v6759_v34 = vld [vmem:[#allocation5 + $0xdec] sm:$0xf0]  ;;  %3693 = vmatmul.bf16.vlgmr.msra.gmra.mxu3 %v7058_v17 }
 0x1d6   :  { %v6299_v37 = vld [vmem:[#allocation5 + $0xfd0] sm:$0xf]  ;;  %v6044_v46 = vor.u32 %v6759_v34, %v6043_v32  ;;  %3713 = vmatpush.bf16.msrb.mxu1 %v5788_v45 }
 0x1d7   :  { %v6823_v38 = vld [vmem:[#allocation5 + $0xfec] sm:$0xf0] }
 0x1d8   :  { %v5499_v48 = vld [vmem:[#allocation5 + $0x990] sm:$0xf]  ;;  %v6300_v54 = vor.u32 %v6823_v38, %v6299_v37  ;;  %3727 = vmatpush.bf16.msrb.mxu2 %v6044_v46  ;;  %v3428_v46 = vpop.f32.mrf.mxu0 }
 0x1d9   :  { %v6623_v50 = vld [vmem:[#allocation5 + $0x9ac] sm:$0xf0] }
 0x1da   :  { %v5755_v51 = vld [vmem:[#allocation5 + $0xb90] sm:$0xf]  ;;  %v5500_v3 = vor.u32 %v6623_v50, %v5499_v48  ;;  %3741 = vmatpush.bf16.msrb.mxu3 %v6300_v54  ;;  %v7153_v48 = vpop.f32.mrf.mxu3 }
 0x1db   :  { %v6687_v55 = vld [vmem:[#allocation5 + $0xbac] sm:$0xf0]  ;;  %7350 = vst [vmem:[#allocation25_spill] sm:$0xff] %v7153_v48 }
 0x1dc   :  { %v6011_v57 = vld [vmem:[#allocation5 + $0xd90] sm:$0xf]  ;;  %v5756_v5 = vor.u32 %v6687_v55, %v5755_v51  ;;  %3700 = vmatpush.bf16.msrb.mxu0 %v5500_v3  ;;  %v3429_v51 = vadd.f32 %v3428_v46, %v7330_v24  ;;  %v5501_v24 = vld [vmem:[#allocation5 + $0x9b0] sm:$0xf0] }
 0x1dd   :  { %v6751_v59 = vld [vmem:[#allocation5 + $0xdac] sm:$0xf0] }
 0x1de   :  { %v6267_v0 = vld [vmem:[#allocation5 + $0xf90] sm:$0xf]  ;;  %v6012_v7 = vor.u32 %v6751_v59, %v6011_v57  ;;  %3714 = vmatpush.bf16.msrb.mxu1 %v5756_v5 }
 0x1df   :  { %v6815_v2 = vld [vmem:[#allocation5 + $0xfac] sm:$0xf0] }
 0x1e0   :  { %v5467_v12 = vld [vmem:[#allocation5 + $0x950] sm:$0xf]  ;;  %v6268_v15 = vor.u32 %v6815_v2, %v6267_v0  ;;  %3728 = vmatpush.bf16.msrb.mxu2 %v6012_v7  ;;  %v3442_v2 = vpop.f32.mrf.mxu1 }
 0x1e1   :  { %v6615_v13 = vld [vmem:[#allocation5 + $0x96c] sm:$0xf0] }
 0x1e2   :  { %v5723_v14 = vld [vmem:[#allocation5 + $0xb50] sm:$0xf]  ;;  %v5468_v27 = vor.u32 %v6615_v13, %v5467_v12  ;;  %3742 = vmatpush.bf16.msrb.mxu3 %v6268_v15  ;;  %v3443_v13 = vadd.f32 %v3442_v2, %v3429_v51 }
 0x1e3   :  { %v6679_v18 = vld [vmem:[#allocation5 + $0xb6c] sm:$0xf0] }
 0x1e4   :  { %v5979_v20 = vld [vmem:[#allocation5 + $0xd50] sm:$0xf]  ;;  %v5724_v29 = vor.u32 %v6679_v18, %v5723_v14  ;;  %3701 = vmatpush.bf16.msrb.mxu0 %v5468_v27 }
 0x1e5   :  { %v6743_v21 = vld [vmem:[#allocation5 + $0xd6c] sm:$0xf0] }
 0x1e6   :  { %v6235_v22 = vld [vmem:[#allocation5 + $0xf50] sm:$0xf]  ;;  %v5980_v30 = vor.u32 %v6743_v21, %v5979_v20  ;;  %3715 = vmatpush.bf16.msrb.mxu1 %v5724_v29 }
 0x1e7   :  { %v6807_v23 = vld [vmem:[#allocation5 + $0xf6c] sm:$0xf0] }
 0x1e8   :  { %v5435_v31 = vld [vmem:[#allocation5 + $0x910] sm:$0xf]  ;;  %v6236_v36 = vor.u32 %v6807_v23, %v6235_v22  ;;  %3729 = vmatpush.bf16.msrb.mxu2 %v5980_v30 }
 0x1e9   :  { %v6607_v32 = vld [vmem:[#allocation5 + $0x92c] sm:$0xf0] }
 0x1ea   :  { %v5691_v34 = vld [vmem:[#allocation5 + $0xb10] sm:$0xf]  ;;  %v5436_v50 = vor.u32 %v6607_v32, %v5435_v31  ;;  %3743 = vmatpush.bf16.msrb.mxu3 %v6236_v36 }
 0x1eb   :  { %v6671_v37 = vld [vmem:[#allocation5 + $0xb2c] sm:$0xf0] }
 0x1ec   :  { %v5947_v38 = vld [vmem:[#allocation5 + $0xd10] sm:$0xf]  ;;  %v5692_v54 = vor.u32 %v6671_v37, %v5691_v34  ;;  %3702 = vmatpush.bf16.msrb.mxu0 %v5436_v50  ;;  %v3456_v34 = vpop.f32.mrf.mxu2 }
 0x1ed   :  { %v6735_v41 = vld [vmem:[#allocation5 + $0xd2c] sm:$0xf0] }
 0x1ee   :  { %v6203_v9 = vld [vmem:[#allocation5 + $0xf10] sm:$0xf]  ;;  %v5948_v55 = vor.u32 %v6735_v41, %v5947_v38  ;;  %3716 = vmatpush.bf16.msrb.mxu1 %v5692_v54  ;;  %v3457_v38 = vadd.f32 %v3456_v34, %v3443_v13 }
 0x1ef   :  { %v6799_v45 = vld [vmem:[#allocation5 + $0xf2c] sm:$0xf0] }
 0x1f0   :  { %v5403_v57 = vld [vmem:[#allocation5 + $0x8d0] sm:$0xf]  ;;  %v6204_v3 = vor.u32 %v6799_v45, %v6203_v9  ;;  %3730 = vmatpush.bf16.msrb.mxu2 %v5948_v55  ;;  %v3470_v9 = vpop.f32.mrf.mxu3 }
 0x1f1   :  { %v6599_v59 = vld [vmem:[#allocation5 + $0x8ec] sm:$0xf0]  ;;  %v7157_v55 = vadd.f32 %v3470_v9, %v3457_v38  ;;  %v5021_v38 = vld [vmem:[#allocation5 + $0x5f0] sm:$0xf0] }
 0x1f2   :  { %v5659_v0 = vld [vmem:[#allocation5 + $0xad0] sm:$0xf]  ;;  %v5404_v18 = vor.u32 %v6599_v59, %v5403_v57  ;;  %3744 = vmatpush.bf16.msrb.mxu3 %v6204_v3 }
 0x1f3   :  { %v6663_v5 = vld [vmem:[#allocation5 + $0xaec] sm:$0xf0] }
 0x1f4   :  { %v5915_v7 = vld [vmem:[#allocation5 + $0xcd0] sm:$0xf]  ;;  %v5660_v20 = vor.u32 %v6663_v5, %v5659_v0  ;;  %3703 = vmatpush.bf16.msrb.mxu0 %v5404_v18 }
 0x1f5   :  { %v6727_v12 = vld [vmem:[#allocation5 + $0xcec] sm:$0xf0] }
 0x1f6   :  { %v6171_v14 = vld [vmem:[#allocation5 + $0xed0] sm:$0xf]  ;;  %v5916_v21 = vor.u32 %v6727_v12, %v5915_v7  ;;  %3717 = vmatpush.bf16.msrb.mxu1 %v5660_v20 }
 0x1f7   :  { %v6791_v15 = vld [vmem:[#allocation5 + $0xeec] sm:$0xf0] }
 0x1f8   :  { %v5371_v22 = vld [vmem:[#allocation5 + $0x890] sm:$0xf]  ;;  %v6172_v29 = vor.u32 %v6791_v15, %v6171_v14  ;;  %3731 = vmatpush.bf16.msrb.mxu2 %v5916_v21 }
 0x1f9   :  { %v6591_v23 = vld [vmem:[#allocation5 + $0x8ac] sm:$0xf0] }
 0x1fa   :  { %v5627_v27 = vld [vmem:[#allocation5 + $0xa90] sm:$0xf]  ;;  %v5372_v41 = vor.u32 %v6591_v23, %v5371_v22  ;;  %3745 = vmatpush.bf16.msrb.mxu3 %v6172_v29 }
 0x1fb   :  { %v6655_v30 = vld [vmem:[#allocation5 + $0xaac] sm:$0xf0] }
 0x1fc   :  { %v5883_v31 = vld [vmem:[#allocation5 + $0xc90] sm:$0xf]  ;;  %v5628_v45 = vor.u32 %v6655_v30, %v5627_v27  ;;  %3704 = vmatpush.bf16.msrb.mxu0 %v5372_v41  ;;  %v6371_v30 = vld [vmem:[#allocation5 + $0x1d4] sm:$0xf] }
 0x1fd   :  { %v6719_v32 = vld [vmem:[#allocation5 + $0xcac] sm:$0xf0] }
 0x1fe   :  { %v6139_v36 = vld [vmem:[#allocation5 + $0xe90] sm:$0xf]  ;;  %v5884_v46 = vor.u32 %v6719_v32, %v5883_v31  ;;  %3718 = vmatpush.bf16.msrb.mxu1 %v5628_v45  ;;  %v4509_v31 = vld [vmem:[#allocation5 + $0x1f0] sm:$0xf0] }
 0x1ff   :  { %v6783_v37 = vld [vmem:[#allocation5 + $0xeac] sm:$0xf0]  ;;  %v6435_v32 = vld [vmem:[#allocation5 + $0x3d4] sm:$0xf] }
 0x200   :  { %v5339_v50 = vld [vmem:[#allocation5 + $0x850] sm:$0xf]  ;;  %v6140_v57 = vor.u32 %v6783_v37, %v6139_v36  ;;  %3732 = vmatpush.bf16.msrb.mxu2 %v5884_v46  ;;  %v4765_v36 = vld [vmem:[#allocation5 + $0x3f0] sm:$0xf0] }
 0x201   :  { %v6583_v51 = vld [vmem:[#allocation5 + $0x86c] sm:$0xf0]  ;;  %v6499_v37 = vld [vmem:[#allocation5 + $0x5d4] sm:$0xf] }
 0x202   :  { %v5595_v54 = vld [vmem:[#allocation5 + $0xa50] sm:$0xf]  ;;  %v5340_v7 = vor.u32 %v6583_v51, %v5339_v50  ;;  %3746 = vmatpush.bf16.msrb.mxu3 %v6140_v57  ;;  %v6563_v45 = vld [vmem:[#allocation5 + $0x7d4] sm:$0xf]  ;;  %v4512_v51 = vor.u32 %v6371_v30, %v4509_v31  ;;  %v5024_v57 = vor.u32 %v6499_v37, %v5021_v38 }
 0x203   :  { %v6647_v59 = vld [vmem:[#allocation5 + $0xa6c] sm:$0xf0]  ;;  %v5277_v46 = vld [vmem:[#allocation5 + $0x7f0] sm:$0xf0] }
 0x204   :  { %v5851_v0 = vld [vmem:[#allocation5 + $0xc50] sm:$0xf]  ;;  %v5596_v14 = vor.u32 %v6647_v59, %v5595_v54  ;;  %3705 = vmatpush.bf16.msrb.mxu0 %v5340_v7  ;;  %v4768_v54 = vor.u32 %v6435_v32, %v4765_v36  ;;  %v7159_v59 = vpop.f32.mrf.mxu0  ;;  %v4733_v7 = vld [vmem:[#allocation5 + $0x3b0] sm:$0xf0] }
 0x205   :  { %v6711_v2 = vld [vmem:[#allocation5 + $0xc6c] sm:$0xf0]  ;;  %v4701_v31 = vld [vmem:[#allocation5 + $0x370] sm:$0xf0] }
 0x206   :  { %v6107_v3 = vld [vmem:[#allocation5 + $0xe50] sm:$0xf]  ;;  %v5852_v15 = vor.u32 %v6711_v2, %v5851_v0  ;;  %3719 = vmatpush.bf16.msrb.mxu1 %v5596_v14  ;;  %v6363_v0 = vld [vmem:[#allocation5 + $0x194] sm:$0xf] }
 0x207   :  { %v6775_v5 = vld [vmem:[#allocation5 + $0xe6c] sm:$0xf0]  ;;  %v4477_v2 = vld [vmem:[#allocation5 + $0x1b0] sm:$0xf0] }
 0x208   :  { %v5307_v12 = vld [vmem:[#allocation5 + $0x810] sm:$0xf]  ;;  %v6108_v22 = vor.u32 %v6775_v5, %v6107_v3  ;;  %3733 = vmatpush.bf16.msrb.mxu2 %v5852_v15  ;;  %v6427_v3 = vld [vmem:[#allocation5 + $0x394] sm:$0xf]  ;;  %v5280_v5 = vor.u32 %v6563_v45, %v5277_v46 }
 0x209   :  { %v6575_v13 = vld [vmem:[#allocation5 + $0x82c] sm:$0xf0]  ;;  %v6555_v14 = vld [vmem:[#allocation5 + $0x794] sm:$0xf] }
 0x20a   :  { %v5563_v18 = vld [vmem:[#allocation5 + $0xa10] sm:$0xf]  ;;  %v5308_v34 = vor.u32 %v6575_v13, %v5307_v12  ;;  %3747 = vmatpush.bf16.msrb.mxu3 %v6108_v22  ;;  %v6491_v12 = vld [vmem:[#allocation5 + $0x594] sm:$0xf] }
 0x20b   :  { %v6639_v20 = vld [vmem:[#allocation5 + $0xa2c] sm:$0xf0]  ;;  %v4989_v13 = vld [vmem:[#allocation5 + $0x5b0] sm:$0xf0] }
 0x20c   :  { %v5819_v21 = vld [vmem:[#allocation5 + $0xc10] sm:$0xf]  ;;  %v5564_v41 = vor.u32 %v6639_v20, %v5563_v18  ;;  %3706 = vmatpush.bf16.msrb.mxu0 %v5308_v34  ;;  %v5245_v15 = vld [vmem:[#allocation5 + $0x7b0] sm:$0xf0]  ;;  %v7161_v18 = vpop.f32.mrf.mxu1  ;;  %v4480_v20 = vor.u32 %v6363_v0, %v4477_v2  ;;  %v4992_v22 = vor.u32 %v6491_v12, %v4989_v13 }
 0x20d   :  { %v6703_v23 = vld [vmem:[#allocation5 + $0xc2c] sm:$0xf0]  ;;  %v5248_v30 = vor.u32 %v6555_v14, %v5245_v15  ;;  %v6483_v32 = vld [vmem:[#allocation5 + $0x554] sm:$0xf] }
 0x20e   :  { %v6075_v27 = vld [vmem:[#allocation5 + $0xe10] sm:$0xf]  ;;  %v5820_v9 = vor.u32 %v6703_v23, %v5819_v21  ;;  %3720 = vmatpush.bf16.msrb.mxu1 %v5564_v41  ;;  %v4736_v21 = vor.u32 %v6427_v3, %v4733_v7  ;;  %v6355_v23 = vld [vmem:[#allocation5 + $0x154] sm:$0xf]  ;;  %v7167_v41 = vpop.f32.mrf.mxu2 }
 0x20f   :  { %v6767_v29 = vld [vmem:[#allocation5 + $0xe2c] sm:$0xf0]  ;;  %3707 = vmatmul.bf16.vlgmr.msrb.gmra.mxu0 %v7062_v39  ;;  %v4957_v34 = vld [vmem:[#allocation5 + $0x570] sm:$0xf0] }
 0x210   :  { %v6076_v50 = vor.u32 %v6767_v29, %v6075_v27  ;;  %3734 = vmatpush.bf16.msrb.mxu2 %v5820_v9  ;;  %3755 = vmatpush.bf16.msra.mxu0 %v4512_v51  ;;  %v4445_v27 = vld [vmem:[#allocation5 + $0x170] sm:$0xf0]  ;;  %v4960_v45 = vor.u32 %v6483_v32, %v4957_v34 }
 0x211   :  { %v6419_v29 = vld [vmem:[#allocation5 + $0x354] sm:$0xf]  ;;  %3721 = vmatmul.bf16.vlgmr.msrb.gmra.mxu1 %v7066_v44  ;;  %v4448_v38 = vor.u32 %v6355_v23, %v4445_v27 }
 0x212   :  { %3748 = vmatpush.bf16.msrb.mxu3 %v6076_v50  ;;  %3769 = vmatpush.bf16.msra.mxu1 %v4768_v54  ;;  %v6547_v36 = vld [vmem:[#allocation5 + $0x754] sm:$0xf]  ;;  %v4704_v9 = vor.u32 %v6419_v29, %v4701_v31 }
 0x213   :  { %3735 = vmatmul.bf16.vlgmr.msrb.gmra.mxu2 %v7064_v43  ;;  %v5213_v37 = vld [vmem:[#allocation5 + $0x770] sm:$0xf0] }
 0x214   :  { %3783 = vmatpush.bf16.msra.mxu2 %v5024_v57  ;;  %3756 = vmatpush.bf16.msra.mxu0 %v4480_v20  ;;  %v6347_v46 = vld [vmem:[#allocation5 + $0x114] sm:$0xf]  ;;  %v5216_v54 = vor.u32 %v6547_v36, %v5213_v37  ;;  %v7169_v57 = vpop.f32.mrf.mxu3 }
 0x215   :  { %3749 = vmatmul.bf16.vlgmr.msrb.gmra.mxu3 %v7068_v47  ;;  %v4413_v50 = vld [vmem:[#allocation5 + $0x130] sm:$0xf0] }
 0x216   :  { %3797 = vmatpush.bf16.msra.mxu3 %v5280_v5  ;;  %3770 = vmatpush.bf16.msra.mxu1 %v4736_v21  ;;  %v6411_v51 = vld [vmem:[#allocation5 + $0x314] sm:$0xf]  ;;  %v3484_v5 = vpop.f32.mrf.mxu0  ;;  %v4416_v14 = vor.u32 %v6347_v46, %v4413_v50  ;;  %v3498_v21 = vpop.f32.mrf.mxu1 }
 0x217   :  { %v4669_v0 = vld [vmem:[#allocation5 + $0x330] sm:$0xf0]  ;;  %v3485_v13 = vadd.f32 %v3484_v5, %v7157_v55 }
 0x218   :  { %3784 = vmatpush.bf16.msra.mxu2 %v4992_v22  ;;  %v6475_v2 = vld [vmem:[#allocation5 + $0x514] sm:$0xf]  ;;  %3757 = vmatpush.bf16.msra.mxu0 %v4448_v38  ;;  %v4672_v15 = vor.u32 %v6411_v51, %v4669_v0  ;;  %v3512_v0 = vpop.f32.mrf.mxu2 }
 0x219   :  { %v4925_v3 = vld [vmem:[#allocation5 + $0x530] sm:$0xf0] }
 0x21a   :  { %3798 = vmatpush.bf16.msra.mxu3 %v5248_v30  ;;  %v6539_v7 = vld [vmem:[#allocation5 + $0x714] sm:$0xf]  ;;  %3771 = vmatpush.bf16.msra.mxu1 %v4704_v9  ;;  %v4928_v20 = vor.u32 %v6475_v2, %v4925_v3  ;;  %v3499_v30 = vadd.f32 %v3498_v21, %v3485_v13 }
 0x21b   :  { %v5181_v12 = vld [vmem:[#allocation5 + $0x730] sm:$0xf0] }
 0x21c   :  { %3785 = vmatpush.bf16.msra.mxu2 %v4960_v45  ;;  %v6339_v22 = vld [vmem:[#allocation5 + $0xd4] sm:$0xf]  ;;  %v5184_v29 = vor.u32 %v6539_v7, %v5181_v12  ;;  %3758 = vmatpush.bf16.msra.mxu0 %v4416_v14  ;;  %v3513_v5 = vadd.f32 %v3512_v0, %v3499_v30  ;;  %v3526_v13 = vpop.f32.mrf.mxu3 }
 0x21d   :  { %v4381_v23 = vld [vmem:[#allocation5 + $0xf0] sm:$0xf0] }
 0x21e   :  { %v6403_v27 = vld [vmem:[#allocation5 + $0x2d4] sm:$0xf]  ;;  %3799 = vmatpush.bf16.msra.mxu3 %v5216_v54  ;;  %v4384_v38 = vor.u32 %v6339_v22, %v4381_v23  ;;  %3772 = vmatpush.bf16.msra.mxu1 %v4672_v15  ;;  %v7172_v15 = vadd.f32 %v3526_v13, %v3513_v5 }
 0x21f   :  { %v4637_v31 = vld [vmem:[#allocation5 + $0x2f0] sm:$0xf0] }
 0x220   :  { %v6467_v32 = vld [vmem:[#allocation5 + $0x4d4] sm:$0xf]  ;;  %3786 = vmatpush.bf16.msra.mxu2 %v4928_v20  ;;  %v4640_v55 = vor.u32 %v6403_v27, %v4637_v31  ;;  %3759 = vmatpush.bf16.msra.mxu0 %v4384_v38  ;;  %7351 = vst [vmem:[#allocation26_spill] sm:$0xff] %v7172_v15  ;;  %v6624_v15 = vld [vmem:[#allocation5 + $0x9b4] sm:$0xf0] }
 0x221   :  { %v4893_v34 = vld [vmem:[#allocation5 + $0x4f0] sm:$0xf0] }
 0x222   :  { %v6531_v36 = vld [vmem:[#allocation5 + $0x6d4] sm:$0xf]  ;;  %v4896_v9 = vor.u32 %v6467_v32, %v4893_v34  ;;  %3800 = vmatpush.bf16.msra.mxu3 %v5184_v29  ;;  %3773 = vmatpush.bf16.msra.mxu1 %v4640_v55 }
 0x223   :  { %v5149_v37 = vld [vmem:[#allocation5 + $0x6f0] sm:$0xf0] }
 0x224   :  { %v6331_v45 = vld [vmem:[#allocation5 + $0x94] sm:$0xf]  ;;  %v5152_v51 = vor.u32 %v6531_v36, %v5149_v37  ;;  %3787 = vmatpush.bf16.msra.mxu2 %v4896_v9 }
 0x225   :  { %v4349_v46 = vld [vmem:[#allocation5 + $0xb0] sm:$0xf0] }
 0x226   :  { %v6395_v50 = vld [vmem:[#allocation5 + $0x294] sm:$0xf]  ;;  %v4352_v14 = vor.u32 %v6331_v45, %v4349_v46  ;;  %3801 = vmatpush.bf16.msra.mxu3 %v5152_v51 }
 0x227   :  { %v4605_v54 = vld [vmem:[#allocation5 + $0x2b0] sm:$0xf0] }
 0x228   :  { %v6459_v2 = vld [vmem:[#allocation5 + $0x494] sm:$0xf]  ;;  %v4608_v20 = vor.u32 %v6395_v50, %v4605_v54  ;;  %3760 = vmatpush.bf16.msra.mxu0 %v4352_v14 }
 0x229   :  { %v4861_v3 = vld [vmem:[#allocation5 + $0x4b0] sm:$0xf0] }
 0x22a   :  { %v6523_v7 = vld [vmem:[#allocation5 + $0x694] sm:$0xf]  ;;  %v4864_v21 = vor.u32 %v6459_v2, %v4861_v3  ;;  %3774 = vmatpush.bf16.msra.mxu1 %v4608_v20 }
 0x22b   :  { %v5117_v12 = vld [vmem:[#allocation5 + $0x6b0] sm:$0xf0] }
 0x22c   :  { %v6323_v22 = vld [vmem:[#allocation5 + $0x54] sm:$0xf]  ;;  %v5120_v29 = vor.u32 %v6523_v7, %v5117_v12  ;;  %3788 = vmatpush.bf16.msra.mxu2 %v4864_v21 }
 0x22d   :  { %v4317_v23 = vld [vmem:[#allocation5 + $0x70] sm:$0xf0] }
 0x22e   :  { %v6387_v27 = vld [vmem:[#allocation5 + $0x254] sm:$0xf]  ;;  %v4320_v37 = vor.u32 %v6323_v22, %v4317_v23  ;;  %3802 = vmatpush.bf16.msra.mxu3 %v5120_v29 }
 0x22f   :  { %v4573_v31 = vld [vmem:[#allocation5 + $0x270] sm:$0xf0] }
 0x230   :  { %v6451_v32 = vld [vmem:[#allocation5 + $0x454] sm:$0xf]  ;;  %v4576_v55 = vor.u32 %v6387_v27, %v4573_v31  ;;  %3761 = vmatpush.bf16.msra.mxu0 %v4320_v37 }
 0x231   :  { %v4829_v34 = vld [vmem:[#allocation5 + $0x470] sm:$0xf0] }
 0x232   :  { %v6515_v30 = vld [vmem:[#allocation5 + $0x654] sm:$0xf]  ;;  %v4832_v9 = vor.u32 %v6451_v32, %v4829_v34  ;;  %3775 = vmatpush.bf16.msra.mxu1 %v4576_v55 }
 0x233   :  { %v5085_v36 = vld [vmem:[#allocation5 + $0x670] sm:$0xf0] }
 0x234   :  { %v6315_v38 = vld [vmem:[#allocation5 + $0x14] sm:$0xf]  ;;  %v5088_v54 = vor.u32 %v6515_v30, %v5085_v36  ;;  %3789 = vmatpush.bf16.msra.mxu2 %v4832_v9 }
 0x235   :  { %v4285_v45 = vld [vmem:[#allocation5 + $0x30] sm:$0xf0] }
 0x236   :  { %v6379_v46 = vld [vmem:[#allocation5 + $0x214] sm:$0xf]  ;;  %v4288_v13 = vor.u32 %v6315_v38, %v4285_v45  ;;  %3803 = vmatpush.bf16.msra.mxu3 %v5088_v54 }
 0x237   :  { %v4541_v50 = vld [vmem:[#allocation5 + $0x230] sm:$0xf0] }
 0x238   :  { %v6443_v0 = vld [vmem:[#allocation5 + $0x414] sm:$0xf]  ;;  %v4544_v20 = vor.u32 %v6379_v46, %v4541_v50  ;;  %3762 = vmatpush.bf16.msra.mxu0 %v4288_v13 }
 0x239   :  { %v4797_v51 = vld [vmem:[#allocation5 + $0x430] sm:$0xf0] }
 0x23a   :  { %v6507_v2 = vld [vmem:[#allocation5 + $0x614] sm:$0xf]  ;;  %v4800_v21 = vor.u32 %v6443_v0, %v4797_v51  ;;  %3776 = vmatpush.bf16.msra.mxu1 %v4544_v20 }
 0x23b   :  { %v5053_v3 = vld [vmem:[#allocation5 + $0x630] sm:$0xf0]  ;;  %3763 = vmatmul.bf16.vlgmr.msra.gmra.mxu0 %v7050_v58 }
 0x23c   :  { %v6627_v5 = vld [vmem:[#allocation5 + $0x9d4] sm:$0xf]  ;;  %v5056_v29 = vor.u32 %v6507_v2, %v5053_v3  ;;  %3790 = vmatpush.bf16.msra.mxu2 %v4800_v21 }
 0x23d   :  { %v5533_v7 = vld [vmem:[#allocation5 + $0x9f0] sm:$0xf0]  ;;  %3777 = vmatmul.bf16.vlgmr.msra.gmra.mxu1 %v7056_v10 }
 0x23e   :  { %v6691_v12 = vld [vmem:[#allocation5 + $0xbd4] sm:$0xf]  ;;  %v5536_v32 = vor.u32 %v6627_v5, %v5533_v7  ;;  %3804 = vmatpush.bf16.msra.mxu3 %v5056_v29 }
 0x23f   :  { %v5789_v14 = vld [vmem:[#allocation5 + $0xbf0] sm:$0xf0]  ;;  %3791 = vmatmul.bf16.vlgmr.msra.gmra.mxu2 %v7052_v1 }
 0x240   :  { %v6755_v22 = vld [vmem:[#allocation5 + $0xdd4] sm:$0xf]  ;;  %v5792_v34 = vor.u32 %v6691_v12, %v5789_v14  ;;  %3811 = vmatpush.bf16.msrb.mxu0 %v5536_v32 }
 0x241   :  { %v6045_v23 = vld [vmem:[#allocation5 + $0xdf0] sm:$0xf0]  ;;  %3805 = vmatmul.bf16.vlgmr.msra.gmra.mxu3 %v7058_v17 }
 0x242   :  { %v6819_v27 = vld [vmem:[#allocation5 + $0xfd4] sm:$0xf]  ;;  %v6048_v30 = vor.u32 %v6755_v22, %v6045_v23  ;;  %3825 = vmatpush.bf16.msrb.mxu1 %v5792_v34 }
 0x243   :  { %v6301_v31 = vld [vmem:[#allocation5 + $0xff0] sm:$0xf0] }
 0x244   :  { %v6619_v36 = vld [vmem:[#allocation5 + $0x994] sm:$0xf]  ;;  %v6304_v37 = vor.u32 %v6819_v27, %v6301_v31  ;;  %3839 = vmatpush.bf16.msrb.mxu2 %v6048_v30 }
 0x245   :  { %v5757_v38 = vld [vmem:[#allocation5 + $0xbb0] sm:$0xf0]  ;;  %v5504_v46 = vor.u32 %v6619_v36, %v5501_v24 }
 0x246   :  { %v6747_v45 = vld [vmem:[#allocation5 + $0xd94] sm:$0xf]  ;;  %v5760_v50 = vor.u32 %v6683_v19, %v5757_v38  ;;  %3853 = vmatpush.bf16.msrb.mxu3 %v6304_v37 }
 0x247   :  { %v6811_v55 = vld [vmem:[#allocation5 + $0xf94] sm:$0xf]  ;;  %v6016_v0 = vor.u32 %v6747_v45, %v6013_v8  ;;  %3812 = vmatpush.bf16.msrb.mxu0 %v5504_v46 }
 0x248   :  { %v6269_v9 = vld [vmem:[#allocation5 + $0xfb0] sm:$0xf0]  ;;  %3826 = vmatpush.bf16.msrb.mxu1 %v5760_v50 }
 0x249   :  { %v6611_v54 = vld [vmem:[#allocation5 + $0x954] sm:$0xf]  ;;  %v6272_v3 = vor.u32 %v6811_v55, %v6269_v9  ;;  %3840 = vmatpush.bf16.msrb.mxu2 %v6016_v0 }
 0x24a   :  { %v5469_v51 = vld [vmem:[#allocation5 + $0x970] sm:$0xf0] }
 0x24b   :  { %v6675_v2 = vld [vmem:[#allocation5 + $0xb54] sm:$0xf]  ;;  %v5472_v24 = vor.u32 %v6611_v54, %v5469_v51  ;;  %3854 = vmatpush.bf16.msrb.mxu3 %v6272_v3 }
 0x24c   :  { %v5725_v5 = vld [vmem:[#allocation5 + $0xb70] sm:$0xf0] }
 0x24d   :  { %v6739_v7 = vld [vmem:[#allocation5 + $0xd54] sm:$0xf]  ;;  %v5728_v8 = vor.u32 %v6675_v2, %v5725_v5  ;;  %3813 = vmatpush.bf16.msrb.mxu0 %v5472_v24 }
 0x24e   :  { %v5981_v12 = vld [vmem:[#allocation5 + $0xd70] sm:$0xf0] }
 0x24f   :  { %v6803_v13 = vld [vmem:[#allocation5 + $0xf54] sm:$0xf]  ;;  %v5984_v19 = vor.u32 %v6739_v7, %v5981_v12  ;;  %3827 = vmatpush.bf16.msrb.mxu1 %v5728_v8 }
 0x250   :  { %v6237_v14 = vld [vmem:[#allocation5 + $0xf70] sm:$0xf0] }
 0x251   :  { %v6603_v22 = vld [vmem:[#allocation5 + $0x914] sm:$0xf]  ;;  %v6240_v21 = vor.u32 %v6803_v13, %v6237_v14  ;;  %3841 = vmatpush.bf16.msrb.mxu2 %v5984_v19 }
 0x252   :  { %v5437_v23 = vld [vmem:[#allocation5 + $0x930] sm:$0xf0] }
 0x253   :  { %v6667_v20 = vld [vmem:[#allocation5 + $0xb14] sm:$0xf]  ;;  %v5440_v30 = vor.u32 %v6603_v22, %v5437_v23  ;;  %3855 = vmatpush.bf16.msrb.mxu3 %v6240_v21 }
 0x254   :  { %v5693_v27 = vld [vmem:[#allocation5 + $0xb30] sm:$0xf0] }
 0x255   :  { %v6731_v31 = vld [vmem:[#allocation5 + $0xd14] sm:$0xf]  ;;  %v5696_v36 = vor.u32 %v6667_v20, %v5693_v27  ;;  %3814 = vmatpush.bf16.msrb.mxu0 %v5440_v30 }
 0x256   :  { %v5949_v29 = vld [vmem:[#allocation5 + $0xd30] sm:$0xf0] }
 0x257   :  { %v6795_v32 = vld [vmem:[#allocation5 + $0xf14] sm:$0xf]  ;;  %v5952_v37 = vor.u32 %v6731_v31, %v5949_v29  ;;  %3828 = vmatpush.bf16.msrb.mxu1 %v5696_v36 }
 0x258   :  { %v6205_v34 = vld [vmem:[#allocation5 + $0xf30] sm:$0xf0] }
 0x259   :  { %v6595_v38 = vld [vmem:[#allocation5 + $0x8d4] sm:$0xf]  ;;  %v6208_v9 = vor.u32 %v6795_v32, %v6205_v34  ;;  %3842 = vmatpush.bf16.msrb.mxu2 %v5952_v37 }
 0x25a   :  { %v5405_v45 = vld [vmem:[#allocation5 + $0x8f0] sm:$0xf0] }
 0x25b   :  { %v6659_v55 = vld [vmem:[#allocation5 + $0xad4] sm:$0xf]  ;;  %v5408_v2 = vor.u32 %v6595_v38, %v5405_v45  ;;  %3856 = vmatpush.bf16.msrb.mxu3 %v6208_v9 }
 0x25c   :  { %v5661_v46 = vld [vmem:[#allocation5 + $0xaf0] sm:$0xf0] }
 0x25d   :  { %v6723_v50 = vld [vmem:[#allocation5 + $0xcd4] sm:$0xf]  ;;  %v5664_v3 = vor.u32 %v6659_v55, %v5661_v46  ;;  %3815 = vmatpush.bf16.msrb.mxu0 %v5408_v2 }
 0x25e   :  { %v5917_v0 = vld [vmem:[#allocation5 + $0xcf0] sm:$0xf0] }
 0x25f   :  { %v6787_v54 = vld [vmem:[#allocation5 + $0xed4] sm:$0xf]  ;;  %v5920_v5 = vor.u32 %v6723_v50, %v5917_v0  ;;  %3829 = vmatpush.bf16.msrb.mxu1 %v5664_v3 }
 0x260   :  { %v6173_v51 = vld [vmem:[#allocation5 + $0xef0] sm:$0xf0] }
 0x261   :  { %v6587_v7 = vld [vmem:[#allocation5 + $0x894] sm:$0xf]  ;;  %v6176_v14 = vor.u32 %v6787_v54, %v6173_v51  ;;  %3843 = vmatpush.bf16.msrb.mxu2 %v5920_v5 }
 0x262   :  { %v5373_v12 = vld [vmem:[#allocation5 + $0x8b0] sm:$0xf0] }
 0x263   :  { %v6651_v13 = vld [vmem:[#allocation5 + $0xa94] sm:$0xf]  ;;  %v5376_v20 = vor.u32 %v6587_v7, %v5373_v12  ;;  %3857 = vmatpush.bf16.msrb.mxu3 %v6176_v14  ;;  %v6376_v14 = vld [vmem:[#allocation5 + $0x1f4] sm:$0xf0] }
 0x264   :  { %v5629_v24 = vld [vmem:[#allocation5 + $0xab0] sm:$0xf0] }
 0x265   :  { %v6715_v8 = vld [vmem:[#allocation5 + $0xc94] sm:$0xf]  ;;  %v5632_v21 = vor.u32 %v6651_v13, %v5629_v24  ;;  %3816 = vmatpush.bf16.msrb.mxu0 %v5376_v20  ;;  %v4515_v13 = vld [vmem:[#allocation5 + $0x1d8] sm:$0xf] }
 0x266   :  { %v5885_v19 = vld [vmem:[#allocation5 + $0xcb0] sm:$0xf0]  ;;  %v4771_v24 = vld [vmem:[#allocation5 + $0x3d8] sm:$0xf] }
 0x267   :  { %v6779_v22 = vld [vmem:[#allocation5 + $0xe94] sm:$0xf]  ;;  %v5888_v27 = vor.u32 %v6715_v8, %v5885_v19  ;;  %3830 = vmatpush.bf16.msrb.mxu1 %v5632_v21  ;;  %v6440_v19 = vld [vmem:[#allocation5 + $0x3f4] sm:$0xf0] }
 0x268   :  { %v6141_v23 = vld [vmem:[#allocation5 + $0xeb0] sm:$0xf0] }
 0x269   :  { %v6579_v31 = vld [vmem:[#allocation5 + $0x854] sm:$0xf]  ;;  %v6144_v34 = vor.u32 %v6779_v22, %v6141_v23  ;;  %3844 = vmatpush.bf16.msrb.mxu2 %v5888_v27  ;;  %v5027_v22 = vld [vmem:[#allocation5 + $0x5d8] sm:$0xf] }
 0x26a   :  { %v5341_v29 = vld [vmem:[#allocation5 + $0x870] sm:$0xf0]  ;;  %v6504_v23 = vld [vmem:[#allocation5 + $0x5f4] sm:$0xf0] }
 0x26b   :  { %v6643_v32 = vld [vmem:[#allocation5 + $0xa54] sm:$0xf]  ;;  %v5344_v55 = vor.u32 %v6579_v31, %v5341_v29  ;;  %3858 = vmatpush.bf16.msrb.mxu3 %v6144_v34  ;;  %v5283_v27 = vld [vmem:[#allocation5 + $0x7d8] sm:$0xf]  ;;  %v4772_v34 = vor.u32 %v6440_v19, %v4771_v24 }
 0x26c   :  { %v5597_v30 = vld [vmem:[#allocation5 + $0xa70] sm:$0xf0]  ;;  %v6568_v31 = vld [vmem:[#allocation5 + $0x7f4] sm:$0xf0] }
 0x26d   :  { %v6707_v36 = vld [vmem:[#allocation5 + $0xc54] sm:$0xf]  ;;  %v5600_v50 = vor.u32 %v6643_v32, %v5597_v30  ;;  %3817 = vmatpush.bf16.msrb.mxu0 %v5344_v55  ;;  %v4516_v32 = vor.u32 %v6376_v14, %v4515_v13  ;;  %v5028_v30 = vor.u32 %v6504_v23, %v5027_v22  ;;  %v6432_v55 = vld [vmem:[#allocation5 + $0x3b4] sm:$0xf0] }
 0x26e   :  { %v5853_v37 = vld [vmem:[#allocation5 + $0xc70] sm:$0xf0]  ;;  %v6424_v13 = vld [vmem:[#allocation5 + $0x374] sm:$0xf0] }
 0x26f   :  { %v6771_v38 = vld [vmem:[#allocation5 + $0xe54] sm:$0xf]  ;;  %v5856_v0 = vor.u32 %v6707_v36, %v5853_v37  ;;  %3831 = vmatpush.bf16.msrb.mxu1 %v5600_v50  ;;  %v4483_v36 = vld [vmem:[#allocation5 + $0x198] sm:$0xf] }
 0x270   :  { %v6109_v45 = vld [vmem:[#allocation5 + $0xe70] sm:$0xf0]  ;;  %v6368_v37 = vld [vmem:[#allocation5 + $0x1b4] sm:$0xf0] }
 0x271   :  { %v6571_v9 = vld [vmem:[#allocation5 + $0x814] sm:$0xf]  ;;  %v6112_v3 = vor.u32 %v6771_v38, %v6109_v45  ;;  %3845 = vmatpush.bf16.msrb.mxu2 %v5856_v0  ;;  %v4739_v38 = vld [vmem:[#allocation5 + $0x398] sm:$0xf]  ;;  %v5284_v45 = vor.u32 %v6568_v31, %v5283_v27 }
 0x272   :  { %v5309_v46 = vld [vmem:[#allocation5 + $0x830] sm:$0xf0]  ;;  %v5251_v50 = vld [vmem:[#allocation5 + $0x798] sm:$0xf] }
 0x273   :  { %v6635_v54 = vld [vmem:[#allocation5 + $0xa14] sm:$0xf]  ;;  %v5312_v8 = vor.u32 %v6571_v9, %v5309_v46  ;;  %3859 = vmatpush.bf16.msrb.mxu3 %v6112_v3  ;;  %v4995_v9 = vld [vmem:[#allocation5 + $0x598] sm:$0xf] }
 0x274   :  { %v5565_v51 = vld [vmem:[#allocation5 + $0xa30] sm:$0xf0]  ;;  %v6496_v46 = vld [vmem:[#allocation5 + $0x5b4] sm:$0xf0] }
 0x275   :  { %v6699_v2 = vld [vmem:[#allocation5 + $0xc14] sm:$0xf]  ;;  %v5568_v20 = vor.u32 %v6635_v54, %v5565_v51  ;;  %3818 = vmatpush.bf16.msrb.mxu0 %v5312_v8  ;;  %v6560_v0 = vld [vmem:[#allocation5 + $0x7b4] sm:$0xf0]  ;;  %v4484_v54 = vor.u32 %v6368_v37, %v4483_v36  ;;  %v4740_v51 = vor.u32 %v6432_v55, %v4739_v38 }
 0x276   :  { %v5821_v5 = vld [vmem:[#allocation5 + $0xc30] sm:$0xf0]  ;;  %v4451_v3 = vld [vmem:[#allocation5 + $0x158] sm:$0xf] }
 0x277   :  { %v6763_v7 = vld [vmem:[#allocation5 + $0xe14] sm:$0xf]  ;;  %v5824_v21 = vor.u32 %v6699_v2, %v5821_v5  ;;  %3832 = vmatpush.bf16.msrb.mxu1 %v5568_v20  ;;  %v4996_v2 = vor.u32 %v6496_v46, %v4995_v9  ;;  %v6360_v5 = vld [vmem:[#allocation5 + $0x174] sm:$0xf0] }
 0x278   :  { %v6077_v12 = vld [vmem:[#allocation5 + $0xe30] sm:$0xf0]  ;;  %3819 = vmatmul.bf16.vlgmr.msrb.gmra.mxu0 %v7062_v39  ;;  %v4963_v14 = vld [vmem:[#allocation5 + $0x558] sm:$0xf]  ;;  %v4452_v22 = vor.u32 %v6360_v5, %v4451_v3 }
 0x279   :  { %v6080_v29 = vor.u32 %v6763_v7, %v6077_v12  ;;  %3846 = vmatpush.bf16.msrb.mxu2 %v5824_v21  ;;  %3867 = vmatpush.bf16.msra.mxu0 %v4516_v32  ;;  %v4707_v7 = vld [vmem:[#allocation5 + $0x358] sm:$0xf]  ;;  %v5252_v12 = vor.u32 %v6560_v0, %v5251_v50 }
 0x27a   :  { %v6488_v24 = vld [vmem:[#allocation5 + $0x574] sm:$0xf0]  ;;  %3833 = vmatmul.bf16.vlgmr.msrb.gmra.mxu1 %v7066_v44  ;;  %v4708_v23 = vor.u32 %v6424_v13, %v4707_v7 }
 0x27b   :  { %3860 = vmatpush.bf16.msrb.mxu3 %v6080_v29  ;;  %3881 = vmatpush.bf16.msra.mxu1 %v4772_v34  ;;  %v5219_v8 = vld [vmem:[#allocation5 + $0x758] sm:$0xf]  ;;  %v4964_v20 = vor.u32 %v6488_v24, %v4963_v14 }
 0x27c   :  { %3847 = vmatmul.bf16.vlgmr.msrb.gmra.mxu2 %v7064_v43  ;;  %v6552_v19 = vld [vmem:[#allocation5 + $0x774] sm:$0xf0] }
 0x27d   :  { %3895 = vmatpush.bf16.msra.mxu2 %v5028_v30  ;;  %3868 = vmatpush.bf16.msra.mxu0 %v4484_v54  ;;  %v4419_v21 = vld [vmem:[#allocation5 + $0x118] sm:$0xf]  ;;  %v5220_v29 = vor.u32 %v6552_v19, %v5219_v8 }
 0x27e   :  { %3861 = vmatmul.bf16.vlgmr.msrb.gmra.mxu3 %v7068_v47  ;;  %v6352_v27 = vld [vmem:[#allocation5 + $0x134] sm:$0xf0] }
 0x27f   :  { %3909 = vmatpush.bf16.msra.mxu3 %v5284_v45  ;;  %3882 = vmatpush.bf16.msra.mxu1 %v4740_v51  ;;  %v4675_v31 = vld [vmem:[#allocation5 + $0x318] sm:$0xf]  ;;  %v4420_v38 = vor.u32 %v6352_v27, %v4419_v21 }
 0x280   :  { %v6416_v32 = vld [vmem:[#allocation5 + $0x334] sm:$0xf0] }
 0x281   :  { %3896 = vmatpush.bf16.msra.mxu2 %v4996_v2  ;;  %v4931_v34 = vld [vmem:[#allocation5 + $0x518] sm:$0xf]  ;;  %3869 = vmatpush.bf16.msra.mxu0 %v4452_v22  ;;  %v4676_v45 = vor.u32 %v6416_v32, %v4675_v31 }
 0x282   :  { %v6480_v30 = vld [vmem:[#allocation5 + $0x534] sm:$0xf0] }
 0x283   :  { %3910 = vmatpush.bf16.msra.mxu3 %v5252_v12  ;;  %v5187_v36 = vld [vmem:[#allocation5 + $0x718] sm:$0xf]  ;;  %3883 = vmatpush.bf16.msra.mxu1 %v4708_v23  ;;  %v4932_v55 = vor.u32 %v6480_v30, %v4931_v34 }
 0x284   :  { %v6544_v37 = vld [vmem:[#allocation5 + $0x734] sm:$0xf0] }
 0x285   :  { %3897 = vmatpush.bf16.msra.mxu2 %v4964_v20  ;;  %v4387_v9 = vld [vmem:[#allocation5 + $0xd8] sm:$0xf]  ;;  %v5188_v0 = vor.u32 %v6544_v37, %v5187_v36  ;;  %3870 = vmatpush.bf16.msra.mxu0 %v4420_v38 }
 0x286   :  { %v6344_v46 = vld [vmem:[#allocation5 + $0xf4] sm:$0xf0] }
 0x287   :  { %v4643_v50 = vld [vmem:[#allocation5 + $0x2d8] sm:$0xf]  ;;  %3911 = vmatpush.bf16.msra.mxu3 %v5220_v29  ;;  %v4388_v7 = vor.u32 %v6344_v46, %v4387_v9  ;;  %3884 = vmatpush.bf16.msra.mxu1 %v4676_v45 }
 0x288   :  { %v6408_v54 = vld [vmem:[#allocation5 + $0x2f4] sm:$0xf0] }
 0x289   :  { %v4899_v51 = vld [vmem:[#allocation5 + $0x4d8] sm:$0xf]  ;;  %3898 = vmatpush.bf16.msra.mxu2 %v4932_v55  ;;  %v4644_v12 = vor.u32 %v6408_v54, %v4643_v50  ;;  %3871 = vmatpush.bf16.msra.mxu0 %v4388_v7  ;;  %v7182_v50 = vpop.f32.mrf.mxu0 }
 0x28a   :  { %v6472_v2 = vld [vmem:[#allocation5 + $0x4f4] sm:$0xf0]  ;;  %7352 = vst [vmem:[#allocation27_spill] sm:$0xff] %v7182_v50  ;;  %v4485_v50 = vld [vmem:[#allocation5 + $0x1b8] sm:$0xf0] }
 0x28b   :  { %v5155_v3 = vld [vmem:[#allocation5 + $0x6d8] sm:$0xf]  ;;  %v4900_v13 = vor.u32 %v6472_v2, %v4899_v51  ;;  %3912 = vmatpush.bf16.msra.mxu3 %v5188_v0  ;;  %3885 = vmatpush.bf16.msra.mxu1 %v4644_v12 }
 0x28c   :  { %v6536_v5 = vld [vmem:[#allocation5 + $0x6f4] sm:$0xf0] }
 0x28d   :  { %v4355_v14 = vld [vmem:[#allocation5 + $0x98] sm:$0xf]  ;;  %v5156_v19 = vor.u32 %v6536_v5, %v5155_v3  ;;  %3899 = vmatpush.bf16.msra.mxu2 %v4900_v13 }
 0x28e   :  { %v6336_v24 = vld [vmem:[#allocation5 + $0xb4] sm:$0xf0] }
 0x28f   :  { %v4611_v8 = vld [vmem:[#allocation5 + $0x298] sm:$0xf]  ;;  %v4356_v31 = vor.u32 %v6336_v24, %v4355_v14  ;;  %3913 = vmatpush.bf16.msra.mxu3 %v5156_v19 }
 0x290   :  { %v6400_v22 = vld [vmem:[#allocation5 + $0x2b4] sm:$0xf0] }
 0x291   :  { %v4867_v23 = vld [vmem:[#allocation5 + $0x498] sm:$0xf]  ;;  %v4612_v29 = vor.u32 %v6400_v22, %v4611_v8  ;;  %3872 = vmatpush.bf16.msra.mxu0 %v4356_v31 }
 0x292   :  { %v6464_v20 = vld [vmem:[#allocation5 + $0x4b4] sm:$0xf0] }
 0x293   :  { %v5123_v21 = vld [vmem:[#allocation5 + $0x698] sm:$0xf]  ;;  %v4868_v32 = vor.u32 %v6464_v20, %v4867_v23  ;;  %3886 = vmatpush.bf16.msra.mxu1 %v4612_v29  ;;  %v7184_v20 = vpop.f32.mrf.mxu1 }
 0x294   :  { %v6528_v27 = vld [vmem:[#allocation5 + $0x6b4] sm:$0xf0]  ;;  %7353 = vst [vmem:[#allocation28_spill] sm:$0xff] %v7184_v20  ;;  %v6372_v20 = vld [vmem:[#allocation5 + $0x1dc] sm:$0xf] }
 0x295   :  { %v4323_v34 = vld [vmem:[#allocation5 + $0x58] sm:$0xf]  ;;  %v5124_v37 = vor.u32 %v6528_v27, %v5123_v21  ;;  %3900 = vmatpush.bf16.msra.mxu2 %v4868_v32 }
 0x296   :  { %v6328_v30 = vld [vmem:[#allocation5 + $0x74] sm:$0xf0] }
 0x297   :  { %v4579_v36 = vld [vmem:[#allocation5 + $0x258] sm:$0xf]  ;;  %v4324_v0 = vor.u32 %v6328_v30, %v4323_v34  ;;  %3914 = vmatpush.bf16.msra.mxu3 %v5124_v37  ;;  %v7186_v37 = vpop.f32.mrf.mxu2 }
 0x298   :  { %v6392_v38 = vld [vmem:[#allocation5 + $0x274] sm:$0xf0]  ;;  %7354 = vst [vmem:[#allocation29_spill] sm:$0xff] %v7186_v37 }
 0x299   :  { %v4835_v45 = vld [vmem:[#allocation5 + $0x458] sm:$0xf]  ;;  %v4580_v2 = vor.u32 %v6392_v38, %v4579_v36  ;;  %3873 = vmatpush.bf16.msra.mxu0 %v4324_v0 }
 0x29a   :  { %v6456_v55 = vld [vmem:[#allocation5 + $0x474] sm:$0xf0] }
 0x29b   :  { %v5091_v9 = vld [vmem:[#allocation5 + $0x658] sm:$0xf]  ;;  %v4836_v3 = vor.u32 %v6456_v55, %v4835_v45  ;;  %3887 = vmatpush.bf16.msra.mxu1 %v4580_v2 }
 0x29c   :  { %v6520_v46 = vld [vmem:[#allocation5 + $0x674] sm:$0xf0] }
 0x29d   :  { %v4291_v54 = vld [vmem:[#allocation5 + $0x18] sm:$0xf]  ;;  %v5092_v13 = vor.u32 %v6520_v46, %v5091_v9  ;;  %3901 = vmatpush.bf16.msra.mxu2 %v4836_v3 }
 0x29e   :  { %v6320_v51 = vld [vmem:[#allocation5 + $0x34] sm:$0xf0] }
 0x29f   :  { %v4547_v5 = vld [vmem:[#allocation5 + $0x218] sm:$0xf]  ;;  %v4292_v21 = vor.u32 %v6320_v51, %v4291_v54  ;;  %3915 = vmatpush.bf16.msra.mxu3 %v5092_v13  ;;  %v7188_v54 = vpop.f32.mrf.mxu0 }
 0x2a0   :  { %v6384_v7 = vld [vmem:[#allocation5 + $0x234] sm:$0xf0] }
 0x2a1   :  { %v4803_v12 = vld [vmem:[#allocation5 + $0x418] sm:$0xf]  ;;  %v4548_v32 = vor.u32 %v6384_v7, %v4547_v5  ;;  %3874 = vmatpush.bf16.msra.mxu0 %v4292_v21  ;;  %v7192_v21 = vpop.f32.mrf.mxu1 }
 0x2a2   :  { %v6448_v14 = vld [vmem:[#allocation5 + $0x434] sm:$0xf0] }
 0x2a3   :  { %v5059_v24 = vld [vmem:[#allocation5 + $0x618] sm:$0xf]  ;;  %v4804_v34 = vor.u32 %v6448_v14, %v4803_v12  ;;  %3888 = vmatpush.bf16.msra.mxu1 %v4548_v32  ;;  %v7190_v14 = vpop.f32.mrf.mxu3 }
 0x2a4   :  { %v6512_v8 = vld [vmem:[#allocation5 + $0x634] sm:$0xf0]  ;;  %7355 = vst [vmem:[#allocation30_spill] sm:$0xff] %v7190_v14  ;;  %3875 = vmatmul.bf16.vlgmr.msra.gmra.mxu0 %v7050_v58 }
 0x2a5   :  { %v5539_v19 = vld [vmem:[#allocation5 + $0x9d8] sm:$0xf]  ;;  %v5060_v38 = vor.u32 %v6512_v8, %v5059_v24  ;;  %3902 = vmatpush.bf16.msra.mxu2 %v4804_v34 }
 0x2a6   :  { %v6632_v22 = vld [vmem:[#allocation5 + $0x9f4] sm:$0xf0]  ;;  %3889 = vmatmul.bf16.vlgmr.msra.gmra.mxu1 %v7056_v10  ;;  %v6428_v10 = vld [vmem:[#allocation5 + $0x39c] sm:$0xf] }
 0x2a7   :  { %v5795_v23 = vld [vmem:[#allocation5 + $0xbd8] sm:$0xf]  ;;  %v5540_v45 = vor.u32 %v6632_v22, %v5539_v19  ;;  %3916 = vmatpush.bf16.msra.mxu3 %v5060_v38 }
 0x2a8   :  { %v6696_v27 = vld [vmem:[#allocation5 + $0xbf4] sm:$0xf0]  ;;  %3903 = vmatmul.bf16.vlgmr.msra.gmra.mxu2 %v7052_v1 }
 0x2a9   :  { %v6051_v31 = vld [vmem:[#allocation5 + $0xdd8] sm:$0xf]  ;;  %v5796_v55 = vor.u32 %v6696_v27, %v5795_v23  ;;  %3923 = vmatpush.bf16.msrb.mxu0 %v5540_v45  ;;  %v7204_v14 = vpop.f32.mrf.mxu1 }
 0x2aa   :  { %v6760_v29 = vld [vmem:[#allocation5 + $0xdf4] sm:$0xf0]  ;;  %3917 = vmatmul.bf16.vlgmr.msra.gmra.mxu3 %v7058_v17 }
 0x2ab   :  { %v6307_v30 = vld [vmem:[#allocation5 + $0xfd8] sm:$0xf]  ;;  %v6052_v9 = vor.u32 %v6760_v29, %v6051_v31  ;;  %3937 = vmatpush.bf16.msrb.mxu1 %v5796_v55 }
 0x2ac   :  { %v6824_v36 = vld [vmem:[#allocation5 + $0xff4] sm:$0xf0] }
 0x2ad   :  { %v5507_v46 = vld [vmem:[#allocation5 + $0x998] sm:$0xf]  ;;  %v6308_v51 = vor.u32 %v6824_v36, %v6307_v30  ;;  %3951 = vmatpush.bf16.msrb.mxu2 %v6052_v9 }
 0x2ae   :  { %v5763_v0 = vld [vmem:[#allocation5 + $0xb98] sm:$0xf]  ;;  %v5508_v13 = vor.u32 %v6624_v15, %v5507_v46  ;;  %v7197_v15 = vpop.f32.mrf.mxu2 }
 0x2af   :  { %v6688_v2 = vld [vmem:[#allocation5 + $0xbb4] sm:$0xf0]  ;;  %3965 = vmatpush.bf16.msrb.mxu3 %v6308_v51 }
 0x2b0   :  { %v6019_v3 = vld [vmem:[#allocation5 + $0xd98] sm:$0xf]  ;;  %v5764_v24 = vor.u32 %v6688_v2, %v5763_v0  ;;  %3924 = vmatpush.bf16.msrb.mxu0 %v5508_v13  ;;  %v7202_v13 = vpop.f32.mrf.mxu3 }
 0x2b1   :  { %v6752_v5 = vld [vmem:[#allocation5 + $0xdb4] sm:$0xf0] }
 0x2b2   :  { %v6275_v7 = vld [vmem:[#allocation5 + $0xf98] sm:$0xf]  ;;  %v6020_v8 = vor.u32 %v6752_v5, %v6019_v3  ;;  %3938 = vmatpush.bf16.msrb.mxu1 %v5764_v24 }
 0x2b3   :  { %v6816_v12 = vld [vmem:[#allocation5 + $0xfb4] sm:$0xf0] }
 0x2b4   :  { %v5475_v19 = vld [vmem:[#allocation5 + $0x958] sm:$0xf]  ;;  %v6276_v27 = vor.u32 %v6816_v12, %v6275_v7  ;;  %3952 = vmatpush.bf16.msrb.mxu2 %v6020_v8  ;;  %v7200_v12 = vpop.f32.mrf.mxu0 }
 0x2b5   :  { %v6616_v22 = vld [vmem:[#allocation5 + $0x974] sm:$0xf0] }
 0x2b6   :  { %v5731_v23 = vld [vmem:[#allocation5 + $0xb58] sm:$0xf]  ;;  %v5476_v36 = vor.u32 %v6616_v22, %v5475_v19  ;;  %3966 = vmatpush.bf16.msrb.mxu3 %v6276_v27 }
 0x2b7   :  { %v6680_v31 = vld [vmem:[#allocation5 + $0xb74] sm:$0xf0] }
 0x2b8   :  { %v5987_v29 = vld [vmem:[#allocation5 + $0xd58] sm:$0xf]  ;;  %v5732_v38 = vor.u32 %v6680_v31, %v5731_v23  ;;  %3925 = vmatpush.bf16.msrb.mxu0 %v5476_v36 }
 0x2b9   :  { %v6744_v32 = vld [vmem:[#allocation5 + $0xd74] sm:$0xf0] }
 0x2ba   :  { %v6243_v34 = vld [vmem:[#allocation5 + $0xf58] sm:$0xf]  ;;  %v5988_v45 = vor.u32 %v6744_v32, %v5987_v29  ;;  %3939 = vmatpush.bf16.msrb.mxu1 %v5732_v38 }
 0x2bb   :  { %v6808_v30 = vld [vmem:[#allocation5 + $0xf74] sm:$0xf0] }
 0x2bc   :  { %v5443_v55 = vld [vmem:[#allocation5 + $0x918] sm:$0xf]  ;;  %v6244_v0 = vor.u32 %v6808_v30, %v6243_v34  ;;  %3953 = vmatpush.bf16.msrb.mxu2 %v5988_v45 }
 0x2bd   :  { %v6608_v9 = vld [vmem:[#allocation5 + $0x934] sm:$0xf0] }
 0x2be   :  { %v5699_v46 = vld [vmem:[#allocation5 + $0xb18] sm:$0xf]  ;;  %v5444_v19 = vor.u32 %v6608_v9, %v5443_v55  ;;  %3967 = vmatpush.bf16.msrb.mxu3 %v6244_v0 }
 0x2bf   :  { %v6672_v51 = vld [vmem:[#allocation5 + $0xb34] sm:$0xf0] }
 0x2c0   :  { %v5955_v2 = vld [vmem:[#allocation5 + $0xd18] sm:$0xf]  ;;  %v5700_v24 = vor.u32 %v6672_v51, %v5699_v46  ;;  %3926 = vmatpush.bf16.msrb.mxu0 %v5444_v19  ;;  %v7206_v46 = vpop.f32.mrf.mxu2 }
 0x2c1   :  { %v6736_v3 = vld [vmem:[#allocation5 + $0xd34] sm:$0xf0] }
 0x2c2   :  { %v6211_v5 = vld [vmem:[#allocation5 + $0xf18] sm:$0xf]  ;;  %v5956_v8 = vor.u32 %v6736_v3, %v5955_v2  ;;  %3940 = vmatpush.bf16.msrb.mxu1 %v5700_v24 }
 0x2c3   :  { %v6800_v7 = vld [vmem:[#allocation5 + $0xf34] sm:$0xf0] }
 0x2c4   :  { %v5411_v22 = vld [vmem:[#allocation5 + $0x8d8] sm:$0xf]  ;;  %v6212_v27 = vor.u32 %v6800_v7, %v6211_v5  ;;  %3954 = vmatpush.bf16.msrb.mxu2 %v5956_v8 }
 0x2c5   :  { %v6600_v23 = vld [vmem:[#allocation5 + $0x8f4] sm:$0xf0] }
 0x2c6   :  { %v5667_v31 = vld [vmem:[#allocation5 + $0xad8] sm:$0xf]  ;;  %v5412_v61 = vor.u32 %v6600_v23, %v5411_v22  ;;  %3968 = vmatpush.bf16.msrb.mxu3 %v6212_v27 }
 0x2c7   :  { %v6664_v29 = vld [vmem:[#allocation5 + $0xaf4] sm:$0xf0] }
 0x2c8   :  { %v5923_v32 = vld [vmem:[#allocation5 + $0xcd8] sm:$0xf]  ;;  %v5668_v36 = vor.u32 %v6664_v29, %v5667_v31  ;;  %3927 = vmatpush.bf16.msrb.mxu0 %v5412_v61  ;;  %v7208_v31 = vpop.f32.mrf.mxu3  ;;  %v7210_v29 = vpop.f32.mrf.mxu0 }
 0x2c9   :  { %v6728_v34 = vld [vmem:[#allocation5 + $0xcf4] sm:$0xf0]  ;;  %7356 = vst [vmem:[#allocation31_spill] sm:$0xff] %v7210_v29  ;;  %v6364_v29 = vld [vmem:[#allocation5 + $0x19c] sm:$0xf] }
 0x2ca   :  { %v6179_v30 = vld [vmem:[#allocation5 + $0xed8] sm:$0xf]  ;;  %v5924_v38 = vor.u32 %v6728_v34, %v5923_v32  ;;  %3941 = vmatpush.bf16.msrb.mxu1 %v5668_v36 }
 0x2cb   :  { %v5379_v45 = vld [vmem:[#allocation5 + $0x898] sm:$0xf]  ;;  %v6180_v0 = vor.u32 %v6792_v49, %v6179_v30 }
 0x2cc   :  { %v6592_v55 = vld [vmem:[#allocation5 + $0x8b4] sm:$0xf0]  ;;  %3955 = vmatpush.bf16.msrb.mxu2 %v5924_v38 }
 0x2cd   :  { %v5635_v9 = vld [vmem:[#allocation5 + $0xa98] sm:$0xf]  ;;  %v5380_v48 = vor.u32 %v6592_v55, %v5379_v45  ;;  %3969 = vmatpush.bf16.msrb.mxu3 %v6180_v0 }
 0x2ce   :  { %v6656_v51 = vld [vmem:[#allocation5 + $0xab4] sm:$0xf0] }
 0x2cf   :  { %v5891_v2 = vld [vmem:[#allocation5 + $0xc98] sm:$0xf]  ;;  %v5636_v19 = vor.u32 %v6656_v51, %v5635_v9  ;;  %3928 = vmatpush.bf16.msrb.mxu0 %v5380_v48  ;;  %v6436_v48 = vld [vmem:[#allocation5 + $0x3dc] sm:$0xf] }
 0x2d0   :  { %v6720_v3 = vld [vmem:[#allocation5 + $0xcb4] sm:$0xf0] }
 0x2d1   :  { %v6147_v5 = vld [vmem:[#allocation5 + $0xe98] sm:$0xf]  ;;  %v5892_v24 = vor.u32 %v6720_v3, %v5891_v2  ;;  %3942 = vmatpush.bf16.msrb.mxu1 %v5636_v19  ;;  %v7212_v3 = vpop.f32.mrf.mxu1 }
 0x2d2   :  { %v6784_v7 = vld [vmem:[#allocation5 + $0xeb4] sm:$0xf0]  ;;  %7357 = vst [vmem:[#allocation32_spill] sm:$0xff] %v7212_v3 }
 0x2d3   :  { %v5347_v8 = vld [vmem:[#allocation5 + $0x858] sm:$0xf]  ;;  %v6148_v49 = vor.u32 %v6784_v7, %v6147_v5  ;;  %3956 = vmatpush.bf16.msrb.mxu2 %v5892_v24  ;;  %v4773_v24 = vld [vmem:[#allocation5 + $0x3f8] sm:$0xf0] }
 0x2d4   :  { %v6584_v22 = vld [vmem:[#allocation5 + $0x874] sm:$0xf0]  ;;  %v4776_v3 = vor.u32 %v6436_v48, %v4773_v24  ;;  %v6484_v24 = vld [vmem:[#allocation5 + $0x55c] sm:$0xf] }
 0x2d5   :  { %v5603_v23 = vld [vmem:[#allocation5 + $0xa58] sm:$0xf]  ;;  %v5348_v61 = vor.u32 %v6584_v22, %v5347_v8  ;;  %3970 = vmatpush.bf16.msrb.mxu3 %v6148_v49  ;;  %v7214_v8 = vpop.f32.mrf.mxu2  ;;  %v6500_v22 = vld [vmem:[#allocation5 + $0x5dc] sm:$0xf] }
 0x2d6   :  { %v6648_v27 = vld [vmem:[#allocation5 + $0xa74] sm:$0xf0]  ;;  %7358 = vst [vmem:[#allocation33_spill] sm:$0xff] %v7214_v8  ;;  %v5285_v49 = vld [vmem:[#allocation5 + $0x7f8] sm:$0xf0]  ;;  %v7216_v8 = vpop.f32.mrf.mxu0 }
 0x2d7   :  { %v5859_v32 = vld [vmem:[#allocation5 + $0xc58] sm:$0xf]  ;;  %v5604_v45 = vor.u32 %v6648_v27, %v5603_v23  ;;  %3929 = vmatpush.bf16.msrb.mxu0 %v5348_v61  ;;  %v5029_v23 = vld [vmem:[#allocation5 + $0x5f8] sm:$0xf0]  ;;  %v7218_v61 = vpop.f32.mrf.mxu3 }
 0x2d8   :  { %v6712_v34 = vld [vmem:[#allocation5 + $0xc74] sm:$0xf0]  ;;  %v5032_v25 = vor.u32 %v6500_v22, %v5029_v23  ;;  %v4965_v22 = vld [vmem:[#allocation5 + $0x578] sm:$0xf0] }
 0x2d9   :  { %v6115_v30 = vld [vmem:[#allocation5 + $0xe58] sm:$0xf]  ;;  %v5860_v55 = vor.u32 %v6712_v34, %v5859_v32  ;;  %3943 = vmatpush.bf16.msrb.mxu1 %v5604_v45  ;;  %v6564_v34 = vld [vmem:[#allocation5 + $0x7dc] sm:$0xf]  ;;  %v4968_v23 = vor.u32 %v6484_v24, %v4965_v22 }
 0x2da   :  { %v6776_v37 = vld [vmem:[#allocation5 + $0xe74] sm:$0xf0]  ;;  %v6492_v45 = vld [vmem:[#allocation5 + $0x59c] sm:$0xf] }
 0x2db   :  { %v5315_v36 = vld [vmem:[#allocation5 + $0x818] sm:$0xf]  ;;  %v6116_v0 = vor.u32 %v6776_v37, %v6115_v30  ;;  %3957 = vmatpush.bf16.msrb.mxu2 %v5860_v55  ;;  %v4520_v30 = vor.u32 %v6372_v20, %v4517_v35  ;;  %v4997_v55 = vld [vmem:[#allocation5 + $0x5b8] sm:$0xf0] }
 0x2dc   :  { %v6576_v38 = vld [vmem:[#allocation5 + $0x834] sm:$0xf0]  ;;  %v5000_v20 = vor.u32 %v6492_v45, %v4997_v55  ;;  %v6540_v45 = vld [vmem:[#allocation5 + $0x71c] sm:$0xf] }
 0x2dd   :  { %v5571_v9 = vld [vmem:[#allocation5 + $0xa18] sm:$0xf]  ;;  %v5316_v19 = vor.u32 %v6576_v38, %v5315_v36  ;;  %3971 = vmatpush.bf16.msrb.mxu3 %v6116_v0  ;;  %v5288_v36 = vor.u32 %v6564_v34, %v5285_v49  ;;  %v4741_v38 = vld [vmem:[#allocation5 + $0x3b8] sm:$0xf0] }
 0x2de   :  { %v6640_v51 = vld [vmem:[#allocation5 + $0xa34] sm:$0xf0]  ;;  %v4744_v35 = vor.u32 %v6428_v10, %v4741_v38  ;;  %v4453_v0 = vld [vmem:[#allocation5 + $0x178] sm:$0xf0]  ;;  %v7225_v10 = vpop.f32.mrf.mxu2  ;;  %v7228_v49 = vpop.f32.mrf.mxu0 }
 0x2df   :  { %v5827_v2 = vld [vmem:[#allocation5 + $0xc18] sm:$0xf]  ;;  %v5572_v27 = vor.u32 %v6640_v51, %v5571_v9  ;;  %3930 = vmatpush.bf16.msrb.mxu0 %v5316_v19  ;;  %v6556_v9 = vld [vmem:[#allocation5 + $0x79c] sm:$0xf] }
 0x2e0   :  { %v6704_v5 = vld [vmem:[#allocation5 + $0xc34] sm:$0xf0]  ;;  %v5253_v51 = vld [vmem:[#allocation5 + $0x7b8] sm:$0xf0] }
 0x2e1   :  { %v6083_v7 = vld [vmem:[#allocation5 + $0xe18] sm:$0xf]  ;;  %v5828_v32 = vor.u32 %v6704_v5, %v5827_v2  ;;  %3944 = vmatpush.bf16.msrb.mxu1 %v5572_v27  ;;  %v6356_v2 = vld [vmem:[#allocation5 + $0x15c] sm:$0xf]  ;;  %v5256_v48 = vor.u32 %v6556_v9, %v5253_v51  ;;  %v7230_v9 = vpop.f32.mrf.mxu3 }
 0x2e2   :  { %v6084_v37 = vor.u32 %v6768_v33, %v6083_v7  ;;  %v4488_v33 = vor.u32 %v6364_v29, %v4485_v50  ;;  %v6420_v5 = vld [vmem:[#allocation5 + $0x35c] sm:$0xf]  ;;  %v7220_v7 = vpop.f32.mrf.mxu1  ;;  %3931 = vmatmul.bf16.vlgmr.msrb.gmra.mxu0 %v7062_v39  ;;  %v4456_v29 = vor.u32 %v6356_v2, %v4453_v0 }
 0x2e3   :  { %3958 = vmatpush.bf16.msrb.mxu2 %v5828_v32  ;;  %3979 = vmatpush.bf16.msra.mxu0 %v4520_v30  ;;  %v4709_v19 = vld [vmem:[#allocation5 + $0x378] sm:$0xf0] }
 0x2e4   :  { %3972 = vmatpush.bf16.msrb.mxu3 %v6084_v37  ;;  %3945 = vmatmul.bf16.vlgmr.msrb.gmra.mxu1 %v7066_v44  ;;  %v6548_v50 = vld [vmem:[#allocation5 + $0x75c] sm:$0xf] }
 0x2e5   :  { %3993 = vmatpush.bf16.msra.mxu1 %v4776_v3  ;;  %v4712_v3 = vor.u32 %v6420_v5, %v4709_v19  ;;  %v6348_v27 = vld [vmem:[#allocation5 + $0x11c] sm:$0xf] }
 0x2e6   :  { %3959 = vmatmul.bf16.vlgmr.msrb.gmra.mxu2 %v7064_v43  ;;  %v4421_v32 = vld [vmem:[#allocation5 + $0x138] sm:$0xf0] }
 0x2e7   :  { %4007 = vmatpush.bf16.msra.mxu2 %v5032_v25  ;;  %v5221_v25 = vld [vmem:[#allocation5 + $0x778] sm:$0xf0]  ;;  %3973 = vmatmul.bf16.vlgmr.msrb.gmra.mxu3 %v7068_v47  ;;  %v4424_v51 = vor.u32 %v6348_v27, %v4421_v32  ;;  %v7359_v47 = vperm.slane %v7082_v63, 0  ;;  %v7360_v27 = vperm.slane %v7082_v63, 1 }
 0x2e8   :  { %4021 = vmatpush.bf16.msra.mxu3 %v5288_v36  ;;  %3980 = vmatpush.bf16.msra.mxu0 %v4488_v33  ;;  %v6412_v34 = vld [vmem:[#allocation5 + $0x31c] sm:$0xf]  ;;  %v5224_v37 = vor.u32 %v6548_v50, %v5221_v25 }
 0x2e9   :  { %3994 = vmatpush.bf16.msra.mxu1 %v4744_v35  ;;  %v4677_v30 = vld [vmem:[#allocation5 + $0x338] sm:$0xf0]  ;;  %v3319_v32 = vadd.f32 %v7125_v11, %v7360_v27 }
 0x2ea   :  { %v6476_v36 = vld [vmem:[#allocation5 + $0x51c] sm:$0xf]  ;;  %v4680_v33 = vor.u32 %v6412_v34, %v4677_v30  ;;  %v7232_v5 = vpop.f32.mrf.mxu1 }
 0x2eb   :  { %4008 = vmatpush.bf16.msra.mxu2 %v5000_v20  ;;  %v4933_v38 = vld [vmem:[#allocation5 + $0x538] sm:$0xf0] }
 0x2ec   :  { %4022 = vmatpush.bf16.msra.mxu3 %v5256_v48  ;;  %v5189_v55 = vld [vmem:[#allocation5 + $0x738] sm:$0xf0]  ;;  %3981 = vmatpush.bf16.msra.mxu0 %v4456_v29  ;;  %v4936_v35 = vor.u32 %v6476_v36, %v4933_v38  ;;  %v3207_v29 = vadd.f32 %v7093_v40, %v7359_v47 }
 0x2ed   :  { %3995 = vmatpush.bf16.msra.mxu1 %v4712_v3  ;;  %v6340_v20 = vld [vmem:[#allocation5 + $0xdc] sm:$0xf]  ;;  %v5192_v48 = vor.u32 %v6540_v45, %v5189_v55  ;;  %v7237_v3 = vpop.f32.mrf.mxu2 }
 0x2ee   :  { %v4389_v2 = vld [vmem:[#allocation5 + $0xf8] sm:$0xf0] }
 0x2ef   :  { %4009 = vmatpush.bf16.msra.mxu2 %v4968_v23  ;;  %v6404_v0 = vld [vmem:[#allocation5 + $0x2dc] sm:$0xf]  ;;  %v4392_v23 = vor.u32 %v6340_v20, %v4389_v2  ;;  %v7243_v20 = vld [vmem:[#allocation7] sm:$0xff] }
 0x2f0   :  { %4023 = vmatpush.bf16.msra.mxu3 %v5224_v37  ;;  %v4645_v19 = vld [vmem:[#allocation5 + $0x2f8] sm:$0xf0]  ;;  %3982 = vmatpush.bf16.msra.mxu0 %v4424_v51  ;;  %v3221_v51 = vadd.f32 %v7095_v53, %v3207_v29  ;;  %7361 = vst [vmem:[#allocation34_spill] sm:$0xff] %v7243_v20  ;;  %v622_v63 = vperm.slane %v7243_v20, 3  ;;  %v623_v11 = vperm.slane %v7243_v20, 4 }
 0x2f1   :  { %v6468_v24 = vld [vmem:[#allocation5 + $0x4dc] sm:$0xf]  ;;  %3996 = vmatpush.bf16.msra.mxu1 %v4680_v33  ;;  %v4648_v34 = vor.u32 %v6404_v0, %v4645_v19  ;;  %v3654_v33 = vpop.f32.mrf.mxu0  ;;  %v3333_v0 = vadd.f32 %v7127_v26, %v3319_v32 }
 0x2f2   :  { %v4901_v22 = vld [vmem:[#allocation5 + $0x4f8] sm:$0xf0]  ;;  %v3235_v26 = vadd.f32 %v7101_v6, %v3221_v51  ;;  %v3541_v32 = vadd.f32 %v7188_v54, %v622_v63  ;;  %v3653_v54 = vadd.f32 %v7228_v49, %v623_v11 }
 0x2f3   :  { %v6532_v50 = vld [vmem:[#allocation5 + $0x6dc] sm:$0xf]  ;;  %4010 = vmatpush.bf16.msra.mxu2 %v4936_v35  ;;  %v4904_v37 = vor.u32 %v6468_v24, %v4901_v22  ;;  %v7247_v35 = vpop.f32.mrf.mxu3 }
 0x2f4   :  { %v5157_v25 = vld [vmem:[#allocation5 + $0x6f8] sm:$0xf0]  ;;  %4024 = vmatpush.bf16.msra.mxu3 %v5192_v48  ;;  %3983 = vmatpush.bf16.msra.mxu0 %v4392_v23 }
 0x2f5   :  { %v6332_v30 = vld [vmem:[#allocation5 + $0x9c] sm:$0xf]  ;;  %v5160_v45 = vor.u32 %v6532_v50, %v5157_v25  ;;  %3997 = vmatpush.bf16.msra.mxu1 %v4648_v34  ;;  %v7362_v50 = vperm.slane %v7148_v28, 2  ;;  %v3668_v34 = vpop.f32.mrf.mxu1 }
 0x2f6   :  { %v4357_v36 = vld [vmem:[#allocation5 + $0xb8] sm:$0xf0] }
 0x2f7   :  { %v6396_v38 = vld [vmem:[#allocation5 + $0x29c] sm:$0xf]  ;;  %v4360_v2 = vor.u32 %v6332_v30, %v4357_v36  ;;  %4011 = vmatpush.bf16.msra.mxu2 %v4904_v37  ;;  %v3431_v25 = vadd.f32 %v7159_v59, %v7362_v50  ;;  %v3347_v59 = vadd.f32 %v7133_v42, %v3333_v0 }
 0x2f8   :  { %v4613_v55 = vld [vmem:[#allocation5 + $0x2b8] sm:$0xf0]  ;;  %4025 = vmatpush.bf16.msra.mxu3 %v5160_v45 }
 0x2f9   :  { %v6460_v43 = vld [vmem:[#allocation5 + $0x49c] sm:$0xf]  ;;  %v4616_v48 = vor.u32 %v6396_v38, %v4613_v55  ;;  %3984 = vmatpush.bf16.msra.mxu0 %v4360_v2  ;;  %v3445_v6 = vadd.f32 %v7161_v18, %v3431_v25  ;;  %v3361_v50 = vadd.f32 %v7135_v52, %v3347_v59 }
 0x2fa   :  { %v4869_v47 = vld [vmem:[#allocation5 + $0x4b8] sm:$0xf0] }
 0x2fb   :  { %v6524_v40 = vld [vmem:[#allocation5 + $0x69c] sm:$0xf]  ;;  %v4872_v19 = vor.u32 %v6460_v43, %v4869_v47  ;;  %v3543_v43 = vadd.f32 %v7200_v12, %v622_v63  ;;  %3998 = vmatpush.bf16.msra.mxu1 %v4616_v48  ;;  %v3249_v48 = vadd.f32 %v7103_v16, %v3235_v26  ;;  %v3667_v16 = vadd.f32 %v7232_v5, %v3653_v54 }
 0x2fc   :  { %v5125_v44 = vld [vmem:[#allocation5 + $0x6b8] sm:$0xf0] }
 0x2fd   :  { %v6324_v24 = vld [vmem:[#allocation5 + $0x5c] sm:$0xf]  ;;  %v5128_v29 = vor.u32 %v6524_v40, %v5125_v44  ;;  %4012 = vmatpush.bf16.msra.mxu2 %v4872_v19  ;;  %v3682_v40 = vpop.f32.mrf.mxu2  ;;  %v3681_v54 = vadd.f32 %v7237_v3, %v3667_v16 }
 0x2fe   :  { %v4325_v22 = vld [vmem:[#allocation5 + $0x78] sm:$0xf0] }
 0x2ff   :  { %v6388_v53 = vld [vmem:[#allocation5 + $0x25c] sm:$0xf]  ;;  %v4328_v37 = vor.u32 %v6324_v24, %v4325_v22  ;;  %4026 = vmatpush.bf16.msra.mxu3 %v5128_v29  ;;  %v3655_v24 = vadd.f32 %v3654_v33, %v623_v11 }
 0x300   :  { %v4581_v27 = vld [vmem:[#allocation5 + $0x278] sm:$0xf0] }
 0x301   :  { %v6452_v39 = vld [vmem:[#allocation5 + $0x45c] sm:$0xf]  ;;  %v4584_v44 = vor.u32 %v6388_v53, %v4581_v27  ;;  %3985 = vmatpush.bf16.msra.mxu0 %v4328_v37  ;;  %v3459_v27 = vadd.f32 %v7167_v41, %v3445_v6  ;;  %v3669_v26 = vadd.f32 %v3668_v34, %v3655_v24 }
 0x302   :  { %v4837_v20 = vld [vmem:[#allocation5 + $0x478] sm:$0xf0] }
 0x303   :  { %v6516_v23 = vld [vmem:[#allocation5 + $0x65c] sm:$0xf]  ;;  %v4840_v38 = vor.u32 %v6452_v39, %v4837_v20  ;;  %v3555_v39 = vadd.f32 %v7192_v21, %v3541_v32  ;;  %v3557_v20 = vadd.f32 %v7204_v14, %v3543_v43  ;;  %3999 = vmatpush.bf16.msra.mxu1 %v4584_v44  ;;  %v3696_v21 = vpop.f32.mrf.mxu3  ;;  %v3473_v6 = vadd.f32 %v7169_v57, %v3459_v27 }
 0x304   :  { %v5093_v30 = vld [vmem:[#allocation5 + $0x678] sm:$0xf0] }
 0x305   :  { %v6316_v36 = vld [vmem:[#allocation5 + $0x1c] sm:$0xf]  ;;  %v5096_v12 = vor.u32 %v6516_v23, %v5093_v30  ;;  %4013 = vmatpush.bf16.msra.mxu2 %v4840_v38  ;;  %v7265_v23 = vpop.f32.mrf.mxu0  ;;  %v3571_v59 = vadd.f32 %v7206_v46, %v3557_v20  ;;  %v7277_v57 = vpop.f32.mrf.mxu2 }
 0x306   :  { %v4293_v28 = vld [vmem:[#allocation5 + $0x38] sm:$0xf0] }
 0x307   :  { %v6380_v45 = vld [vmem:[#allocation5 + $0x21c] sm:$0xf]  ;;  %v4296_v18 = vor.u32 %v6316_v36, %v4293_v28  ;;  %4027 = vmatpush.bf16.msra.mxu3 %v5096_v12  ;;  %v3569_v28 = vadd.f32 %v7197_v15, %v3555_v39  ;;  %v7273_v15 = vpop.f32.mrf.mxu1  ;;  %v3683_v12 = vadd.f32 %v3682_v40, %v3669_v26 }
 0x308   :  { %v4549_v55 = vld [vmem:[#allocation5 + $0x238] sm:$0xf0] }
 0x309   :  { %v6444_v47 = vld [vmem:[#allocation5 + $0x41c] sm:$0xf]  ;;  %v4552_v25 = vor.u32 %v6380_v45, %v4549_v55  ;;  %3986 = vmatpush.bf16.msra.mxu0 %v4296_v18  ;;  %v3263_v45 = vadd.f32 %v7108_v56, %v3249_v48  ;;  %v3375_v55 = vadd.f32 %v7140_v60, %v3361_v50  ;;  %v3583_v24 = vadd.f32 %v7202_v13, %v3569_v28 }
 0x30a   :  { %v4805_v51 = vld [vmem:[#allocation5 + $0x438] sm:$0xf0] }
 0x30b   :  { %v6508_v63 = vld [vmem:[#allocation5 + $0x61c] sm:$0xf]  ;;  %v4808_v11 = vor.u32 %v6444_v47, %v4805_v51  ;;  %4000 = vmatpush.bf16.msra.mxu1 %v4552_v25  ;;  %v3277_v48 = vadd.f32 %v7110_v62, %v3263_v45  ;;  %v3389_v13 = vadd.f32 %v7142_v4, %v3375_v55 }
 0x30c   :  { %v5061_v2 = vld [vmem:[#allocation5 + $0x638] sm:$0xf0]  ;;  %3987 = vmatmul.bf16.vlgmr.msra.gmra.mxu0 %v7050_v58 }
 0x30d   :  { %v6628_v22 = vld [vmem:[#allocation5 + $0x9dc] sm:$0xf]  ;;  %v5064_v14 = vor.u32 %v6508_v63, %v5061_v2  ;;  %4014 = vmatpush.bf16.msra.mxu2 %v4808_v11  ;;  %v7364_v11 = vld [vmem:[#allocation27_spill] sm:$0xff] }
 0x30e   :  { %v5541_v42 = vld [vmem:[#allocation5 + $0x9f8] sm:$0xf0]  ;;  %v3487_v58 = vadd.f32 %v7364_v11, %v3473_v6 }
 0x30f   :  { %v6692_v0 = vld [vmem:[#allocation5 + $0xbdc] sm:$0xf]  ;;  %v5544_v30 = vor.u32 %v6628_v22, %v5541_v42  ;;  %4028 = vmatpush.bf16.msra.mxu3 %v5064_v14  ;;  %v3585_v22 = vadd.f32 %v7208_v31, %v3571_v59  ;;  %v3695_v31 = vadd.f32 %v7247_v35, %v3681_v54  ;;  %v7289_v35 = vpop.f32.mrf.mxu3  ;;  %v3724_v54 = vpop.f32.mrf.mxu1 }
 0x310   :  { %v5797_v19 = vld [vmem:[#allocation5 + $0xbf8] sm:$0xf0]  ;;  %4015 = vmatmul.bf16.vlgmr.msra.gmra.mxu2 %v7052_v1  ;;  %v3697_v1 = vadd.f32 %v3696_v21, %v3683_v12 }
 0x311   :  { %v6756_v49 = vld [vmem:[#allocation5 + $0xddc] sm:$0xf]  ;;  %v5800_v32 = vor.u32 %v6692_v0, %v5797_v19  ;;  %4035 = vmatpush.bf16.msrb.mxu0 %v5544_v30  ;;  %v7363_v19 = vld [vmem:[#allocation15_spill] sm:$0xff]  ;;  %v3599_v4 = vadd.f32 %v7216_v8, %v3585_v22  ;;  %v7366_v30 = vld [vmem:[#allocation21_spill] sm:$0xff] }
 0x312   :  { %v6053_v53 = vld [vmem:[#allocation5 + $0xdf8] sm:$0xf0]  ;;  %4029 = vmatmul.bf16.vlgmr.msra.gmra.mxu3 %v7058_v17  ;;  %4001 = vmatmul.bf16.vlgmr.msra.gmra.mxu1 %v7363_v19  ;;  %v3291_v26 = vadd.f32 %v7366_v30, %v3277_v48 }
 0x313   :  { %v6820_v33 = vld [vmem:[#allocation5 + $0xfdc] sm:$0xf]  ;;  %v6056_v43 = vor.u32 %v6756_v49, %v6053_v53  ;;  %4049 = vmatpush.bf16.msrb.mxu1 %v5800_v32  ;;  %v3613_v6 = vadd.f32 %v7220_v7, %v3599_v4 }
 0x314   :  { %v6309_v29 = vld [vmem:[#allocation5 + $0xff8] sm:$0xf0] }
 0x315   :  { %v6620_v52 = vld [vmem:[#allocation5 + $0x99c] sm:$0xf]  ;;  %v6312_v41 = vor.u32 %v6820_v33, %v6309_v29  ;;  %4063 = vmatpush.bf16.msrb.mxu2 %v6056_v43  ;;  %v7365_v33 = vld [vmem:[#allocation31_spill] sm:$0xff]  ;;  %v3710_v29 = vpop.f32.mrf.mxu0 }
 0x316   :  { %v5509_v37 = vld [vmem:[#allocation5 + $0x9b8] sm:$0xf0]  ;;  %v3597_v17 = vadd.f32 %v7365_v33, %v3583_v24  ;;  %v3711_v59 = vadd.f32 %v3710_v29, %v3697_v1  ;;  %v7371_v24 = vld [vmem:[#allocation29_spill] sm:$0xff]  ;;  %v7375_v33 = vld [vmem:[#allocation30_spill] sm:$0xff] }
 0x317   :  { %v6684_v36 = vld [vmem:[#allocation5 + $0xb9c] sm:$0xf]  ;;  %v5512_v46 = vor.u32 %v6620_v52, %v5509_v37  ;;  %4077 = vmatpush.bf16.msrb.mxu3 %v6312_v41  ;;  %v7373_v1 = vld [vmem:[#allocation33_spill] sm:$0xff]  ;;  %v3752_v29 = vpop.f32.mrf.mxu3 }
 0x318   :  { %v5765_v44 = vld [vmem:[#allocation5 + $0xbb8] sm:$0xf0]  ;;  %v3725_v7 = vadd.f32 %v3724_v54, %v3711_v59 }
 0x319   :  { %v6748_v5 = vld [vmem:[#allocation5 + $0xd9c] sm:$0xf]  ;;  %v5768_v51 = vor.u32 %v6684_v36, %v5765_v44  ;;  %4036 = vmatpush.bf16.msrb.mxu0 %v5512_v46  ;;  %v3709_v36 = vadd.f32 %v7265_v23, %v3695_v31 }
 0x31a   :  { %v6021_v38 = vld [vmem:[#allocation5 + $0xdb8] sm:$0xf0] }
 0x31b   :  { %v6812_v34 = vld [vmem:[#allocation5 + $0xf9c] sm:$0xf]  ;;  %v6024_v56 = vor.u32 %v6748_v5, %v6021_v38  ;;  %4050 = vmatpush.bf16.msrb.mxu1 %v5768_v51 }
 0x31c   :  { %v6277_v47 = vld [vmem:[#allocation5 + $0xfb8] sm:$0xf0] }
 0x31d   :  { %v6612_v63 = vld [vmem:[#allocation5 + $0x95c] sm:$0xf]  ;;  %v6280_v3 = vor.u32 %v6812_v34, %v6277_v47  ;;  %4064 = vmatpush.bf16.msrb.mxu2 %v6024_v56  ;;  %v7370_v56 = vld [vmem:[#allocation22_spill] sm:$0xff] }
 0x31e   :  { %v5477_v60 = vld [vmem:[#allocation5 + $0x978] sm:$0xf0] }
 0x31f   :  { %v6676_v2 = vld [vmem:[#allocation5 + $0xb5c] sm:$0xf]  ;;  %v5480_v18 = vor.u32 %v6612_v63, %v5477_v60  ;;  %4078 = vmatpush.bf16.msrb.mxu3 %v6280_v3  ;;  %v3305_v63 = vadd.f32 %v7370_v56, %v3291_v26  ;;  %v3627_v3 = vadd.f32 %v7225_v10, %v3613_v6  ;;  %v3764_v26 = vpop.f32.mrf.mxu0 }
 0x320   :  { %v5733_v42 = vld [vmem:[#allocation5 + $0xb78] sm:$0xf0] }
 0x321   :  { %v6740_v0 = vld [vmem:[#allocation5 + $0xd5c] sm:$0xf]  ;;  %v5736_v49 = vor.u32 %v6676_v2, %v5733_v42  ;;  %4037 = vmatpush.bf16.msrb.mxu0 %v5480_v18  ;;  %v3723_v42 = vadd.f32 %v7273_v15, %v3709_v36  ;;  %v7372_v18 = vld [vmem:[#allocation25_spill] sm:$0xff]  ;;  %v3641_v4 = vadd.f32 %v7230_v9, %v3627_v3 }
 0x322   :  { %v5989_v40 = vld [vmem:[#allocation5 + $0xd78] sm:$0xf0] }
 0x323   :  { %v6804_v39 = vld [vmem:[#allocation5 + $0xf5c] sm:$0xf]  ;;  %v5992_v53 = vor.u32 %v6740_v0, %v5989_v40  ;;  %4051 = vmatpush.bf16.msrb.mxu1 %v5736_v49  ;;  %v3738_v0 = vpop.f32.mrf.mxu2 }
 0x324   :  { %v6245_v20 = vld [vmem:[#allocation5 + $0xf78] sm:$0xf0] }
 0x325   :  { %v6604_v62 = vld [vmem:[#allocation5 + $0x91c] sm:$0xf]  ;;  %v6248_v27 = vor.u32 %v6804_v39, %v6245_v20  ;;  %4065 = vmatpush.bf16.msrb.mxu2 %v5992_v53 }
 0x326   :  { %v5445_v50 = vld [vmem:[#allocation5 + $0x938] sm:$0xf0] }
 0x327   :  { %v6668_v25 = vld [vmem:[#allocation5 + $0xb1c] sm:$0xf]  ;;  %v5448_v28 = vor.u32 %v6604_v62, %v5445_v50  ;;  %4079 = vmatpush.bf16.msrb.mxu3 %v6248_v27 }
 0x328   :  { %v5701_v16 = vld [vmem:[#allocation5 + $0xb38] sm:$0xf0] }
 0x329   :  { %v6732_v21 = vld [vmem:[#allocation5 + $0xd1c] sm:$0xf]  ;;  %v5704_v8 = vor.u32 %v6668_v25, %v5701_v16  ;;  %4038 = vmatpush.bf16.msrb.mxu0 %v5448_v28  ;;  %v3739_v25 = vadd.f32 %v3738_v0, %v3725_v7  ;;  %v7376_v16 = vld [vmem:[#allocation23_spill] sm:$0xff] }
 0x32a   :  { %v5957_v14 = vld [vmem:[#allocation5 + $0xd38] sm:$0xf0] }
 0x32b   :  { %v6796_v32 = vld [vmem:[#allocation5 + $0xf1c] sm:$0xf]  ;;  %v5960_v41 = vor.u32 %v6732_v21, %v5957_v14  ;;  %4052 = vmatpush.bf16.msrb.mxu1 %v5704_v8  ;;  %v3737_v21 = vadd.f32 %v7277_v57, %v3723_v42  ;;  %v3778_v8 = vpop.f32.mrf.mxu1  ;;  %v3753_v57 = vadd.f32 %v3752_v29, %v3739_v25  ;;  %v3792_v0 = vpop.f32.mrf.mxu2  ;;  %v7381_v29 = vld [vmem:[#allocation17_spill] sm:$0xff] }
 0x32c   :  { %v6213_v43 = vld [vmem:[#allocation5 + $0xf38] sm:$0xf0] }
 0x32d   :  { %v7367_v52 = vld [vmem:[#allocation24_spill] sm:$0xff]  ;;  %v6216_v46 = vor.u32 %v6796_v32, %v6213_v43  ;;  %4066 = vmatpush.bf16.msrb.mxu2 %v5960_v41  ;;  %v7377_v41 = vld [vmem:[#allocation26_spill] sm:$0xff] }
 0x32e   :  { %v3403_v37 = vadd.f32 %v7367_v52, %v3389_v13  ;;  %v6596_v44 = vld [vmem:[#allocation5 + $0x8dc] sm:$0xf] }
 0x32f   :  { %v5413_v5 = vld [vmem:[#allocation5 + $0x8f8] sm:$0xf0]  ;;  %4080 = vmatpush.bf16.msrb.mxu3 %v6216_v46 }
 0x330   :  { %v6660_v38 = vld [vmem:[#allocation5 + $0xadc] sm:$0xf]  ;;  %v5416_v40 = vor.u32 %v6596_v44, %v5413_v5  ;;  %v3417_v19 = vadd.f32 %v7372_v18, %v3403_v37  ;;  %v3766_v18 = vpop.f32.mrf.mxu0 }
 0x331   :  { %v7368_v45 = vld [vmem:[#allocation28_spill] sm:$0xff] }
 0x332   :  { %v3501_v55 = vadd.f32 %v7368_v45, %v3487_v58  ;;  %v7369_v34 = vld [vmem:[#allocation32_spill] sm:$0xff]  ;;  %4039 = vmatpush.bf16.msrb.mxu0 %v5416_v40 }
 0x333   :  { %v3611_v47 = vadd.f32 %v7369_v34, %v3597_v17  ;;  %v5669_v23 = vld [vmem:[#allocation5 + $0xaf8] sm:$0xf0] }
 0x334   :  { %v6724_v12 = vld [vmem:[#allocation5 + $0xcdc] sm:$0xf]  ;;  %v3515_v22 = vadd.f32 %v7371_v24, %v3501_v55  ;;  %v5672_v48 = vor.u32 %v6660_v38, %v5669_v23  ;;  %v7378_v38 = vld [vmem:[#allocation34_spill] sm:$0xff] }
 0x335   :  { %v5925_v51 = vld [vmem:[#allocation5 + $0xcf8] sm:$0xf0]  ;;  %v3625_v49 = vadd.f32 %v7373_v1, %v3611_v47  ;;  %v624_v45 = vperm.slane %v7378_v38, 5 }
 0x336   :  { %v6788_v60 = vld [vmem:[#allocation5 + $0xedc] sm:$0xf]  ;;  %v5928_v39 = vor.u32 %v6724_v12, %v5925_v51  ;;  %v3529_v17 = vadd.f32 %v7375_v33, %v3515_v22  ;;  %4053 = vmatpush.bf16.msrb.mxu1 %v5672_v48 }
 0x337   :  { %v6181_v2 = vld [vmem:[#allocation5 + $0xef8] sm:$0xf0]  ;;  %v3639_v37 = vadd.f32 %v7218_v61, %v3625_v49  ;;  %v3751_v61 = vadd.f32 %v7289_v35, %v3737_v21  ;;  %v3765_v35 = vadd.f32 %v3764_v26, %v624_v45 }
 0x338   :  { %v6588_v20 = vld [vmem:[#allocation5 + $0x89c] sm:$0xf]  ;;  %v6184_v53 = vor.u32 %v6788_v60, %v6181_v2  ;;  %4067 = vmatpush.bf16.msrb.mxu2 %v5928_v39  ;;  %v3806_v39 = vpop.f32.mrf.mxu3  ;;  %v3820_v26 = vpop.f32.mrf.mxu0 }
 0x339   :  { %v5381_v13 = vld [vmem:[#allocation5 + $0x8b8] sm:$0xf0]  ;;  %v3779_v1 = vadd.f32 %v3778_v8, %v3765_v35 }
 0x33a   :  { %v6652_v31 = vld [vmem:[#allocation5 + $0xa9c] sm:$0xf]  ;;  %v5384_v27 = vor.u32 %v6588_v20, %v5381_v13  ;;  %4081 = vmatpush.bf16.msrb.mxu3 %v6184_v53  ;;  %v3780_v53 = vpop.f32.mrf.mxu1 }
 0x33b   :  { %v5637_v10 = vld [vmem:[#allocation5 + $0xab8] sm:$0xf0] }
 0x33c   :  { %v6716_v62 = vld [vmem:[#allocation5 + $0xc9c] sm:$0xf]  ;;  %v5640_v14 = vor.u32 %v6652_v31, %v5637_v10  ;;  %4040 = vmatpush.bf16.msrb.mxu0 %v5384_v27  ;;  %v7382_v27 = vld [vmem:[#allocation19_spill] sm:$0xff] }
 0x33d   :  { %v5893_v15 = vld [vmem:[#allocation5 + $0xcb8] sm:$0xf0] }
 0x33e   :  { %v7374_v50 = vld [vmem:[#allocation20_spill] sm:$0xff]  ;;  %v5896_v30 = vor.u32 %v6716_v62, %v5893_v15  ;;  %4054 = vmatpush.bf16.msrb.mxu1 %v5640_v14 }
 0x33f   :  { %6836 = vtanh.f32 %v7374_v50  ;;  %v6780_v11 = vld [vmem:[#allocation5 + $0xe9c] sm:$0xf] }
 0x340   :  { %v6149_v58 = vld [vmem:[#allocation5 + $0xeb8] sm:$0xf0]  ;;  %6838 = vtanh.f32 %v3305_v63  ;;  %4068 = vmatpush.bf16.msrb.mxu2 %v5896_v30  ;;  %v3808_v14 = vpop.f32.mrf.mxu3 }
 0x341   :  { %6840 = vtanh.f32 %v7376_v16  ;;  %v6580_v32 = vld [vmem:[#allocation5 + $0x85c] sm:$0xf]  ;;  %v6152_v9 = vor.u32 %v6780_v11, %v6149_v58  ;;  %v3767_v11 = vadd.f32 %v3766_v18, %v624_v45  ;;  %v3793_v58 = vadd.f32 %v3792_v0, %v3779_v1  ;;  %v3794_v16 = vpop.f32.mrf.mxu2 }
 0x342   :  { %v5349_v43 = vld [vmem:[#allocation5 + $0x878] sm:$0xf0]  ;;  %6842 = vtanh.f32 %v3417_v19 }
 0x343   :  { %v6644_v52 = vld [vmem:[#allocation5 + $0xa5c] sm:$0xf]  ;;  %6844 = vtanh.f32 %v7377_v41  ;;  %v5352_v55 = vor.u32 %v6580_v32, %v5349_v43  ;;  %4082 = vmatpush.bf16.msrb.mxu3 %v6152_v9  ;;  %v3781_v21 = vadd.f32 %v3780_v53, %v3767_v11  ;;  %v3807_v30 = vadd.f32 %v3806_v39, %v3793_v58  ;;  %v3834_v32 = vpop.f32.mrf.mxu1 }
 0x344   :  { %v5605_v36 = vld [vmem:[#allocation5 + $0xa78] sm:$0xf0]  ;;  %6846 = vtanh.f32 %v3529_v17 }
 0x345   :  { %v6708_v28 = vld [vmem:[#allocation5 + $0xc5c] sm:$0xf]  ;;  %v6837_v34 = vpop.eup %6836  ;;  %6848 = vtanh.f32 %v3641_v4  ;;  %v5608_v47 = vor.u32 %v6644_v52, %v5605_v36  ;;  %4041 = vmatpush.bf16.msrb.mxu0 %v5352_v55  ;;  %v7380_v4 = vld [vmem:[#allocation18_spill] sm:$0xff]  ;;  %v3795_v43 = vadd.f32 %v3794_v16, %v3781_v21  ;;  %v3821_v52 = vadd.f32 %v3820_v26, %v3807_v30 }
 0x346   :  { %v5861_v59 = vld [vmem:[#allocation5 + $0xc78] sm:$0xf0]  ;;  %v6839_v12 = vpop.eup %6838  ;;  %6850 = vtanh.f32 %v3639_v37 }
 0x347   :  { %v6772_v44 = vld [vmem:[#allocation5 + $0xe5c] sm:$0xf]  ;;  %v5864_v6 = vor.u32 %v6708_v28, %v5861_v59  ;;  %v6841_v2 = vpop.eup %6840  ;;  %6852 = vtanh.f32 %v3753_v57  ;;  %4055 = vmatpush.bf16.msrb.mxu1 %v5608_v47  ;;  %v4108_v49 = vpack.c.bf16 %v6839_v12, %v6837_v34  ;;  %v3809_v37 = vadd.f32 %v3808_v14, %v3795_v43  ;;  %v3822_v28 = vpop.f32.mrf.mxu0 }
 0x348   :  { %v6117_v5 = vld [vmem:[#allocation5 + $0xe78] sm:$0xf0]  ;;  %v6843_v3 = vpop.eup %6842  ;;  %6854 = vtanh.f32 %v3751_v61  ;;  %v3835_v9 = vadd.f32 %v3834_v32, %v3821_v52  ;;  %v3862_v59 = vpop.f32.mrf.mxu3  ;;  %v625_v12 = vperm.slane %v7378_v38, 6  ;;  %v626_v32 = vperm.slane %v7378_v38, 7  ;;  %v4116_v38 = vld [vmem:[%s7328_s4] sm:$0x3] }
 0x349   :  { %v6572_v54 = vld [vmem:[#allocation5 + $0x81c] sm:$0xf]  ;;  %v6120_v51 = vor.u32 %v6772_v44, %v6117_v5  ;;  %v6845_v40 = vpop.eup %6844  ;;  %4069 = vmatpush.bf16.msrb.mxu2 %v5864_v6  ;;  %v4109_v62 = vpack.c.bf16 %v6843_v3, %v6841_v2  ;;  %v3848_v36 = vpop.f32.mrf.mxu2  ;;  %v3823_v8 = vadd.f32 %v3822_v28, %v3809_v37  ;;  %s7007_s4 = smov [#allocation10]  }
 0x34a   :  { %v5317_v46 = vld [vmem:[#allocation5 + $0x838] sm:$0xf0]  ;;  %v6847_v20 = vpop.eup %6846  ;;  %v3849_v41 = vadd.f32 %v3848_v36, %v3835_v9  ;;  %s4251_s15 = sshll.u32 %s7007_s4, 4  ;;  %s4252_s15 = int_to_ptr.vmem [resolvable:$true] %s4251_s15 }
 0x34b   :  { %v6636_v23 = vld [vmem:[#allocation5 + $0xa1c] sm:$0xf]  ;;  %v5320_v42 = vor.u32 %v6572_v54, %v5317_v46  ;;  %4083 = vmatpush.bf16.msrb.mxu3 %v6120_v51  ;;  %v6849_v31 = vpop.eup %6848  ;;  %v4110_v15 = vpack.c.bf16 %v6847_v20, %v6845_v40  ;;  %v3836_v57 = vpop.f32.mrf.mxu1 }
 0x34c   :  { %v5573_v56 = vld [vmem:[#allocation5 + $0xa38] sm:$0xf0]  ;;  %v6851_v19 = vpop.eup %6850  ;;  %v3837_v44 = vadd.f32 %v3836_v57, %v3823_v8  ;;  %v3863_v5 = vadd.f32 %v3862_v59, %v3849_v41 }
 0x34d   :  { %v6700_v63 = vld [vmem:[#allocation5 + $0xc1c] sm:$0xf]  ;;  %v5576_v7 = vor.u32 %v6636_v23, %v5573_v56  ;;  %4042 = vmatpush.bf16.msrb.mxu0 %v5320_v42  ;;  %v6853_v10 = vpop.eup %6852  ;;  %v4111_v50 = vpack.c.bf16 %v6849_v31, %v6851_v19 }
 0x34e   :  { %v5829_v60 = vld [vmem:[#allocation5 + $0xc38] sm:$0xf0]  ;;  %v6855_v25 = vpop.eup %6854  ;;  %6856 = vtanh.f32 %v3863_v5 }
 0x34f   :  { %v6764_v24 = vld [vmem:[#allocation5 + $0xe1c] sm:$0xf]  ;;  %v5832_v48 = vor.u32 %v6700_v63, %v5829_v60  ;;  %4056 = vmatpush.bf16.msrb.mxu1 %v5576_v7  ;;  %v4112_v17 = vpack.c.bf16 %v6853_v10, %v6855_v25  ;;  %v3876_v46 = vpop.f32.mrf.mxu0 }
 0x350   :  { %v6085_v22 = vld [vmem:[#allocation5 + $0xe38] sm:$0xf0]  ;;  %v3864_v34 = vpop.f32.mrf.mxu3  ;;  %v3877_v51 = vadd.f32 %v3876_v46, %v625_v12 }
 0x351   :  { %v6088_v13 = vor.u32 %v6764_v24, %v6085_v22  ;;  %4070 = vmatpush.bf16.msrb.mxu2 %v5832_v48  ;;  %4147 = vmatpush.bf16.xpose.msra.mxu0 %v4108_v49  ;;  %v7379_v33 = vld [vmem:[#allocation16_spill] sm:$0xff]  ;;  %v3850_v45 = vpop.f32.mrf.mxu2 }
 0x352   :  { %4043 = vmatmul.bf16.vlgmr.msrb.gmra.mxu0 %v7379_v33  ;;  %4057 = vmatmul.bf16.vlgmr.msrb.gmra.mxu1 %v7380_v4  ;;  %v3851_v55 = vadd.f32 %v3850_v45, %v3837_v44  ;;  %v7006_v45 = vmov 0  }
 0x353   :  { %4084 = vmatpush.bf16.msrb.mxu3 %v6088_v13  ;;  %4160 = vmatpush.bf16.xpose.msra.mxu1 %v4109_v62  ;;  %v3890_v23 = vpop.f32.mrf.mxu1 }
 0x354   :  { %4071 = vmatmul.bf16.vlgmr.msrb.gmra.mxu2 %v7381_v29  ;;  %v3865_v61 = vadd.f32 %v3864_v34, %v3851_v55  ;;  %v6857_v47 = vpop.eup %6856  ;;  %v3891_v2 = vadd.f32 %v3890_v23, %v3877_v51  ;;  %v4107_v29 = vld [vmem:[#allocation8] sm:$0xff]  ;;  %6835 = vset.pattern.permute.xlu0 %v7006_v45 }
 0x355   :  { %4173 = vmatpush.bf16.xpose.msra.mxu2 %v4110_v15  ;;  %4123 = vst [vmem:[#allocation1] ss:$9 sm:$0xff] %v4107_v29  ;;  %4119 = vperm.xlu0 %6835, %v4116_v38  }
 0x356   :  { %4085 = vmatmul.bf16.vlgmr.msrb.gmra.mxu3 %v7382_v27  ;;  %6858 = vtanh.f32 %v3865_v61 }
 0x357   :  { %4186 = vmatpush.bf16.xpose.msra.mxu3 %v4111_v50  ;;  %v3878_v60 = vpop.f32.mrf.mxu0 }
 0x358   :  { %v3918_v63 = vpop.f32.mrf.mxu3  ;;  %v3879_v22 = vadd.f32 %v3878_v60, %v625_v12 }
 0x359   :  { %4199 = vmatpush.bf16.xpose.msrb.mxu0 %v4112_v17  ;;  %v3904_v56 = vpop.f32.mrf.mxu2 }
 0x35a   :  { %v3905_v3 = vadd.f32 %v3904_v56, %v3891_v2 }
 0x35b   :  { %v3892_v24 = vpop.f32.mrf.mxu1 }
 0x35c   :  { %v6859_v6 = vpop.eup %6858  ;;  %v3893_v42 = vadd.f32 %v3892_v24, %v3879_v22  ;;  %v3919_v40 = vadd.f32 %v3918_v63, %v3905_v3  ;;  %v4126_v27 = vld [vmem:[#allocation1 + $0x12] sm:$0xff]  ;;  %v4124_v16 = vld [vmem:[#allocation1] sm:$0xff]  ;;  %v4125_v30 = vld [vmem:[#allocation1 + $0x9] sm:$0xff] }
 0x35d   :  { %v4113_v54 = vpack.c.bf16 %v6859_v6, %v6857_v47  ;;  %v4127_v21 = vld [vmem:[#allocation1 + $0x1b] sm:$0xff]  ;;  %v4128_v41 = vld [vmem:[#allocation1 + $0x24] sm:$0xff]  ;;  %v4129_v57 = vld [vmem:[#allocation1 + $0x2d] sm:$0xff] }
 0x35e   :  { %v4130_v36 = vld [vmem:[#allocation1 + $0x36] sm:$0xff] }
 0x35f   :  { %4212 = vmatpush.bf16.xpose.msrb.mxu1 %v4113_v54  ;;  %v3932_v7 = vpop.f32.mrf.mxu0 }
 0x360   :  { %v3920_v0 = vpop.f32.mrf.mxu3  ;;  %v3933_v20 = vadd.f32 %v3932_v7, %v3919_v40 }
 0x361   :  { %v3906_v35 = vpop.f32.mrf.mxu2 }
 0x362   :  { %v3907_v39 = vadd.f32 %v3906_v35, %v3893_v42  ;;  %4148 = vmatmul.bf16.vlgmr.msra.gmra.mxu0 %v4124_v16  ;;  %4161 = vmatmul.bf16.vlgmr.msra.gmra.mxu1 %v4125_v30 }
 0x363   :  { %v3946_v48 = vpop.f32.mrf.mxu1 }
 0x364   :  { %v3921_v13 = vadd.f32 %v3920_v0, %v3907_v39  ;;  %v3947_v31 = vadd.f32 %v3946_v48, %v3933_v20  ;;  %4174 = vmatmul.bf16.vlgmr.msra.gmra.mxu2 %v4126_v27  ;;  %v4131_v20 = vld [vmem:[#allocation1 + $0x3f] sm:$0xff] }
 0x366   :  { %4187 = vmatmul.bf16.vlgmr.msra.gmra.mxu3 %v4127_v21 }
 0x367   :  { %v3934_v19 = vpop.f32.mrf.mxu0 }
 0x368   :  { %v3935_v49 = vadd.f32 %v3934_v19, %v3921_v13 }
 0x369   :  { %v3960_v18 = vpop.f32.mrf.mxu2 }
 0x36a   :  { %v3974_v1 = vpop.f32.mrf.mxu3  ;;  %v3961_v53 = vadd.f32 %v3960_v18, %v3947_v31 }
 0x36b   :  { %v3948_v10 = vpop.f32.mrf.mxu1 }
 0x36c   :  { %v3949_v62 = vadd.f32 %v3948_v10, %v3935_v49  ;;  %v3975_v15 = vadd.f32 %v3974_v1, %v3961_v53 }
 0x36e   :  { %6860 = vtanh.f32 %v3975_v15 }
 0x371   :  { %v3962_v50 = vpop.f32.mrf.mxu2 }
 0x372   :  { %v3963_v25 = vadd.f32 %v3962_v50, %v3949_v62  ;;  %v3976_v11 = vpop.f32.mrf.mxu3  ;;  %4200 = vmatmul.bf16.vlgmr.msrb.gmra.mxu0 %v4128_v41  ;;  %4213 = vmatmul.bf16.vlgmr.msrb.gmra.mxu1 %v4129_v57 }
 0x374   :  { %v3977_v58 = vadd.f32 %v3976_v11, %v3963_v25  ;;  %v6861_v33 = vpop.eup %6860 }
 0x376   :  { %6862 = vtanh.f32 %v3977_v58 }
 0x37c   :  { %v6863_v17 = vpop.eup %6862 }
 0x37d   :  { %v4114_v4 = vpack.c.bf16 %v6863_v17, %v6861_v33 }
 0x37f   :  { %4225 = vmatpush.bf16.xpose.msrb.mxu2 %v4114_v4 }
 0x386   :  { %4226 = vmatmul.bf16.vlgmr.msrb.gmra.mxu2 %v4130_v36 }
 0x389   :  { %v3988_v14 = vpop.f32.mrf.mxu0 }
 0x38a   :  { %v3989_v37 = vadd.f32 %v3988_v14, %v626_v32 }
 0x38f   :  { %v4002_v26 = vpop.f32.mrf.mxu1 }
 0x390   :  { %v4003_v28 = vadd.f32 %v4002_v26, %v3989_v37 }
 0x391   :  { %v3990_v9 = vpop.f32.mrf.mxu0 }
 0x392   :  { %v3991_v8 = vadd.f32 %v3990_v9, %v626_v32 }
 0x393   :  { %v4016_v43 = vpop.f32.mrf.mxu2 }
 0x394   :  { %v4017_v44 = vadd.f32 %v4016_v43, %v4003_v28 }
 0x395   :  { %v4030_v52 = vpop.f32.mrf.mxu3 }
 0x396   :  { %v4031_v47 = vadd.f32 %v4030_v52, %v4017_v44 }
 0x397   :  { %v4004_v59 = vpop.f32.mrf.mxu1 }
 0x398   :  { %v4005_v55 = vadd.f32 %v4004_v59, %v3991_v8 }
 0x39b   :  { %v4018_v5 = vpop.f32.mrf.mxu2 }
 0x39c   :  { %v4019_v54 = vadd.f32 %v4018_v5, %v4005_v55 }
 0x39d   :  { %v4032_v34 = vpop.f32.mrf.mxu3 }
 0x39e   :  { %v4033_v12 = vadd.f32 %v4032_v34, %v4019_v54 }
 0x3c7   :  { %v4120_v33 = vpop.permute.xlu0 %4119 }
 0x3cf   :  { %v4044_v61 = vpop.f32.mrf.mxu0  ;;  %v4058_v6 = vpop.f32.mrf.mxu1 }
 0x3d0   :  { %v4045_v46 = vadd.f32 %v4044_v61, %v4031_v47 }
 0x3d2   :  { %v4059_v63 = vadd.f32 %v4058_v6, %v4045_v46 }
 0x3d7   :  { %v4072_v23 = vpop.f32.mrf.mxu2  ;;  %v4046_v56 = vpop.f32.mrf.mxu0 }
 0x3d8   :  { %v4047_v60 = vadd.f32 %v4046_v56, %v4033_v12  ;;  %v4073_v2 = vadd.f32 %v4072_v23, %v4059_v63  ;;  %v4060_v24 = vpop.f32.mrf.mxu1 }
 0x3d9   :  { %v4086_v51 = vpop.f32.mrf.mxu3 }
 0x3da   :  { %v4061_v22 = vadd.f32 %v4060_v24, %v4047_v60  ;;  %v4087_v3 = vadd.f32 %v4086_v51, %v4073_v2 }
 0x3dc   :  { %6864 = vtanh.f32 %v4087_v3 }
 0x3df   :  { %v4074_v35 = vpop.f32.mrf.mxu2  ;;  %v4149_v13 = vpop.f32.mrf.mxu0 }
 0x3e0   :  { %v4075_v42 = vadd.f32 %v4074_v35, %v4061_v22  ;;  %v4162_v31 = vpop.f32.mrf.mxu1  ;;  %v4150_v17 = vadd.f32 %v4149_v13, %v4120_v33 }
 0x3e1   :  { %v4088_v0 = vpop.f32.mrf.mxu3 }
 0x3e2   :  { %v4089_v40 = vadd.f32 %v4088_v0, %v4075_v42  ;;  %v6865_v7 = vpop.eup %6864  ;;  %v4163_v4 = vadd.f32 %v4162_v31, %v4150_v17 }
 0x3e4   :  { %6866 = vtanh.f32 %v4089_v40 }
 0x3e7   :  { %v4175_v18 = vpop.f32.mrf.mxu2  ;;  %v4151_v1 = vpop.f32.mrf.mxu0 }
 0x3e8   :  { %v4164_v49 = vpop.f32.mrf.mxu1  ;;  %v4176_v29 = vadd.f32 %v4175_v18, %v4163_v4 }
 0x3e9   :  { %v4188_v19 = vpop.f32.mrf.mxu3 }
 0x3ea   :  { %v6867_v48 = vpop.eup %6866  ;;  %v4189_v27 = vadd.f32 %v4188_v19, %v4176_v29 }
 0x3eb   :  { %v4115_v39 = vpack.c.bf16 %v6867_v48, %v6865_v7 }
 0x3ed   :  { %4238 = vmatpush.bf16.xpose.msrb.mxu3 %v4115_v39 }
 0x3ef   :  { %v4177_v53 = vpop.f32.mrf.mxu2  ;;  %v4201_v62 = vpop.f32.mrf.mxu0 }
 0x3f0   :  { %v4214_v15 = vpop.f32.mrf.mxu1  ;;  %v4202_v16 = vadd.f32 %v4201_v62, %v4189_v27 }
 0x3f1   :  { %v4190_v10 = vpop.f32.mrf.mxu3 }
 0x3f2   :  { %v4215_v21 = vadd.f32 %v4214_v15, %v4202_v16 }
 0x3f4   :  { %4239 = vmatmul.bf16.vlgmr.msrb.gmra.mxu3 %v4131_v20 }
 0x3f7   :  { %v4203_v25 = vpop.f32.mrf.mxu0 }
 0x3f8   :  { %v4216_v11 = vpop.f32.mrf.mxu1 }
 0x409   :  { %v4227_v50 = vpop.f32.mrf.mxu2 }
 0x40a   :  { %v4228_v14 = vadd.f32 %v4227_v50, %v4215_v21 }
 0x411   :  { %v4229_v58 = vpop.f32.mrf.mxu2 }
 0x477   :  { %v4240_v30 = vpop.f32.mrf.mxu3 }
 0x478   :  { %v4241_v26 = vadd.f32 %v4240_v30, %v4228_v14 }
 0x47a   :  { %4245 = vst.msk [vmem:[#allocation10] sm:$0x3] %vm4244_vm0, %v4241_v26 }
 0x47b   :  { %4256 = dma.vmem_to_hbm [thread:$0]  %s4252_s15, 32, %s4254_s18, [#allocation4]  }
 0x47f   :  { %v4242_v32 = vpop.f32.mrf.mxu3 }
 0x480   :  { %6996 = dma.done.wait [#allocation4], 32  }
 0x481   :  { %6997 = vsyncadd [#allocation4], 4294967264 }
 0x482   :  { %4261 = vsyncpa [#allocation3], 1 }
 0x483   :  { %4262 = vsyncpa [#allocation6], 1 }
 0x484   :  { %4263 = vsyncpa [#allocation9], 1 }
 0x485   :  { %4264 = vsyncpa [#allocation4], 1 }

</bundles_post_ra>
